<compile_context>
chip_gen: v7x
topology: tpu7x:2x2x1
jax: 0.10.0
libtpu: 0.0.40
codegen_flags: <defaults>
</compile_context>

<pallas_src>
import functools
import math

import numpy as np
import jax
import jax.numpy as jnp
from jax.experimental import pallas as pl
from jax.experimental.pallas import tpu as pltpu

POOL_SCALES = [1, 2, 3, 6]
_LANE = 128                         # lane width -> channel/N padding target
_VMEM_LIMIT = 48 * 1024 * 1024      # sized for v7x (64 MiB phys); fine on v5e/v6e


def _round_up(x, m):
    return -(-x // m) * m


def _cparams(*semantics):
    return pltpu.CompilerParams(dimension_semantics=tuple(semantics),
                                vmem_limit_bytes=_VMEM_LIMIT)


# --------------------------------------------------------------------------- #
# Kernel 1: tiled fused matmul + per-column affine (+ optional ReLU)
#   grid = (M tiles, N tiles, K tiles); f32 accumulator in VMEM scratch.
# --------------------------------------------------------------------------- #
def _matmul_affine_kernel(x_ref, w_ref, s_ref, b_ref, o_ref, acc_ref, *, relu):
    @pl.when(pl.program_id(2) == 0)
    def _init():
        acc_ref[...] = jnp.zeros_like(acc_ref)

    acc_ref[...] += jnp.dot(x_ref[...], w_ref[...],
                            preferred_element_type=jnp.float32)

    @pl.when(pl.program_id(2) == pl.num_programs(2) - 1)
    def _finalize():
        out = acc_ref[...] * s_ref[...] + b_ref[...]
        if relu:
            out = jnp.maximum(out, 0.0)
        o_ref[...] = out


def matmul_affine(x, w, scale, bias, relu=False, keep_padded_n=False,
                  tile_m=256, tile_n=256, tile_k=512):
    """optional_relu((x @ w) * scale + bias); bf16 MXU operands, f32 epilogue."""
    M, K = x.shape
    K2, N = w.shape
    assert K == K2
    scale = jnp.asarray(scale).reshape(-1)
    bias = jnp.asarray(bias).reshape(-1)

    tm = min(tile_m, _round_up(M, 16))        # bf16 sublane packing -> 16
    tn = min(tile_n, _round_up(N, _LANE))     # lane-dense output
    tk = min(tile_k, _round_up(K, _LANE))
    Mp, Np, Kp = _round_up(M, tm), _round_up(N, tn), _round_up(K, tk)

    if (Mp, Kp) != (M, K):
        x = jnp.pad(x, ((0, Mp - M), (0, Kp - K)))
    if (Kp, Np) != (K, N):
        w = jnp.pad(w, ((0, Kp - K), (0, Np - N)))
    if Np != N:
        scale = jnp.pad(scale, (0, Np - N))
        bias = jnp.pad(bias, (0, Np - N))

    grid = (Mp // tm, Np // tn, Kp // tk)
    out = pl.pallas_call(
        functools.partial(_matmul_affine_kernel, relu=relu),
        out_shape=jax.ShapeDtypeStruct((Mp, Np), jnp.float32),
        grid=grid,
        in_specs=[
            pl.BlockSpec((tm, tk), lambda i, j, k: (i, k)),
            pl.BlockSpec((tk, tn), lambda i, j, k: (k, j)),
            pl.BlockSpec((1, tn), lambda i, j, k: (0, j)),
            pl.BlockSpec((1, tn), lambda i, j, k: (0, j)),
        ],
        out_specs=pl.BlockSpec((tm, tn), lambda i, j, k: (i, j)),
        scratch_shapes=[pltpu.VMEM((tm, tn), jnp.float32)],
        compiler_params=_cparams("parallel", "parallel", "arbitrary"),
        cost_estimate=pl.CostEstimate(
            flops=2 * Mp * Np * Kp, transcendentals=0,
            bytes_accessed=Mp * Kp * 2 + Kp * Np * 2 + Mp * Np * 4),
    )(x.astype(jnp.bfloat16), w.astype(jnp.bfloat16),
      scale.reshape(1, Np).astype(jnp.float32),
      bias.reshape(1, Np).astype(jnp.float32))

    out = out[:M]
    if not keep_padded_n:
        out = out[:, :N]
    return out


# --------------------------------------------------------------------------- #
# Backbone stand-in conv (stride 4) via im2col glue + the tiled matmul kernel.
# (Called once on the 3-channel input; the big 3x3 head conv does NOT use im2col.)
# --------------------------------------------------------------------------- #
def conv_im2col(x, w_pt, scale, bias, stride, pad, relu):
    Cout, Cin, k, _ = w_pt.shape
    B, H, W, C = x.shape
    assert C == Cin
    xp = jnp.pad(x, ((0, 0), (pad, pad), (pad, pad), (0, 0)))
    Ho = (H + 2 * pad - k) // stride + 1
    Wo = (W + 2 * pad - k) // stride + 1
    cols = []
    for dy in range(k):
        for dx in range(k):
            cols.append(jax.lax.slice(
                xp, (0, dy, dx, 0),
                (B, dy + stride * (Ho - 1) + 1, dx + stride * (Wo - 1) + 1, Cin),
                (1, stride, stride, 1)))
    patches = jnp.concatenate(cols, axis=-1).reshape(B * Ho * Wo, k * k * Cin)
    wmat = jnp.transpose(w_pt, (2, 3, 1, 0)).reshape(k * k * Cin, Cout)
    out = matmul_affine(patches, wmat, scale, bias, relu=relu, keep_padded_n=True)
    return out.reshape(B, Ho, Wo, -1)          # channel-padded (zeros) to 128


# --------------------------------------------------------------------------- #
# Kernel 2: fully fused PSP head (one image per grid step)
#   PyramidPooling:  pooling matrix @ f_flat -> 1x1 ConvBnRelu -> upsample matrix
#   branch slab written into a padded bf16 VMEM scratch (implicit concat, no HBM)
#   3x3 head ConvBnRelu: 9 taps, static slices, bf16 MXU dots, f32 accumulator
#   Dropout2d(0.1): identity at inference
#   1x1 classifier conv (+bias) fused with the final bilinear upsample matrix.
# --------------------------------------------------------------------------- #
def _psp_head_kernel(*refs, num_scales, ksize, pad):
    xf_ref = refs[0]                                   # (1, Hp, Wp, Cf) padded feats
    p_refs = refs[1:1 + num_scales]                    # pooling matrices
    u_refs = refs[1 + num_scales:1 + 2 * num_scales]   # branch upsample matrices
    (pw_ref, ps_ref, pb_ref,
     wf_ref, wb_ref, hs_ref, hb_ref,
     cw_ref, cbias_ref, uf_ref,
     o_ref, xb_ref) = refs[1 + 2 * num_scales:]

    _, hp, wp, cf = xf_ref.shape
    hf, wf = hp - 2 * pad, wp - 2 * pad
    hw = hf * wf
    cb = xb_ref.shape[-1]
    cout = wf_ref.shape[-1]

    # ---- PyramidPooling: all 4 branches as small matmuls on the resident map ----
    f_flat = xf_ref[0, pad:pad + hf, pad:pad + wf, :].reshape(hw, cf)
    outs = []
    for i in range(num_scales):
        pooled = jnp.dot(p_refs[i][...], f_flat,
                         preferred_element_type=jnp.float32)           # (cells, Cf)
        z = jnp.dot(pooled, pw_ref[i], preferred_element_type=jnp.float32)
        z = jnp.maximum(z * ps_ref[i:i + 1, :] + pb_ref[i:i + 1, :], 0.0)
        outs.append(jnp.dot(u_refs[i][...], z,
                            preferred_element_type=jnp.float32))       # (HW, Cred)
    packed = jnp.concatenate(outs, axis=-1)                            # (HW, Cb)

    # ---- implicit concat: branch slab into padded bf16 VMEM scratch (no HBM) ----
    xb_ref[...] = jnp.zeros_like(xb_ref)
    xb_ref[pad:pad + hf, pad:pad + wf, :] = (
        packed.reshape(hf, wf, cb).astype(xb_ref.dtype))

    # ---- 3x3 head ConvBnRelu over implicit concat [backbone feats, branches] ----
    acc = jnp.zeros((hw, cout), jnp.float32)
    for dy in range(ksize):
        for dx in range(ksize):
            t = dy * ksize + dx
            pf = xf_ref[0, dy:dy + hf, dx:dx + wf, :].reshape(hw, cf)
            pb = xb_ref[dy:dy + hf, dx:dx + wf, :].reshape(hw, cb)
            acc = acc + jnp.dot(pf.astype(jnp.bfloat16), wf_ref[t],
                                preferred_element_type=jnp.float32)
            acc = acc + jnp.dot(pb, wb_ref[t],
                                preferred_element_type=jnp.float32)
    head = jnp.maximum(acc * hs_ref[...] + hb_ref[...], 0.0)
    # Dropout2d(0.1): identity at inference.

    # ---- 1x1 classifier conv + bilinear upsample to input resolution ----
    logits = jnp.dot(head, cw_ref[...], preferred_element_type=jnp.float32) + cbias_ref[...]
    up = jnp.dot(uf_ref[...], logits, preferred_element_type=jnp.float32)
    o_ref[...] = up.reshape(o_ref.shape)


def psp_head_fused(f, p_mats, u_mats, ppm_p, head_p, cls_p, u_fin, H, W):
    B, Hf, Wf, Cf = f.shape
    n = len(p_mats)
    kk = head_p["wf"].shape[0]
    k = int(round(math.sqrt(kk)))
    pad = (k - 1) // 2
    Cb = head_p["wb"].shape[1]
    ncls_pad = cls_p["w"].shape[-1]

    xf = jnp.pad(f, ((0, 0), (pad, pad), (pad, pad), (0, 0)))
    Hp, Wp = Hf + 2 * pad, Wf + 2 * pad
    HW = Hf * Wf

    in_specs = [pl.BlockSpec((1, Hp, Wp, Cf), lambda b: (b, 0, 0, 0))]
    in_specs += [pl.BlockSpec(m.shape, lambda b: (0, 0)) for m in p_mats]
    in_specs += [pl.BlockSpec(m.shape, lambda b: (0, 0)) for m in u_mats]
    in_specs += [pl.BlockSpec(ppm_p["w"].shape, lambda b: (0, 0, 0)),
                 pl.BlockSpec(ppm_p["scale"].shape, lambda b: (0, 0)),
                 pl.BlockSpec(ppm_p["bias"].shape, lambda b: (0, 0)),
                 pl.BlockSpec(head_p["wf"].shape, lambda b: (0, 0, 0)),
                 pl.BlockSpec(head_p["wb"].shape, lambda b: (0, 0, 0)),
                 pl.BlockSpec(head_p["scale"].shape, lambda b: (0, 0)),
                 pl.BlockSpec(head_p["bias"].shape, lambda b: (0, 0)),
                 pl.BlockSpec(cls_p["w"].shape, lambda b: (0, 0)),
                 pl.BlockSpec(cls_p["bias"].shape, lambda b: (0, 0)),
                 pl.BlockSpec(u_fin.shape, lambda b: (0, 0))]

    c_red = ppm_p["w"].shape[-1]
    flops = 2 * B * (
        sum(int(m.shape[0]) * HW * Cf for m in p_mats)                  # pooling
        + sum(int(m.shape[0]) * Cf * c_red for m in p_mats)             # 1x1 cbr
        + sum(HW * int(m.shape[1]) * c_red for m in u_mats)             # branch up
        + kk * HW * (Cf + Cb) * head_p["wf"].shape[-1]                  # 3x3 head
        + HW * cls_p["w"].shape[0] * ncls_pad                           # classifier
        + H * W * HW * ncls_pad)                                        # final up
    bytes_accessed = int(
        B * Hp * Wp * Cf * 4
        + head_p["wf"].size * 2 + head_p["wb"].size * 2
        + ppm_p["w"].size * 4 + cls_p["w"].size * 4 + u_fin.size * 4
        + B * H * W * ncls_pad * 4)

    return pl.pallas_call(
        functools.partial(_psp_head_kernel, num_scales=n, ksize=k, pad=pad),
        out_shape=jax.ShapeDtypeStruct((B, H, W, ncls_pad), jnp.float32),
        grid=(B,),
        in_specs=in_specs,
        out_specs=pl.BlockSpec((1, H, W, ncls_pad), lambda b: (b, 0, 0, 0)),
        scratch_shapes=[pltpu.VMEM((Hp, Wp, Cb), jnp.bfloat16)],
        compiler_params=_cparams("parallel"),
        cost_estimate=pl.CostEstimate(flops=flops, transcendentals=0,
                                      bytes_accessed=bytes_accessed),
    )(xf, *p_mats, *u_mats,
      ppm_p["w"], ppm_p["scale"], ppm_p["bias"],
      head_p["wf"], head_p["wb"], head_p["scale"], head_p["bias"],
      cls_p["w"], cls_p["bias"], u_fin)


# --------------------------------------------------------------------------- #
# Spatial operator matrices (numpy, built at trace time; tiny)
# --------------------------------------------------------------------------- #
def adaptive_avg_pool_matrix(in_size, out_size):
    mat = np.zeros((out_size, in_size), np.float32)
    for i in range(out_size):
        start = (i * in_size) // out_size
        end = math.ceil((i + 1) * in_size / out_size)
        mat[i, start:end] = 1.0 / (end - start)
    return mat


def bilinear_matrix(in_size, out_size):
    """F.interpolate(mode='bilinear', align_corners=True) as a 1-D matrix."""
    mat = np.zeros((out_size, in_size), np.float32)
    if out_size == 1:
        mat[0, 0] = 1.0
        return mat
    for o in range(out_size):
        src = o * (in_size - 1) / (out_size - 1)
        h0 = min(int(math.floor(src)), in_size - 1)
        h1 = min(h0 + 1, in_size - 1)
        f = src - h0
        mat[o, h0] += 1.0 - f
        mat[o, h1] += f
    return mat


def _pad_rows(m, mult=8):
    r = _round_up(m.shape[0], mult)
    return np.pad(m, ((0, r - m.shape[0]), (0, 0)))


def _pad_cols(m, mult=8):
    c = _round_up(m.shape[1], mult)
    return np.pad(m, ((0, 0), (0, c - m.shape[1])))


# --------------------------------------------------------------------------- #
# Parameters: deterministic synthetic init (PyTorch layout, BN folded to
# scale/bias with eps=1e-5), then a one-time prep into padded kernel layout.
# --------------------------------------------------------------------------- #
def init_pspnet_params(key, class_num, in_ch=3, fc_dim=64, red_dim=32, bn_eps=1e-5):
    keys = iter(jax.random.split(key, 64))
    nk = lambda: next(keys)

    def conv_w(cout, cin, k):
        fan_in = cin * k * k
        return jax.random.normal(nk(), (cout, cin, k, k), jnp.float32) / math.sqrt(fan_in)

    def folded_bn(c):
        gamma = 1.0 + 0.1 * jax.random.normal(nk(), (c,), jnp.float32)
        beta = 0.1 * jax.random.normal(nk(), (c,), jnp.float32)
        mean = 0.1 * jax.random.normal(nk(), (c,), jnp.float32)
        var = 0.5 + jax.random.uniform(nk(), (c,), jnp.float32)
        scale = gamma / jnp.sqrt(var + bn_eps)
        bias = beta - mean * scale
        return scale, bias

    params = {
        "backbone": {"w": conv_w(fc_dim, in_ch, 3), "affine": folded_bn(fc_dim)},
        "ppm": [{"w": conv_w(red_dim, fc_dim, 1), "affine": folded_bn(red_dim)}
                for _ in POOL_SCALES],
    }
    cat_dim = fc_dim + len(POOL_SCALES) * red_dim
    params["head_cbr"] = {"w": conv_w(red_dim, cat_dim, 3), "affine": folded_bn(red_dim)}
    params["cls"] = {
        "w": conv_w(class_num, red_dim, 1),
        "bias": 0.1 * jax.random.normal(nk(), (class_num,), jnp.float32),
    }
    return params


def prepare_params(raw, fc_dim, red_dim, class_num):
    """One-time channel padding / layout prep so no per-call weight padding is needed."""
    n = len(POOL_SCALES)
    cf_pad = _round_up(fc_dim, _LANE)          # 128
    chead_pad = _round_up(red_dim, _LANE)      # 128
    ncls_pad = _round_up(class_num, _LANE)     # 128
    cb = n * red_dim                           # 128 (packed branch slab)

    p = {"backbone": raw["backbone"]}

    # PPM branch 1x1 convs, stacked + input-channel padded (pad rows are zero).
    w_stack = jnp.zeros((n, cf_pad, red_dim), jnp.float32)
    s_stack = jnp.zeros((n, red_dim), jnp.float32)
    b_stack = jnp.zeros((n, red_dim), jnp.float32)
    for i, br in enumerate(raw["ppm"]):
        w_stack = w_stack.at[i, :fc_dim, :].set(br["w"][:, :, 0, 0].T)
        s_stack = s_stack.at[i].set(br["affine"][0])
        b_stack = b_stack.at[i].set(br["affine"][1])
    p["ppm"] = {"w": w_stack, "scale": s_stack, "bias": b_stack}

    # Head 3x3 conv: split the concat-input weights into the two channel-group
    # sources (backbone features / packed branch outputs); pad Cout -> 128.
    w_pt = raw["head_cbr"]["w"]                          # (red_dim, cat_dim, 3, 3)
    k = w_pt.shape[-1]
    wf = jnp.zeros((k * k, cf_pad, chead_pad), jnp.float32)
    wb = jnp.zeros((k * k, cb, chead_pad), jnp.float32)
    for dy in range(k):
        for dx in range(k):
            t = dy * k + dx
            wf = wf.at[t, :fc_dim, :red_dim].set(w_pt[:, :fc_dim, dy, dx].T)
            wb = wb.at[t, :, :red_dim].set(w_pt[:, fc_dim:, dy, dx].T)
    hs, hb = raw["head_cbr"]["affine"]
    p["head"] = {
        "wf": wf.astype(jnp.bfloat16), "wb": wb.astype(jnp.bfloat16),
        "scale": jnp.zeros((1, chead_pad), jnp.float32).at[0, :red_dim].set(hs),
        "bias": jnp.zeros((1, chead_pad), jnp.float32).at[0, :red_dim].set(hb),
    }

    # Classifier 1x1 conv (with bias), padded to lane-dense 128-wide output.
    wc = jnp.zeros((chead_pad, ncls_pad), jnp.float32)
    wc = wc.at[:red_dim, :class_num].set(raw["cls"]["w"][:, :, 0, 0].T)
    bc = jnp.zeros((1, ncls_pad), jnp.float32).at[0, :class_num].set(raw["cls"]["bias"])
    p["cls"] = {"w": wc, "bias": bc}
    return p


# --------------------------------------------------------------------------- #
# PSPNet forward
# --------------------------------------------------------------------------- #
def pspnet_forward(params, x_nchw, class_num):
    x = jnp.transpose(x_nchw, (0, 2, 3, 1)).astype(jnp.float32)   # NCHW -> NHWC
    B, H, W, _ = x.shape

    # TODO(synk): the real backbone is torchvision ResNet-101 (external `resnet`
    # module, not provided); a single stride-4 ConvBnRelu stand-in producing fc_dim
    # channels (padded to 128, pad channels exactly zero) is used instead.
    f = conv_im2col(x, params["backbone"]["w"], *params["backbone"]["affine"],
                    stride=4, pad=1, relu=True)                    # (B, Hf, Wf, 128)
    _, Hf, Wf, _ = f.shape

    # Spatial operators for the pyramid branches and the final upsample,
    # expressed as separable Kronecker-product matrices (trace-time constants).
    p_mats, u_mats = [], []
    for s in POOL_SCALES:
        pm = np.kron(adaptive_avg_pool_matrix(Hf, s), adaptive_avg_pool_matrix(Wf, s))
        um = np.kron(bilinear_matrix(s, Hf), bilinear_matrix(s, Wf))
        p_mats.append(jnp.asarray(_pad_rows(pm).astype(np.float32)))   # (cells_pad, Hf*Wf)
        u_mats.append(jnp.asarray(_pad_cols(um).astype(np.float32)))   # (Hf*Wf, cells_pad)
    u_fin = jnp.asarray(
        np.kron(bilinear_matrix(Hf, H), bilinear_matrix(Wf, W)).astype(np.float32))

    # ---- PyramidPooling + 3x3 head ConvBnRelu + 1x1 classifier + bilinear
    #      upsample, all fused into ONE kernel per image ----
    out = psp_head_fused(f, p_mats, u_mats, params["ppm"], params["head"],
                         params["cls"], u_fin, H, W)               # (B, H, W, 128)

    out = out[..., :class_num]                                     # drop lane padding
    return jnp.transpose(out, (0, 3, 1, 2))                        # back to NCHW


if __name__ == "__main__":
    class_num = 5
    key = jax.random.PRNGKey(0)
    kp, kx = jax.random.split(key)
    raw = init_pspnet_params(kp, class_num=class_num, in_ch=3, fc_dim=64, red_dim=32)
    params = prepare_params(raw, fc_dim=64, red_dim=32, class_num=class_num)
    x = jax.random.normal(kx, (2, 3, 32, 32), jnp.float32)

    fwd = jax.jit(functools.partial(pspnet_forward, class_num=class_num))
    out = fwd(params, x)
    out = jax.block_until_ready(out)

    assert out.shape == (2, class_num, 32, 32), out.shape
    assert bool(jnp.all(jnp.isfinite(out)))
    print("KERNEL_OK")
</pallas_src>

<mosaic_0001>
module attributes {stable_mosaic.version = 11 : i64} {
  func.func @_matmul_affine_kernel(%arg0: i32, %arg1: i32, %arg2: i32, %arg3: memref<128x128xbf16, #tpu.memory_space<vmem>>, %arg4: memref<128x128xbf16, #tpu.memory_space<vmem>>, %arg5: memref<1x128xf32, #tpu.memory_space<vmem>>, %arg6: memref<1x128xf32, #tpu.memory_space<vmem>>, %arg7: memref<128x128xf32, #tpu.memory_space<vmem>>, %arg8: memref<128x128xf32, #tpu.memory_space<vmem>>) attributes {dimension_semantics = [#tpu.dimension_semantics<parallel>, #tpu.dimension_semantics<parallel>, #tpu.dimension_semantics<arbitrary>], iteration_bounds = array<i64: 1, 1, 1>, scalar_prefetch = 0 : i64, scratch_operands = 1 : i64, tpu.core_type = #tpu.core_type<tc>, window_params = [{transform_indices = @transform_0, window_bounds = array<i64: 128, 128>}, {transform_indices = @transform_1, window_bounds = array<i64: 128, 128>}, {transform_indices = @transform_2, window_bounds = array<i64: 1, 128>}, {transform_indices = @transform_3, window_bounds = array<i64: 1, 128>}, {transform_indices = @transform_4, window_bounds = array<i64: 128, 128>}]} {
    %c0_i32 = arith.constant 0 : i32
    %0 = arith.cmpi eq, %arg2, %c0_i32 : i32
    %1 = arith.extui %0 : i1 to i32
    %c0_i32_0 = arith.constant 0 : i32
    %2 = arith.cmpi ne, %1, %c0_i32_0 : i32
    scf.if %2 {
      %cst_10 = arith.constant 0.000000e+00 : f32
      %12 = vector.broadcast %cst_10 : f32 to vector<128x128xf32>
      %c0_11 = arith.constant 0 : index
      %c0_12 = arith.constant 0 : index
      %13 = vector.load %arg8[%c0_11, %c0_12] : memref<128x128xf32, #tpu.memory_space<vmem>>, vector<128x128xf32>
      tpu.vector_store %arg8[%c0_11, %c0_12], %12 {strides = array<i32>} : memref<128x128xf32, #tpu.memory_space<vmem>>, vector<128x128xf32>,
    } else {
    }
    %c0 = arith.constant 0 : index
    %c0_1 = arith.constant 0 : index
    %3 = vector.load %arg8[%c0, %c0_1] : memref<128x128xf32, #tpu.memory_space<vmem>>, vector<128x128xf32>
    %c0_2 = arith.constant 0 : index
    %c0_3 = arith.constant 0 : index
    %4 = vector.load %arg3[%c0_2, %c0_3] : memref<128x128xbf16, #tpu.memory_space<vmem>>, vector<128x128xbf16>
    %c0_4 = arith.constant 0 : index
    %c0_5 = arith.constant 0 : index
    %5 = vector.load %arg4[%c0_4, %c0_5] : memref<128x128xbf16, #tpu.memory_space<vmem>>, vector<128x128xbf16>
    %cst = arith.constant dense<0.000000e+00> : vector<128x128xf32>
    %6 = tpu.matmul %4, %5, %cst {dimension_numbers = #tpu.dot_dimension_numbers<[1], [0], [0], [1], [0, 0, 1, 1], [], []>} : vector<128x128xbf16>, vector<128x128xbf16>, vector<128x128xf32> -> vector<128x128xf32>
    %7 = arith.addf %3, %6 : vector<128x128xf32>
    %c0_6 = arith.constant 0 : index
    %c0_7 = arith.constant 0 : index
    %8 = vector.load %arg8[%c0_6, %c0_7] : memref<128x128xf32, #tpu.memory_space<vmem>>, vector<128x128xf32>
    tpu.vector_store %arg8[%c0_6, %c0_7], %7 {strides = array<i32>} : memref<128x128xf32, #tpu.memory_space<vmem>>, vector<128x128xf32>,
    %c0_i32_8 = arith.constant 0 : i32
    %9 = arith.cmpi eq, %arg2, %c0_i32_8 : i32
    %10 = arith.extui %9 : i1 to i32
    %c0_i32_9 = arith.constant 0 : i32
    %11 = arith.cmpi ne, %10, %c0_i32_9 : i32
    scf.if %11 {
      %c0_10 = arith.constant 0 : index
      %c0_11 = arith.constant 0 : index
      %12 = vector.load %arg8[%c0_10, %c0_11] : memref<128x128xf32, #tpu.memory_space<vmem>>, vector<128x128xf32>
      %c0_12 = arith.constant 0 : index
      %c0_13 = arith.constant 0 : index
      %13 = vector.load %arg5[%c0_12, %c0_13] : memref<1x128xf32, #tpu.memory_space<vmem>>, vector<1x128xf32>
      %14 = vector.broadcast %13 : vector<1x128xf32> to vector<128x128xf32>
      %15 = arith.mulf %12, %14 : vector<128x128xf32>
      %c0_14 = arith.constant 0 : index
      %c0_15 = arith.constant 0 : index
      %16 = vector.load %arg6[%c0_14, %c0_15] : memref<1x128xf32, #tpu.memory_space<vmem>>, vector<1x128xf32>
      %17 = vector.broadcast %16 : vector<1x128xf32> to vector<128x128xf32>
      %18 = arith.addf %15, %17 : vector<128x128xf32>
      %cst_16 = arith.constant 0.000000e+00 : f32
      %19 = vector.broadcast %cst_16 : f32 to vector<128x128xf32>
      %20 = arith.maximumf %18, %19 : vector<128x128xf32>
      %c0_17 = arith.constant 0 : index
      %c0_18 = arith.constant 0 : index
      %21 = vector.load %arg7[%c0_17, %c0_18] : memref<128x128xf32, #tpu.memory_space<vmem>>, vector<128x128xf32>
      tpu.vector_store %arg7[%c0_17, %c0_18], %20 {strides = array<i32>} : memref<128x128xf32, #tpu.memory_space<vmem>>, vector<128x128xf32>,
    } else {
    }
    return
  }
  func.func @transform_0(%arg0: i32, %arg1: i32, %arg2: i32) -> (i32, i32) {
    %c0_i32 = arith.constant 0 : i32
    return %arg0, %arg2 : i32, i32
  }
  func.func @transform_1(%arg0: i32, %arg1: i32, %arg2: i32) -> (i32, i32) {
    %c0_i32 = arith.constant 0 : i32
    return %arg2, %arg1 : i32, i32
  }
  func.func @transform_2(%arg0: i32, %arg1: i32, %arg2: i32) -> (i32, i32) {
    %c0_i32 = arith.constant 0 : i32
    %c0_i32_0 = arith.constant 0 : i32
    return %c0_i32, %arg1 : i32, i32
  }
  func.func @transform_3(%arg0: i32, %arg1: i32, %arg2: i32) -> (i32, i32) {
    %c0_i32 = arith.constant 0 : i32
    %c0_i32_0 = arith.constant 0 : i32
    return %c0_i32, %arg1 : i32, i32
  }
  func.func @transform_4(%arg0: i32, %arg1: i32, %arg2: i32) -> (i32, i32) {
    %c0_i32 = arith.constant 0 : i32
    return %arg0, %arg1 : i32, i32
  }
}

module attributes {stable_mosaic.version = 11 : i64} {
  func.func @_psp_head_kernel(%arg0: i32, %arg1: memref<1x10x10x128xf32, #tpu.memory_space<vmem>>, %arg2: memref<8x64xf32, #tpu.memory_space<vmem>>, %arg3: memref<8x64xf32, #tpu.memory_space<vmem>>, %arg4: memref<16x64xf32, #tpu.memory_space<vmem>>, %arg5: memref<40x64xf32, #tpu.memory_space<vmem>>, %arg6: memref<64x8xf32, #tpu.memory_space<vmem>>, %arg7: memref<64x8xf32, #tpu.memory_space<vmem>>, %arg8: memref<64x16xf32, #tpu.memory_space<vmem>>, %arg9: memref<64x40xf32, #tpu.memory_space<vmem>>, %arg10: memref<4x128x32xf32, #tpu.memory_space<vmem>>, %arg11: memref<4x32xf32, #tpu.memory_space<vmem>>, %arg12: memref<4x32xf32, #tpu.memory_space<vmem>>, %arg13: memref<9x128x128xbf16, #tpu.memory_space<vmem>>, %arg14: memref<9x128x128xbf16, #tpu.memory_space<vmem>>, %arg15: memref<1x128xf32, #tpu.memory_space<vmem>>, %arg16: memref<1x128xf32, #tpu.memory_space<vmem>>, %arg17: memref<128x128xf32, #tpu.memory_space<vmem>>, %arg18: memref<1x128xf32, #tpu.memory_space<vmem>>, %arg19: memref<1024x64xf32, #tpu.memory_space<vmem>>, %arg20: memref<1x32x32x128xf32, #tpu.memory_space<vmem>>, %arg21: memref<10x10x128xbf16, #tpu.memory_space<vmem>>) attributes {dimension_semantics = [#tpu.dimension_semantics<parallel>], iteration_bounds = array<i64: 2>, scalar_prefetch = 0 : i64, scratch_operands = 1 : i64, tpu.core_type = #tpu.core_type<tc>, window_params = [{transform_indices = @transform_0, window_bounds = array<i64: 1, 10, 10, 128>}, {pipeline_mode = #tpu.pipeline_mode<synchronous>, transform_indices = @transform_1, window_bounds = array<i64: 8, 64>}, {pipeline_mode = #tpu.pipeline_mode<synchronous>, transform_indices = @transform_2, window_bounds = array<i64: 8, 64>}, {pipeline_mode = #tpu.pipeline_mode<synchronous>, transform_indices = @transform_3, window_bounds = array<i64: 16, 64>}, {pipeline_mode = #tpu.pipeline_mode<synchronous>, transform_indices = @transform_4, window_bounds = array<i64: 40, 64>}, {pipeline_mode = #tpu.pipeline_mode<synchronous>, transform_indices = @transform_5, window_bounds = array<i64: 64, 8>}, {pipeline_mode = #tpu.pipeline_mode<synchronous>, transform_indices = @transform_6, window_bounds = array<i64: 64, 8>}, {pipeline_mode = #tpu.pipeline_mode<synchronous>, transform_indices = @transform_7, window_bounds = array<i64: 64, 16>}, {pipeline_mode = #tpu.pipeline_mode<synchronous>, transform_indices = @transform_8, window_bounds = array<i64: 64, 40>}, {pipeline_mode = #tpu.pipeline_mode<synchronous>, transform_indices = @transform_9, window_bounds = array<i64: 4, 128, 32>}, {pipeline_mode = #tpu.pipeline_mode<synchronous>, transform_indices = @transform_10, window_bounds = array<i64: 4, 32>}, {pipeline_mode = #tpu.pipeline_mode<synchronous>, transform_indices = @transform_11, window_bounds = array<i64: 4, 32>}, {pipeline_mode = #tpu.pipeline_mode<synchronous>, transform_indices = @transform_12, window_bounds = array<i64: 9, 128, 128>}, {pipeline_mode = #tpu.pipeline_mode<synchronous>, transform_indices = @transform_13, window_bounds = array<i64: 9, 128, 128>}, {pipeline_mode = #tpu.pipeline_mode<synchronous>, transform_indices = @transform_14, window_bounds = array<i64: 1, 128>}, {pipeline_mode = #tpu.pipeline_mode<synchronous>, transform_indices = @transform_15, window_bounds = array<i64: 1, 128>}, {pipeline_mode = #tpu.pipeline_mode<synchronous>, transform_indices = @transform_16, window_bounds = array<i64: 128, 128>}, {pipeline_mode = #tpu.pipeline_mode<synchronous>, transform_indices = @transform_17, window_bounds = array<i64: 1, 128>}, {pipeline_mode = #tpu.pipeline_mode<synchronous>, transform_indices = @transform_18, window_bounds = array<i64: 1024, 64>}, {transform_indices = @transform_19, window_bounds = array<i64: 1, 32, 32, 128>}]} {
    %c0 = arith.constant 0 : index
    %c1 = arith.constant 1 : index
    %c1_0 = arith.constant 1 : index
    %c0_1 = arith.constant 0 : index
    %0 = vector.load %arg1[%c0, %c1, %c1_0, %c0_1] : memref<1x10x10x128xf32, #tpu.memory_space<vmem>>, vector<1x8x8x128xf32>
    %1 = vector.shape_cast %0 : vector<1x8x8x128xf32> to vector<8x8x128xf32>
    %2 = vector.shape_cast %1 : vector<8x8x128xf32> to vector<64x128xf32>
    %c0_2 = arith.constant 0 : index
    %c0_3 = arith.constant 0 : index
    %3 = vector.load %arg2[%c0_2, %c0_3] : memref<8x64xf32, #tpu.memory_space<vmem>>, vector<8x64xf32>
    %cst = arith.constant dense<0.000000e+00> : vector<8x128xf32>
    %4 = tpu.matmul %3, %2, %cst {dimension_numbers = #tpu.dot_dimension_numbers<[1], [0], [0], [1], [0, 0, 1, 1], [], []>} : vector<8x64xf32>, vector<64x128xf32>, vector<8x128xf32> -> vector<8x128xf32>
    %c0_4 = arith.constant 0 : index
    %c0_5 = arith.constant 0 : index
    %c0_6 = arith.constant 0 : index
    %5 = vector.load %arg10[%c0_4, %c0_5, %c0_6] : memref<4x128x32xf32, #tpu.memory_space<vmem>>, vector<1x128x32xf32>
    %6 = vector.shape_cast %5 : vector<1x128x32xf32> to vector<128x32xf32>
    %cst_7 = arith.constant dense<0.000000e+00> : vector<8x32xf32>
    %7 = tpu.matmul %4, %6, %cst_7 {dimension_numbers = #tpu.dot_dimension_numbers<[1], [0], [0], [1], [0, 0, 1, 1], [], []>} : vector<8x128xf32>, vector<128x32xf32>, vector<8x32xf32> -> vector<8x32xf32>
    %c0_8 = arith.constant 0 : index
    %c0_9 = arith.constant 0 : index
    %8 = vector.load %arg11[%c0_8, %c0_9] : memref<4x32xf32, #tpu.memory_space<vmem>>, vector<1x32xf32>
    %9 = vector.broadcast %8 : vector<1x32xf32> to vector<8x32xf32>
    %10 = arith.mulf %7, %9 : vector<8x32xf32>
    %c0_10 = arith.constant 0 : index
    %c0_11 = arith.constant 0 : index
    %11 = vector.load %arg12[%c0_10, %c0_11] : memref<4x32xf32, #tpu.memory_space<vmem>>, vector<1x32xf32>
    %12 = vector.broadcast %11 : vector<1x32xf32> to vector<8x32xf32>
    %13 = arith.addf %10, %12 : vector<8x32xf32>
    %cst_12 = arith.constant 0.000000e+00 : f32
    %14 = vector.broadcast %cst_12 : f32 to vector<8x32xf32>
    %15 = arith.maximumf %13, %14 : vector<8x32xf32>
    %c0_13 = arith.constant 0 : index
    %c0_14 = arith.constant 0 : index
    %16 = vector.load %arg6[%c0_13, %c0_14] : memref<64x8xf32, #tpu.memory_space<vmem>>, vector<64x8xf32>
    %cst_15 = arith.constant dense<0.000000e+00> : vector<64x32xf32>
    %17 = tpu.matmul %16, %15, %cst_15 {dimension_numbers = #tpu.dot_dimension_numbers<[1], [0], [0], [1], [0, 0, 1, 1], [], []>} : vector<64x8xf32>, vector<8x32xf32>, vector<64x32xf32> -> vector<64x32xf32>
    %c0_16 = arith.constant 0 : index
    %c0_17 = arith.constant 0 : index
    %18 = vector.load %arg3[%c0_16, %c0_17] : memref<8x64xf32, #tpu.memory_space<vmem>>, vector<8x64xf32>
    %cst_18 = arith.constant dense<0.000000e+00> : vector<8x128xf32>
    %19 = tpu.matmul %18, %2, %cst_18 {dimension_numbers = #tpu.dot_dimension_numbers<[1], [0], [0], [1], [0, 0, 1, 1], [], []>} : vector<8x64xf32>, vector<64x128xf32>, vector<8x128xf32> -> vector<8x128xf32>
    %c1_19 = arith.constant 1 : index
    %c0_20 = arith.constant 0 : index
    %c0_21 = arith.constant 0 : index
    %20 = vector.load %arg10[%c1_19, %c0_20, %c0_21] : memref<4x128x32xf32, #tpu.memory_space<vmem>>, vector<1x128x32xf32>
    %21 = vector.shape_cast %20 : vector<1x128x32xf32> to vector<128x32xf32>
    %cst_22 = arith.constant dense<0.000000e+00> : vector<8x32xf32>
    %22 = tpu.matmul %19, %21, %cst_22 {dimension_numbers = #tpu.dot_dimension_numbers<[1], [0], [0], [1], [0, 0, 1, 1], [], []>} : vector<8x128xf32>, vector<128x32xf32>, vector<8x32xf32> -> vector<8x32xf32>
    %c1_23 = arith.constant 1 : index
    %c0_24 = arith.constant 0 : index
    %23 = vector.load %arg11[%c1_23, %c0_24] : memref<4x32xf32, #tpu.memory_space<vmem>>, vector<1x32xf32>
    %24 = vector.broadcast %23 : vector<1x32xf32> to vector<8x32xf32>
    %25 = arith.mulf %22, %24 : vector<8x32xf32>
    %c1_25 = arith.constant 1 : index
    %c0_26 = arith.constant 0 : index
    %26 = vector.load %arg12[%c1_25, %c0_26] : memref<4x32xf32, #tpu.memory_space<vmem>>, vector<1x32xf32>
    %27 = vector.broadcast %26 : vector<1x32xf32> to vector<8x32xf32>
    %28 = arith.addf %25, %27 : vector<8x32xf32>
    %cst_27 = arith.constant 0.000000e+00 : f32
    %29 = vector.broadcast %cst_27 : f32 to vector<8x32xf32>
    %30 = arith.maximumf %28, %29 : vector<8x32xf32>
    %c0_28 = arith.constant 0 : index
    %c0_29 = arith.constant 0 : index
    %31 = vector.load %arg7[%c0_28, %c0_29] : memref<64x8xf32, #tpu.memory_space<vmem>>, vector<64x8xf32>
    %cst_30 = arith.constant dense<0.000000e+00> : vector<64x32xf32>
    %32 = tpu.matmul %31, %30, %cst_30 {dimension_numbers = #tpu.dot_dimension_numbers<[1], [0], [0], [1], [0, 0, 1, 1], [], []>} : vector<64x8xf32>, vector<8x32xf32>, vector<64x32xf32> -> vector<64x32xf32>
    %c0_31 = arith.constant 0 : index
    %c0_32 = arith.constant 0 : index
    %33 = vector.load %arg4[%c0_31, %c0_32] : memref<16x64xf32, #tpu.memory_space<vmem>>, vector<16x64xf32>
    %cst_33 = arith.constant dense<0.000000e+00> : vector<16x128xf32>
    %34 = tpu.matmul %33, %2, %cst_33 {dimension_numbers = #tpu.dot_dimension_numbers<[1], [0], [0], [1], [0, 0, 1, 1], [], []>} : vector<16x64xf32>, vector<64x128xf32>, vector<16x128xf32> -> vector<16x128xf32>
    %c2 = arith.constant 2 : index
    %c0_34 = arith.constant 0 : index
    %c0_35 = arith.constant 0 : index
    %35 = vector.load %arg10[%c2, %c0_34, %c0_35] : memref<4x128x32xf32, #tpu.memory_space<vmem>>, vector<1x128x32xf32>
    %36 = vector.shape_cast %35 : vector<1x128x32xf32> to vector<128x32xf32>
    %cst_36 = arith.constant dense<0.000000e+00> : vector<16x32xf32>
    %37 = tpu.matmul %34, %36, %cst_36 {dimension_numbers = #tpu.dot_dimension_numbers<[1], [0], [0], [1], [0, 0, 1, 1], [], []>} : vector<16x128xf32>, vector<128x32xf32>, vector<16x32xf32> -> vector<16x32xf32>
    %c2_37 = arith.constant 2 : index
    %c0_38 = arith.constant 0 : index
    %38 = vector.load %arg11[%c2_37, %c0_38] : memref<4x32xf32, #tpu.memory_space<vmem>>, vector<1x32xf32>
    %39 = vector.broadcast %38 : vector<1x32xf32> to vector<16x32xf32>
    %40 = arith.mulf %37, %39 : vector<16x32xf32>
    %c2_39 = arith.constant 2 : index
    %c0_40 = arith.constant 0 : index
    %41 = vector.load %arg12[%c2_39, %c0_40] : memref<4x32xf32, #tpu.memory_space<vmem>>, vector<1x32xf32>
    %42 = vector.broadcast %41 : vector<1x32xf32> to vector<16x32xf32>
    %43 = arith.addf %40, %42 : vector<16x32xf32>
    %cst_41 = arith.constant 0.000000e+00 : f32
    %44 = vector.broadcast %cst_41 : f32 to vector<16x32xf32>
    %45 = arith.maximumf %43, %44 : vector<16x32xf32>
    %c0_42 = arith.constant 0 : index
    %c0_43 = arith.constant 0 : index
    %46 = vector.load %arg8[%c0_42, %c0_43] : memref<64x16xf32, #tpu.memory_space<vmem>>, vector<64x16xf32>
    %cst_44 = arith.constant dense<0.000000e+00> : vector<64x32xf32>
    %47 = tpu.matmul %46, %45, %cst_44 {dimension_numbers = #tpu.dot_dimension_numbers<[1], [0], [0], [1], [0, 0, 1, 1], [], []>} : vector<64x16xf32>, vector<16x32xf32>, vector<64x32xf32> -> vector<64x32xf32>
    %c0_45 = arith.constant 0 : index
    %c0_46 = arith.constant 0 : index
    %48 = vector.load %arg5[%c0_45, %c0_46] : memref<40x64xf32, #tpu.memory_space<vmem>>, vector<40x64xf32>
    %cst_47 = arith.constant dense<0.000000e+00> : vector<40x128xf32>
    %49 = tpu.matmul %48, %2, %cst_47 {dimension_numbers = #tpu.dot_dimension_numbers<[1], [0], [0], [1], [0, 0, 1, 1], [], []>} : vector<40x64xf32>, vector<64x128xf32>, vector<40x128xf32> -> vector<40x128xf32>
    %c3 = arith.constant 3 : index
    %c0_48 = arith.constant 0 : index
    %c0_49 = arith.constant 0 : index
    %50 = vector.load %arg10[%c3, %c0_48, %c0_49] : memref<4x128x32xf32, #tpu.memory_space<vmem>>, vector<1x128x32xf32>
    %51 = vector.shape_cast %50 : vector<1x128x32xf32> to vector<128x32xf32>
    %cst_50 = arith.constant dense<0.000000e+00> : vector<40x32xf32>
    %52 = tpu.matmul %49, %51, %cst_50 {dimension_numbers = #tpu.dot_dimension_numbers<[1], [0], [0], [1], [0, 0, 1, 1], [], []>} : vector<40x128xf32>, vector<128x32xf32>, vector<40x32xf32> -> vector<40x32xf32>
    %c3_51 = arith.constant 3 : index
    %c0_52 = arith.constant 0 : index
    %53 = vector.load %arg11[%c3_51, %c0_52] : memref<4x32xf32, #tpu.memory_space<vmem>>, vector<1x32xf32>
    %54 = vector.broadcast %53 : vector<1x32xf32> to vector<40x32xf32>
    %55 = arith.mulf %52, %54 : vector<40x32xf32>
    %c3_53 = arith.constant 3 : index
    %c0_54 = arith.constant 0 : index
    %56 = vector.load %arg12[%c3_53, %c0_54] : memref<4x32xf32, #tpu.memory_space<vmem>>, vector<1x32xf32>
    %57 = vector.broadcast %56 : vector<1x32xf32> to vector<40x32xf32>
    %58 = arith.addf %55, %57 : vector<40x32xf32>
    %cst_55 = arith.constant 0.000000e+00 : f32
    %59 = vector.broadcast %cst_55 : f32 to vector<40x32xf32>
    %60 = arith.maximumf %58, %59 : vector<40x32xf32>
    %c0_56 = arith.constant 0 : index
    %c0_57 = arith.constant 0 : index
    %61 = vector.load %arg9[%c0_56, %c0_57] : memref<64x40xf32, #tpu.memory_space<vmem>>, vector<64x40xf32>
    %cst_58 = arith.constant dense<0.000000e+00> : vector<64x32xf32>
    %62 = tpu.matmul %61, %60, %cst_58 {dimension_numbers = #tpu.dot_dimension_numbers<[1], [0], [0], [1], [0, 0, 1, 1], [], []>} : vector<64x40xf32>, vector<40x32xf32>, vector<64x32xf32> -> vector<64x32xf32>
    %63 = tpu.concatenate %17, %32, %47, %62 in 1 : vector<64x32xf32>, vector<64x32xf32>, vector<64x32xf32>, vector<64x32xf32> -> vector<64x128xf32>
    %cst_59 = arith.constant 0.000000e+00 : bf16
    %64 = vector.broadcast %cst_59 : bf16 to vector<10x10x128xbf16>
    %c0_60 = arith.constant 0 : index
    %c0_61 = arith.constant 0 : index
    %c0_62 = arith.constant 0 : index
    %65 = vector.load %arg21[%c0_60, %c0_61, %c0_62] : memref<10x10x128xbf16, #tpu.memory_space<vmem>>, vector<10x10x128xbf16>
    tpu.vector_store %arg21[%c0_60, %c0_61, %c0_62], %64 {strides = array<i32>} : memref<10x10x128xbf16, #tpu.memory_space<vmem>>, vector<10x10x128xbf16>,
    %66 = vector.shape_cast %63 : vector<64x128xf32> to vector<8x8x128xf32>
    %67 = arith.truncf %66 : vector<8x8x128xf32> to vector<8x8x128xbf16>
    %c1_63 = arith.constant 1 : index
    %c1_64 = arith.constant 1 : index
    %c0_65 = arith.constant 0 : index
    %68 = vector.load %arg21[%c1_63, %c1_64, %c0_65] : memref<10x10x128xbf16, #tpu.memory_space<vmem>>, vector<8x8x128xbf16>
    tpu.vector_store %arg21[%c1_63, %c1_64, %c0_65], %67 {strides = array<i32>} : memref<10x10x128xbf16, #tpu.memory_space<vmem>>, vector<8x8x128xbf16>,
    %cst_66 = arith.constant 0.000000e+00 : f32
    %69 = vector.broadcast %cst_66 : f32 to vector<64x128xf32>
    %c0_67 = arith.constant 0 : index
    %c0_68 = arith.constant 0 : index
    %c0_69 = arith.constant 0 : index
    %c0_70 = arith.constant 0 : index
    %70 = vector.load %arg1[%c0_67, %c0_68, %c0_69, %c0_70] : memref<1x10x10x128xf32, #tpu.memory_space<vmem>>, vector<1x8x8x128xf32>
    %71 = vector.shape_cast %70 : vector<1x8x8x128xf32> to vector<8x8x128xf32>
    %72 = vector.shape_cast %71 : vector<8x8x128xf32> to vector<64x128xf32>
    %c0_71 = arith.constant 0 : index
    %c0_72 = arith.constant 0 : index
    %c0_73 = arith.constant 0 : index
    %73 = vector.load %arg21[%c0_71, %c0_72, %c0_73] : memref<10x10x128xbf16, #tpu.memory_space<vmem>>, vector<8x8x128xbf16>
    %74 = vector.shape_cast %73 : vector<8x8x128xbf16> to vector<64x128xbf16>
    %75 = arith.truncf %72 : vector<64x128xf32> to vector<64x128xbf16>
    %c0_74 = arith.constant 0 : index
    %c0_75 = arith.constant 0 : index
    %c0_76 = arith.constant 0 : index
    %76 = vector.load %arg13[%c0_74, %c0_75, %c0_76] : memref<9x128x128xbf16, #tpu.memory_space<vmem>>, vector<1x128x128xbf16>
    %77 = vector.shape_cast %76 : vector<1x128x128xbf16> to vector<128x128xbf16>
    %cst_77 = arith.constant dense<0.000000e+00> : vector<64x128xf32>
    %78 = tpu.matmul %75, %77, %cst_77 {dimension_numbers = #tpu.dot_dimension_numbers<[1], [0], [0], [1], [0, 0, 1, 1], [], []>} : vector<64x128xbf16>, vector<128x128xbf16>, vector<64x128xf32> -> vector<64x128xf32>
    %79 = arith.addf %69, %78 : vector<64x128xf32>
    %c0_78 = arith.constant 0 : index
    %c0_79 = arith.constant 0 : index
    %c0_80 = arith.constant 0 : index
    %80 = vector.load %arg14[%c0_78, %c0_79, %c0_80] : memref<9x128x128xbf16, #tpu.memory_space<vmem>>, vector<1x128x128xbf16>
    %81 = vector.shape_cast %80 : vector<1x128x128xbf16> to vector<128x128xbf16>
    %cst_81 = arith.constant dense<0.000000e+00> : vector<64x128xf32>
    %82 = tpu.matmul %74, %81, %cst_81 {dimension_numbers = #tpu.dot_dimension_numbers<[1], [0], [0], [1], [0, 0, 1, 1], [], []>} : vector<64x128xbf16>, vector<128x128xbf16>, vector<64x128xf32> -> vector<64x128xf32>
    %83 = arith.addf %79, %82 : vector<64x128xf32>
    %c0_82 = arith.constant 0 : index
    %c0_83 = arith.constant 0 : index
    %c1_84 = arith.constant 1 : index
    %c0_85 = arith.constant 0 : index
    %84 = vector.load %arg1[%c0_82, %c0_83, %c1_84, %c0_85] : memref<1x10x10x128xf32, #tpu.memory_space<vmem>>, vector<1x8x8x128xf32>
    %85 = vector.shape_cast %84 : vector<1x8x8x128xf32> to vector<8x8x128xf32>
    %86 = vector.shape_cast %85 : vector<8x8x128xf32> to vector<64x128xf32>
    %c0_86 = arith.constant 0 : index
    %c1_87 = arith.constant 1 : index
    %c0_88 = arith.constant 0 : index
    %87 = vector.load %arg21[%c0_86, %c1_87, %c0_88] : memref<10x10x128xbf16, #tpu.memory_space<vmem>>, vector<8x8x128xbf16>
    %88 = vector.shape_cast %87 : vector<8x8x128xbf16> to vector<64x128xbf16>
    %89 = arith.truncf %86 : vector<64x128xf32> to vector<64x128xbf16>
    %c1_89 = arith.constant 1 : index
    %c0_90 = arith.constant 0 : index
    %c0_91 = arith.constant 0 : index
    %90 = vector.load %arg13[%c1_89, %c0_90, %c0_91] : memref<9x128x128xbf16, #tpu.memory_space<vmem>>, vector<1x128x128xbf16>
    %91 = vector.shape_cast %90 : vector<1x128x128xbf16> to vector<128x128xbf16>
    %cst_92 = arith.constant dense<0.000000e+00> : vector<64x128xf32>
    %92 = tpu.matmul %89, %91, %cst_92 {dimension_numbers = #tpu.dot_dimension_numbers<[1], [0], [0], [1], [0, 0, 1, 1], [], []>} : vector<64x128xbf16>, vector<128x128xbf16>, vector<64x128xf32> -> vector<64x128xf32>
    %93 = arith.addf %83, %92 : vector<64x128xf32>
    %c1_93 = arith.constant 1 : index
    %c0_94 = arith.constant 0 : index
    %c0_95 = arith.constant 0 : index
    %94 = vector.load %arg14[%c1_93, %c0_94, %c0_95] : memref<9x128x128xbf16, #tpu.memory_space<vmem>>, vector<1x128x128xbf16>
    %95 = vector.shape_cast %94 : vector<1x128x128xbf16> to vector<128x128xbf16>
    %cst_96 = arith.constant dense<0.000000e+00> : vector<64x128xf32>
    %96 = tpu.matmul %88, %95, %cst_96 {dimension_numbers = #tpu.dot_dimension_numbers<[1], [0], [0], [1], [0, 0, 1, 1], [], []>} : vector<64x128xbf16>, vector<128x128xbf16>, vector<64x128xf32> -> vector<64x128xf32>
    %97 = arith.addf %93, %96 : vector<64x128xf32>
    %c0_97 = arith.constant 0 : index
    %c0_98 = arith.constant 0 : index
    %c2_99 = arith.constant 2 : index
    %c0_100 = arith.constant 0 : index
    %98 = vector.load %arg1[%c0_97, %c0_98, %c2_99, %c0_100] : memref<1x10x10x128xf32, #tpu.memory_space<vmem>>, vector<1x8x8x128xf32>
    %99 = vector.shape_cast %98 : vector<1x8x8x128xf32> to vector<8x8x128xf32>
    %100 = vector.shape_cast %99 : vector<8x8x128xf32> to vector<64x128xf32>
    %c0_101 = arith.constant 0 : index
    %c2_102 = arith.constant 2 : index
    %c0_103 = arith.constant 0 : index
    %101 = vector.load %arg21[%c0_101, %c2_102, %c0_103] : memref<10x10x128xbf16, #tpu.memory_space<vmem>>, vector<8x8x128xbf16>
    %102 = vector.shape_cast %101 : vector<8x8x128xbf16> to vector<64x128xbf16>
    %103 = arith.truncf %100 : vector<64x128xf32> to vector<64x128xbf16>
    %c2_104 = arith.constant 2 : index
    %c0_105 = arith.constant 0 : index
    %c0_106 = arith.constant 0 : index
    %104 = vector.load %arg13[%c2_104, %c0_105, %c0_106] : memref<9x128x128xbf16, #tpu.memory_space<vmem>>, vector<1x128x128xbf16>
    %105 = vector.shape_cast %104 : vector<1x128x128xbf16> to vector<128x128xbf16>
    %cst_107 = arith.constant dense<0.000000e+00> : vector<64x128xf32>
    %106 = tpu.matmul %103, %105, %cst_107 {dimension_numbers = #tpu.dot_dimension_numbers<[1], [0], [0], [1], [0, 0, 1, 1], [], []>} : vector<64x128xbf16>, vector<128x128xbf16>, vector<64x128xf32> -> vector<64x128xf32>
    %107 = arith.addf %97, %106 : vector<64x128xf32>
    %c2_108 = arith.constant 2 : index
    %c0_109 = arith.constant 0 : index
    %c0_110 = arith.constant 0 : index
    %108 = vector.load %arg14[%c2_108, %c0_109, %c0_110] : memref<9x128x128xbf16, #tpu.memory_space<vmem>>, vector<1x128x128xbf16>
    %109 = vector.shape_cast %108 : vector<1x128x128xbf16> to vector<128x128xbf16>
    %cst_111 = arith.constant dense<0.000000e+00> : vector<64x128xf32>
    %110 = tpu.matmul %102, %109, %cst_111 {dimension_numbers = #tpu.dot_dimension_numbers<[1], [0], [0], [1], [0, 0, 1, 1], [], []>} : vector<64x128xbf16>, vector<128x128xbf16>, vector<64x128xf32> -> vector<64x128xf32>
    %111 = arith.addf %107, %110 : vector<64x128xf32>
    %c0_112 = arith.constant 0 : index
    %c1_113 = arith.constant 1 : index
    %c0_114 = arith.constant 0 : index
    %c0_115 = arith.constant 0 : index
    %112 = vector.load %arg1[%c0_112, %c1_113, %c0_114, %c0_115] : memref<1x10x10x128xf32, #tpu.memory_space<vmem>>, vector<1x8x8x128xf32>
    %113 = vector.shape_cast %112 : vector<1x8x8x128xf32> to vector<8x8x128xf32>
    %114 = vector.shape_cast %113 : vector<8x8x128xf32> to vector<64x128xf32>
    %c1_116 = arith.constant 1 : index
    %c0_117 = arith.constant 0 : index
    %c0_118 = arith.constant 0 : index
    %115 = vector.load %arg21[%c1_116, %c0_117, %c0_118] : memref<10x10x128xbf16, #tpu.memory_space<vmem>>, vector<8x8x128xbf16>
    %116 = vector.shape_cast %115 : vector<8x8x128xbf16> to vector<64x128xbf16>
    %117 = arith.truncf %114 : vector<64x128xf32> to vector<64x128xbf16>
    %c3_119 = arith.constant 3 : index
    %c0_120 = arith.constant 0 : index
    %c0_121 = arith.constant 0 : index
    %118 = vector.load %arg13[%c3_119, %c0_120, %c0_121] : memref<9x128x128xbf16, #tpu.memory_space<vmem>>, vector<1x128x128xbf16>
    %119 = vector.shape_cast %118 : vector<1x128x128xbf16> to vector<128x128xbf16>
    %cst_122 = arith.constant dense<0.000000e+00> : vector<64x128xf32>
    %120 = tpu.matmul %117, %119, %cst_122 {dimension_numbers = #tpu.dot_dimension_numbers<[1], [0], [0], [1], [0, 0, 1, 1], [], []>} : vector<64x128xbf16>, vector<128x128xbf16>, vector<64x128xf32> -> vector<64x128xf32>
    %121 = arith.addf %111, %120 : vector<64x128xf32>
    %c3_123 = arith.constant 3 : index
    %c0_124 = arith.constant 0 : index
    %c0_125 = arith.constant 0 : index
    %122 = vector.load %arg14[%c3_123, %c0_124, %c0_125] : memref<9x128x128xbf16, #tpu.memory_space<vmem>>, vector<1x128x128xbf16>
    %123 = vector.shape_cast %122 : vector<1x128x128xbf16> to vector<128x128xbf16>
    %cst_126 = arith.constant dense<0.000000e+00> : vector<64x128xf32>
    %124 = tpu.matmul %116, %123, %cst_126 {dimension_numbers = #tpu.dot_dimension_numbers<[1], [0], [0], [1], [0, 0, 1, 1], [], []>} : vector<64x128xbf16>, vector<128x128xbf16>, vector<64x128xf32> -> vector<64x128xf32>
    %125 = arith.addf %121, %124 : vector<64x128xf32>
    %c0_127 = arith.constant 0 : index
    %c1_128 = arith.constant 1 : index
    %c1_129 = arith.constant 1 : index
    %c0_130 = arith.constant 0 : index
    %126 = vector.load %arg1[%c0_127, %c1_128, %c1_129, %c0_130] : memref<1x10x10x128xf32, #tpu.memory_space<vmem>>, vector<1x8x8x128xf32>
    %127 = vector.shape_cast %126 : vector<1x8x8x128xf32> to vector<8x8x128xf32>
    %128 = vector.shape_cast %127 : vector<8x8x128xf32> to vector<64x128xf32>
    %c1_131 = arith.constant 1 : index
    %c1_132 = arith.constant 1 : index
    %c0_133 = arith.constant 0 : index
    %129 = vector.load %arg21[%c1_131, %c1_132, %c0_133] : memref<10x10x128xbf16, #tpu.memory_space<vmem>>, vector<8x8x128xbf16>
    %130 = vector.shape_cast %129 : vector<8x8x128xbf16> to vector<64x128xbf16>
    %131 = arith.truncf %128 : vector<64x128xf32> to vector<64x128xbf16>
    %c4 = arith.constant 4 : index
    %c0_134 = arith.constant 0 : index
    %c0_135 = arith.constant 0 : index
    %132 = vector.load %arg13[%c4, %c0_134, %c0_135] : memref<9x128x128xbf16, #tpu.memory_space<vmem>>, vector<1x128x128xbf16>
    %133 = vector.shape_cast %132 : vector<1x128x128xbf16> to vector<128x128xbf16>
    %cst_136 = arith.constant dense<0.000000e+00> : vector<64x128xf32>
    %134 = tpu.matmul %131, %133, %cst_136 {dimension_numbers = #tpu.dot_dimension_numbers<[1], [0], [0], [1], [0, 0, 1, 1], [], []>} : vector<64x128xbf16>, vector<128x128xbf16>, vector<64x128xf32> -> vector<64x128xf32>
    %135 = arith.addf %125, %134 : vector<64x128xf32>
    %c4_137 = arith.constant 4 : index
    %c0_138 = arith.constant 0 : index
    %c0_139 = arith.constant 0 : index
    %136 = vector.load %arg14[%c4_137, %c0_138, %c0_139] : memref<9x128x128xbf16, #tpu.memory_space<vmem>>, vector<1x128x128xbf16>
    %137 = vector.shape_cast %136 : vector<1x128x128xbf16> to vector<128x128xbf16>
    %cst_140 = arith.constant dense<0.000000e+00> : vector<64x128xf32>
    %138 = tpu.matmul %130, %137, %cst_140 {dimension_numbers = #tpu.dot_dimension_numbers<[1], [0], [0], [1], [0, 0, 1, 1], [], []>} : vector<64x128xbf16>, vector<128x128xbf16>, vector<64x128xf32> -> vector<64x128xf32>
    %139 = arith.addf %135, %138 : vector<64x128xf32>
    %c0_141 = arith.constant 0 : index
    %c1_142 = arith.constant 1 : index
    %c2_143 = arith.constant 2 : index
    %c0_144 = arith.constant 0 : index
    %140 = vector.load %arg1[%c0_141, %c1_142, %c2_143, %c0_144] : memref<1x10x10x128xf32, #tpu.memory_space<vmem>>, vector<1x8x8x128xf32>
    %141 = vector.shape_cast %140 : vector<1x8x8x128xf32> to vector<8x8x128xf32>
    %142 = vector.shape_cast %141 : vector<8x8x128xf32> to vector<64x128xf32>
    %c1_145 = arith.constant 1 : index
    %c2_146 = arith.constant 2 : index
    %c0_147 = arith.constant 0 : index
    %143 = vector.load %arg21[%c1_145, %c2_146, %c0_147] : memref<10x10x128xbf16, #tpu.memory_space<vmem>>, vector<8x8x128xbf16>
    %144 = vector.shape_cast %143 : vector<8x8x128xbf16> to vector<64x128xbf16>
    %145 = arith.truncf %142 : vector<64x128xf32> to vector<64x128xbf16>
    %c5 = arith.constant 5 : index
    %c0_148 = arith.constant 0 : index
    %c0_149 = arith.constant 0 : index
    %146 = vector.load %arg13[%c5, %c0_148, %c0_149] : memref<9x128x128xbf16, #tpu.memory_space<vmem>>, vector<1x128x128xbf16>
    %147 = vector.shape_cast %146 : vector<1x128x128xbf16> to vector<128x128xbf16>
    %cst_150 = arith.constant dense<0.000000e+00> : vector<64x128xf32>
    %148 = tpu.matmul %145, %147, %cst_150 {dimension_numbers = #tpu.dot_dimension_numbers<[1], [0], [0], [1], [0, 0, 1, 1], [], []>} : vector<64x128xbf16>, vector<128x128xbf16>, vector<64x128xf32> -> vector<64x128xf32>
    %149 = arith.addf %139, %148 : vector<64x128xf32>
    %c5_151 = arith.constant 5 : index
    %c0_152 = arith.constant 0 : index
    %c0_153 = arith.constant 0 : index
    %150 = vector.load %arg14[%c5_151, %c0_152, %c0_153] : memref<9x128x128xbf16, #tpu.memory_space<vmem>>, vector<1x128x128xbf16>
    %151 = vector.shape_cast %150 : vector<1x128x128xbf16> to vector<128x128xbf16>
    %cst_154 = arith.constant dense<0.000000e+00> : vector<64x128xf32>
    %152 = tpu.matmul %144, %151, %cst_154 {dimension_numbers = #tpu.dot_dimension_numbers<[1], [0], [0], [1], [0, 0, 1, 1], [], []>} : vector<64x128xbf16>, vector<128x128xbf16>, vector<64x128xf32> -> vector<64x128xf32>
    %153 = arith.addf %149, %152 : vector<64x128xf32>
    %c0_155 = arith.constant 0 : index
    %c2_156 = arith.constant 2 : index
    %c0_157 = arith.constant 0 : index
    %c0_158 = arith.constant 0 : index
    %154 = vector.load %arg1[%c0_155, %c2_156, %c0_157, %c0_158] : memref<1x10x10x128xf32, #tpu.memory_space<vmem>>, vector<1x8x8x128xf32>
    %155 = vector.shape_cast %154 : vector<1x8x8x128xf32> to vector<8x8x128xf32>
    %156 = vector.shape_cast %155 : vector<8x8x128xf32> to vector<64x128xf32>
    %c2_159 = arith.constant 2 : index
    %c0_160 = arith.constant 0 : index
    %c0_161 = arith.constant 0 : index
    %157 = vector.load %arg21[%c2_159, %c0_160, %c0_161] : memref<10x10x128xbf16, #tpu.memory_space<vmem>>, vector<8x8x128xbf16>
    %158 = vector.shape_cast %157 : vector<8x8x128xbf16> to vector<64x128xbf16>
    %159 = arith.truncf %156 : vector<64x128xf32> to vector<64x128xbf16>
    %c6 = arith.constant 6 : index
    %c0_162 = arith.constant 0 : index
    %c0_163 = arith.constant 0 : index
    %160 = vector.load %arg13[%c6, %c0_162, %c0_163] : memref<9x128x128xbf16, #tpu.memory_space<vmem>>, vector<1x128x128xbf16>
    %161 = vector.shape_cast %160 : vector<1x128x128xbf16> to vector<128x128xbf16>
    %cst_164 = arith.constant dense<0.000000e+00> : vector<64x128xf32>
    %162 = tpu.matmul %159, %161, %cst_164 {dimension_numbers = #tpu.dot_dimension_numbers<[1], [0], [0], [1], [0, 0, 1, 1], [], []>} : vector<64x128xbf16>, vector<128x128xbf16>, vector<64x128xf32> -> vector<64x128xf32>
    %163 = arith.addf %153, %162 : vector<64x128xf32>
    %c6_165 = arith.constant 6 : index
    %c0_166 = arith.constant 0 : index
    %c0_167 = arith.constant 0 : index
    %164 = vector.load %arg14[%c6_165, %c0_166, %c0_167] : memref<9x128x128xbf16, #tpu.memory_space<vmem>>, vector<1x128x128xbf16>
    %165 = vector.shape_cast %164 : vector<1x128x128xbf16> to vector<128x128xbf16>
    %cst_168 = arith.constant dense<0.000000e+00> : vector<64x128xf32>
    %166 = tpu.matmul %158, %165, %cst_168 {dimension_numbers = #tpu.dot_dimension_numbers<[1], [0], [0], [1], [0, 0, 1, 1], [], []>} : vector<64x128xbf16>, vector<128x128xbf16>, vector<64x128xf32> -> vector<64x128xf32>
    %167 = arith.addf %163, %166 : vector<64x128xf32>
    %c0_169 = arith.constant 0 : index
    %c2_170 = arith.constant 2 : index
    %c1_171 = arith.constant 1 : index
    %c0_172 = arith.constant 0 : index
    %168 = vector.load %arg1[%c0_169, %c2_170, %c1_171, %c0_172] : memref<1x10x10x128xf32, #tpu.memory_space<vmem>>, vector<1x8x8x128xf32>
    %169 = vector.shape_cast %168 : vector<1x8x8x128xf32> to vector<8x8x128xf32>
    %170 = vector.shape_cast %169 : vector<8x8x128xf32> to vector<64x128xf32>
    %c2_173 = arith.constant 2 : index
    %c1_174 = arith.constant 1 : index
    %c0_175 = arith.constant 0 : index
    %171 = vector.load %arg21[%c2_173, %c1_174, %c0_175] : memref<10x10x128xbf16, #tpu.memory_space<vmem>>, vector<8x8x128xbf16>
    %172 = vector.shape_cast %171 : vector<8x8x128xbf16> to vector<64x128xbf16>
    %173 = arith.truncf %170 : vector<64x128xf32> to vector<64x128xbf16>
    %c7 = arith.constant 7 : index
    %c0_176 = arith.constant 0 : index
    %c0_177 = arith.constant 0 : index
    %174 = vector.load %arg13[%c7, %c0_176, %c0_177] : memref<9x128x128xbf16, #tpu.memory_space<vmem>>, vector<1x128x128xbf16>
    %175 = vector.shape_cast %174 : vector<1x128x128xbf16> to vector<128x128xbf16>
    %cst_178 = arith.constant dense<0.000000e+00> : vector<64x128xf32>
    %176 = tpu.matmul %173, %175, %cst_178 {dimension_numbers = #tpu.dot_dimension_numbers<[1], [0], [0], [1], [0, 0, 1, 1], [], []>} : vector<64x128xbf16>, vector<128x128xbf16>, vector<64x128xf32> -> vector<64x128xf32>
    %177 = arith.addf %167, %176 : vector<64x128xf32>
    %c7_179 = arith.constant 7 : index
    %c0_180 = arith.constant 0 : index
    %c0_181 = arith.constant 0 : index
    %178 = vector.load %arg14[%c7_179, %c0_180, %c0_181] : memref<9x128x128xbf16, #tpu.memory_space<vmem>>, vector<1x128x128xbf16>
    %179 = vector.shape_cast %178 : vector<1x128x128xbf16> to vector<128x128xbf16>
    %cst_182 = arith.constant dense<0.000000e+00> : vector<64x128xf32>
    %180 = tpu.matmul %172, %179, %cst_182 {dimension_numbers = #tpu.dot_dimension_numbers<[1], [0], [0], [1], [0, 0, 1, 1], [], []>} : vector<64x128xbf16>, vector<128x128xbf16>, vector<64x128xf32> -> vector<64x128xf32>
    %181 = arith.addf %177, %180 : vector<64x128xf32>
    %c0_183 = arith.constant 0 : index
    %c2_184 = arith.constant 2 : index
    %c2_185 = arith.constant 2 : index
    %c0_186 = arith.constant 0 : index
    %182 = vector.load %arg1[%c0_183, %c2_184, %c2_185, %c0_186] : memref<1x10x10x128xf32, #tpu.memory_space<vmem>>, vector<1x8x8x128xf32>
    %183 = vector.shape_cast %182 : vector<1x8x8x128xf32> to vector<8x8x128xf32>
    %184 = vector.shape_cast %183 : vector<8x8x128xf32> to vector<64x128xf32>
    %c2_187 = arith.constant 2 : index
    %c2_188 = arith.constant 2 : index
    %c0_189 = arith.constant 0 : index
    %185 = vector.load %arg21[%c2_187, %c2_188, %c0_189] : memref<10x10x128xbf16, #tpu.memory_space<vmem>>, vector<8x8x128xbf16>
    %186 = vector.shape_cast %185 : vector<8x8x128xbf16> to vector<64x128xbf16>
    %187 = arith.truncf %184 : vector<64x128xf32> to vector<64x128xbf16>
    %c8 = arith.constant 8 : index
    %c0_190 = arith.constant 0 : index
    %c0_191 = arith.constant 0 : index
    %188 = vector.load %arg13[%c8, %c0_190, %c0_191] : memref<9x128x128xbf16, #tpu.memory_space<vmem>>, vector<1x128x128xbf16>
    %189 = vector.shape_cast %188 : vector<1x128x128xbf16> to vector<128x128xbf16>
    %cst_192 = arith.constant dense<0.000000e+00> : vector<64x128xf32>
    %190 = tpu.matmul %187, %189, %cst_192 {dimension_numbers = #tpu.dot_dimension_numbers<[1], [0], [0], [1], [0, 0, 1, 1], [], []>} : vector<64x128xbf16>, vector<128x128xbf16>, vector<64x128xf32> -> vector<64x128xf32>
    %191 = arith.addf %181, %190 : vector<64x128xf32>
    %c8_193 = arith.constant 8 : index
    %c0_194 = arith.constant 0 : index
    %c0_195 = arith.constant 0 : index
    %192 = vector.load %arg14[%c8_193, %c0_194, %c0_195] : memref<9x128x128xbf16, #tpu.memory_space<vmem>>, vector<1x128x128xbf16>
    %193 = vector.shape_cast %192 : vector<1x128x128xbf16> to vector<128x128xbf16>
    %cst_196 = arith.constant dense<0.000000e+00> : vector<64x128xf32>
    %194 = tpu.matmul %186, %193, %cst_196 {dimension_numbers = #tpu.dot_dimension_numbers<[1], [0], [0], [1], [0, 0, 1, 1], [], []>} : vector<64x128xbf16>, vector<128x128xbf16>, vector<64x128xf32> -> vector<64x128xf32>
    %195 = arith.addf %191, %194 : vector<64x128xf32>
    %c0_197 = arith.constant 0 : index
    %c0_198 = arith.constant 0 : index
    %196 = vector.load %arg15[%c0_197, %c0_198] : memref<1x128xf32, #tpu.memory_space<vmem>>, vector<1x128xf32>
    %197 = vector.broadcast %196 : vector<1x128xf32> to vector<64x128xf32>
    %198 = arith.mulf %195, %197 : vector<64x128xf32>
    %c0_199 = arith.constant 0 : index
    %c0_200 = arith.constant 0 : index
    %199 = vector.load %arg16[%c0_199, %c0_200] : memref<1x128xf32, #tpu.memory_space<vmem>>, vector<1x128xf32>
    %200 = vector.broadcast %199 : vector<1x128xf32> to vector<64x128xf32>
    %201 = arith.addf %198, %200 : vector<64x128xf32>
    %cst_201 = arith.constant 0.000000e+00 : f32
    %202 = vector.broadcast %cst_201 : f32 to vector<64x128xf32>
    %203 = arith.maximumf %201, %202 : vector<64x128xf32>
    %c0_202 = arith.constant 0 : index
    %c0_203 = arith.constant 0 : index
    %204 = vector.load %arg17[%c0_202, %c0_203] : memref<128x128xf32, #tpu.memory_space<vmem>>, vector<128x128xf32>
    %cst_204 = arith.constant dense<0.000000e+00> : vector<64x128xf32>
    %205 = tpu.matmul %203, %204, %cst_204 {dimension_numbers = #tpu.dot_dimension_numbers<[1], [0], [0], [1], [0, 0, 1, 1], [], []>} : vector<64x128xf32>, vector<128x128xf32>, vector<64x128xf32> -> vector<64x128xf32>
    %c0_205 = arith.constant 0 : index
    %c0_206 = arith.constant 0 : index
    %206 = vector.load %arg18[%c0_205, %c0_206] : memref<1x128xf32, #tpu.memory_space<vmem>>, vector<1x128xf32>
    %207 = vector.broadcast %206 : vector<1x128xf32> to vector<64x128xf32>
    %208 = arith.addf %205, %207 : vector<64x128xf32>
    %c0_207 = arith.constant 0 : index
    %c0_208 = arith.constant 0 : index
    %209 = vector.load %arg19[%c0_207, %c0_208] : memref<1024x64xf32, #tpu.memory_space<vmem>>, vector<1024x64xf32>
    %cst_209 = arith.constant dense<0.000000e+00> : vector<1024x128xf32>
    %210 = tpu.matmul %209, %208, %cst_209 {dimension_numbers = #tpu.dot_dimension_numbers<[1], [0], [0], [1], [0, 0, 1, 1], [], []>} : vector<1024x64xf32>, vector<64x128xf32>, vector<1024x128xf32> -> vector<1024x128xf32>
    %211 = vector.shape_cast %210 : vector<1024x128xf32> to vector<1x32x32x128xf32>
    %c0_210 = arith.constant 0 : index
    %c0_211 = arith.constant 0 : index
    %c0_212 = arith.constant 0 : index
    %c0_213 = arith.constant 0 : index
    %212 = vector.load %arg20[%c0_210, %c0_211, %c0_212, %c0_213] : memref<1x32x32x128xf32, #tpu.memory_space<vmem>>, vector<1x32x32x128xf32>
    tpu.vector_store %arg20[%c0_210, %c0_211, %c0_212, %c0_213], %211 {strides = array<i32>} : memref<1x32x32x128xf32, #tpu.memory_space<vmem>>, vector<1x32x32x128xf32>,
    return
  }
  func.func @transform_0(%arg0: i32) -> (i32, i32, i32, i32) {
    %c0_i32 = arith.constant 0 : i32
    %c0_i32_0 = arith.constant 0 : i32
    %c0_i32_1 = arith.constant 0 : i32
    %c0_i32_2 = arith.constant 0 : i32
    return %arg0, %c0_i32, %c0_i32_0, %c0_i32_1 : i32, i32, i32, i32
  }
  func.func @transform_1(%arg0: i32) -> (i32, i32) {
    %c0_i32 = arith.constant 0 : i32
    %c0_i32_0 = arith.constant 0 : i32
    %c0_i32_1 = arith.constant 0 : i32
    return %c0_i32, %c0_i32_0 : i32, i32
  }
  func.func @transform_2(%arg0: i32) -> (i32, i32) {
    %c0_i32 = arith.constant 0 : i32
    %c0_i32_0 = arith.constant 0 : i32
    %c0_i32_1 = arith.constant 0 : i32
    return %c0_i32, %c0_i32_0 : i32, i32
  }
  func.func @transform_3(%arg0: i32) -> (i32, i32) {
    %c0_i32 = arith.constant 0 : i32
    %c0_i32_0 = arith.constant 0 : i32
    %c0_i32_1 = arith.constant 0 : i32
    return %c0_i32, %c0_i32_0 : i32, i32
  }
  func.func @transform_4(%arg0: i32) -> (i32, i32) {
    %c0_i32 = arith.constant 0 : i32
    %c0_i32_0 = arith.constant 0 : i32
    %c0_i32_1 = arith.constant 0 : i32
    return %c0_i32, %c0_i32_0 : i32, i32
  }
  func.func @transform_5(%arg0: i32) -> (i32, i32) {
    %c0_i32 = arith.constant 0 : i32
    %c0_i32_0 = arith.constant 0 : i32
    %c0_i32_1 = arith.constant 0 : i32
    return %c0_i32, %c0_i32_0 : i32, i32
  }
  func.func @transform_6(%arg0: i32) -> (i32, i32) {
    %c0_i32 = arith.constant 0 : i32
    %c0_i32_0 = arith.constant 0 : i32
    %c0_i32_1 = arith.constant 0 : i32
    return %c0_i32, %c0_i32_0 : i32, i32
  }
  func.func @transform_7(%arg0: i32) -> (i32, i32) {
    %c0_i32 = arith.constant 0 : i32
    %c0_i32_0 = arith.constant 0 : i32
    %c0_i32_1 = arith.constant 0 : i32
    return %c0_i32, %c0_i32_0 : i32, i32
  }
  func.func @transform_8(%arg0: i32) -> (i32, i32) {
    %c0_i32 = arith.constant 0 : i32
    %c0_i32_0 = arith.constant 0 : i32
    %c0_i32_1 = arith.constant 0 : i32
    return %c0_i32, %c0_i32_0 : i32, i32
  }
  func.func @transform_9(%arg0: i32) -> (i32, i32, i32) {
    %c0_i32 = arith.constant 0 : i32
    %c0_i32_0 = arith.constant 0 : i32
    %c0_i32_1 = arith.constant 0 : i32
    %c0_i32_2 = arith.constant 0 : i32
    return %c0_i32, %c0_i32_0, %c0_i32_1 : i32, i32, i32
  }
  func.func @transform_10(%arg0: i32) -> (i32, i32) {
    %c0_i32 = arith.constant 0 : i32
    %c0_i32_0 = arith.constant 0 : i32
    %c0_i32_1 = arith.constant 0 : i32
    return %c0_i32, %c0_i32_0 : i32, i32
  }
  func.func @transform_11(%arg0: i32) -> (i32, i32) {
    %c0_i32 = arith.constant 0 : i32
    %c0_i32_0 = arith.constant 0 : i32
    %c0_i32_1 = arith.constant 0 : i32
    return %c0_i32, %c0_i32_0 : i32, i32
  }
  func.func @transform_12(%arg0: i32) -> (i32, i32, i32) {
    %c0_i32 = arith.constant 0 : i32
    %c0_i32_0 = arith.constant 0 : i32
    %c0_i32_1 = arith.constant 0 : i32
    %c0_i32_2 = arith.constant 0 : i32
    return %c0_i32, %c0_i32_0, %c0_i32_1 : i32, i32, i32
  }
  func.func @transform_13(%arg0: i32) -> (i32, i32, i32) {
    %c0_i32 = arith.constant 0 : i32
    %c0_i32_0 = arith.constant 0 : i32
    %c0_i32_1 = arith.constant 0 : i32
    %c0_i32_2 = arith.constant 0 : i32
    return %c0_i32, %c0_i32_0, %c0_i32_1 : i32, i32, i32
  }
  func.func @transform_14(%arg0: i32) -> (i32, i32) {
    %c0_i32 = arith.constant 0 : i32
    %c0_i32_0 = arith.constant 0 : i32
    %c0_i32_1 = arith.constant 0 : i32
    return %c0_i32, %c0_i32_0 : i32, i32
  }
  func.func @transform_15(%arg0: i32) -> (i32, i32) {
    %c0_i32 = arith.constant 0 : i32
    %c0_i32_0 = arith.constant 0 : i32
    %c0_i32_1 = arith.constant 0 : i32
    return %c0_i32, %c0_i32_0 : i32, i32
  }
  func.func @transform_16(%arg0: i32) -> (i32, i32) {
    %c0_i32 = arith.constant 0 : i32
    %c0_i32_0 = arith.constant 0 : i32
    %c0_i32_1 = arith.constant 0 : i32
    return %c0_i32, %c0_i32_0 : i32, i32
  }
  func.func @transform_17(%arg0: i32) -> (i32, i32) {
    %c0_i32 = arith.constant 0 : i32
    %c0_i32_0 = arith.constant 0 : i32
    %c0_i32_1 = arith.constant 0 : i32
    return %c0_i32, %c0_i32_0 : i32, i32
  }
  func.func @transform_18(%arg0: i32) -> (i32, i32) {
    %c0_i32 = arith.constant 0 : i32
    %c0_i32_0 = arith.constant 0 : i32
    %c0_i32_1 = arith.constant 0 : i32
    return %c0_i32, %c0_i32_0 : i32, i32
  }
  func.func @transform_19(%arg0: i32) -> (i32, i32, i32, i32) {
    %c0_i32 = arith.constant 0 : i32
    %c0_i32_0 = arith.constant 0 : i32
    %c0_i32_1 = arith.constant 0 : i32
    %c0_i32_2 = arith.constant 0 : i32
    return %arg0, %c0_i32, %c0_i32_0, %c0_i32_1 : i32, i32, i32, i32
  }
}

</mosaic_0001>

<bundles_post_ra>
// kernel: pspnet_forward.2
= control target key start
LH: loop header
LB: loop body
LE: loop exit
PB: predicated region body
PF: predicated region fallthrough
CT: control target
= control target key end

     0   :  { %s655_s1 = inlined_call_operand.vmem [shape: bf16[128,128], index: 1, kind: input, shape index: {}]   ;;  %s656_s0 = inlined_call_operand.vmem [shape: bf16[128,128], index: 0, kind: input, shape index: {}]   ;;  %s657_s2 = inlined_call_operand.vmem [shape: f32[1,128], index: 2, kind: input, shape index: {}]   ;;  %s658_s3 = inlined_call_operand.vmem [shape: f32[1,128], index: 3, kind: input, shape index: {}]   ;;  %s659_s4 = inlined_call_operand.vmem [shape: f32[128,128], index: 4, kind: output, shape index: {}]  }
   0x1   :  { %v494_v0 = vld [vmem:[%s655_s1] sm:$0xff]   ;;  %v495_v1 = vld [vmem:[%s655_s1 + $0x8] sm:$0xff]   ;;  %v496_v2 = vld [vmem:[%s655_s1 + $0x10] sm:$0xff]  }
   0x2   :  { %446 = vmatprep.subr.bf16.mxu0 %v494_v0  ;;  %478 = vmatprep.subr.bf16.mxu1 %v494_v0  ;;  %v497_v3 = vld [vmem:[%s655_s1 + $0x18] sm:$0xff]   ;;  %v502_v4 = vld [vmem:[%s656_s0] sm:$0xff]   ;;  %v499_v7 = vld [vmem:[%s655_s1 + $0x28] sm:$0xff]  }
   0x3   :  { %447 = vmatpush3.bf16.msra.mxu0 %v494_v0  ;;  %486 = vmatpush3.bf16.msra.mxu1 %v494_v0  ;;  %v503_v5 = vld [vmem:[%s656_s0 + $0x20] sm:$0xff]   ;;  %v500_v8 = vld [vmem:[%s655_s1 + $0x30] sm:$0xff]   ;;  %v501_v9 = vld [vmem:[%s655_s1 + $0x38] sm:$0xff]  }
   0x4   :  { %448 = vmatprep.subr.bf16.mxu0 %v495_v1  ;;  %479 = vmatprep.subr.bf16.mxu1 %v495_v1  ;;  %v498_v6 = vld [vmem:[%s655_s1 + $0x20] sm:$0xff]   ;;  %v504_v10 = vld [vmem:[%s656_s0 + $0x8] sm:$0xff]   ;;  %v506_v12 = vld [vmem:[%s656_s0 + $0x10] sm:$0xff]  }
   0x5   :  { %462 = vmatprep.mubr.bf16.mxu0 %v502_v4  ;;  %470 = vmatprep.mubr.bf16.mxu1 %v503_v5  ;;  %v505_v11 = vld [vmem:[%s656_s0 + $0x28] sm:$0xff]   ;;  %v507_v13 = vld [vmem:[%s656_s0 + $0x30] sm:$0xff]   ;;  %v508_v14 = vld [vmem:[%s656_s0 + $0x18] sm:$0xff]  }
   0x6   :  { %v509_v15 = vld [vmem:[%s656_s0 + $0x38] sm:$0xff]   ;;  %v428_v16 = vld [vmem:[%s657_s2] ss:$0 sm:$0xff] }
   0x7   :  { %449 = vmatpush3.bf16.msra.mxu0 %v495_v1  ;;  %487 = vmatpush3.bf16.msra.mxu1 %v495_v1  ;;  %v589_v18 = vld [vmem:[%s658_s3] ss:$0 sm:$0xff] }
   0x8   :  { %450 = vmatprep.subr.bf16.mxu0 %v496_v2  ;;  %480 = vmatprep.subr.bf16.mxu1 %v496_v2 }
   0xb   :  { %451 = vmatpush3.bf16.msra.mxu0 %v496_v2  ;;  %488 = vmatpush3.bf16.msra.mxu1 %v496_v2 }
   0xc   :  { %452 = vmatprep.subr.bf16.mxu0 %v497_v3  ;;  %481 = vmatprep.subr.bf16.mxu1 %v497_v3 }
   0xf   :  { %453 = vmatpush3.bf16.msra.mxu0 %v497_v3  ;;  %489 = vmatpush3.bf16.msra.mxu1 %v497_v3 }
  0x10   :  { %454 = vmatprep.subr.bf16.mxu0 %v498_v6  ;;  %482 = vmatprep.subr.bf16.mxu1 %v498_v6 }
  0x13   :  { %455 = vmatpush3.bf16.msra.mxu0 %v498_v6  ;;  %490 = vmatpush3.bf16.msra.mxu1 %v498_v6 }
  0x14   :  { %456 = vmatprep.subr.bf16.mxu0 %v499_v7  ;;  %483 = vmatprep.subr.bf16.mxu1 %v499_v7 }
  0x17   :  { %457 = vmatpush3.bf16.msra.mxu0 %v499_v7  ;;  %491 = vmatpush3.bf16.msra.mxu1 %v499_v7 }
  0x18   :  { %458 = vmatprep.subr.bf16.mxu0 %v500_v8  ;;  %484 = vmatprep.subr.bf16.mxu1 %v500_v8 }
  0x1b   :  { %459 = vmatpush3.bf16.msra.mxu0 %v500_v8  ;;  %492 = vmatpush3.bf16.msra.mxu1 %v500_v8 }
  0x1c   :  { %460 = vmatprep.subr.bf16.mxu0 %v501_v9  ;;  %485 = vmatprep.subr.bf16.mxu1 %v501_v9 }
  0x1f   :  { %461 = vmatpush3.bf16.msra.mxu0 %v501_v9  ;;  %493 = vmatpush3.bf16.msra.mxu1 %v501_v9 }
  0x22   :  { %463 = vmatmul.mubr.bf16.vlgmr.msra.gmra.mrb[0].mxu0 %v504_v10  ;;  %471 = vmatmul.mubr.bf16.vlgmr.msra.gmra.mrb[0].mxu1 %v505_v11 }
  0x23   :  { %466 = vmatprep.mubr.bf16.mxu0 %v506_v12  ;;  %474 = vmatprep.mubr.bf16.mxu1 %v507_v13 }
  0x2a   :  { %467 = vmatmul.mubr.bf16.gmra.mrb[4].mxu0 %v508_v14  ;;  %475 = vmatmul.mubr.bf16.gmra.mrb[4].mxu1 %v509_v15 }
  0xf5   :  { %v464_v17 = vpop.f32.mrb[0].mxu0  ;;  %v472_v19 = vpop.f32.mrb[0].mxu1 }
  0xf6   :  { %v339_v20 = vmul.f32 %v464_v17, %v428_v16  ;;  %v347_v21 = vmul.f32 %v472_v19, %v428_v16  ;;  %v216_v22 = vpop.f32.mrb[1].mxu0  ;;  %v248_v23 = vpop.f32.mrb[1].mxu1 }
  0xf7   :  { %v337_v24 = vmul.f32 %v428_v16, %v216_v22  ;;  %v345_v25 = vmul.f32 %v428_v16, %v248_v23  ;;  %v465_v26 = vpop.f32.mrb[2].mxu0  ;;  %v473_v27 = vpop.f32.mrb[2].mxu1 }
  0xf8   :  { %v362_v28 = vadd.f32 %v589_v18, %v339_v20  ;;  %v370_v29 = vadd.f32 %v589_v18, %v347_v21  ;;  %v340_v30 = vmul.f32 %v465_v26, %v428_v16  ;;  %v348_v31 = vmul.f32 %v473_v27, %v428_v16  ;;  %v219_v32 = vpop.f32.mrb[3].mxu0  ;;  %v251_v33 = vpop.f32.mrb[3].mxu1 }
  0xf9   :  { %v360_v34 = vadd.f32 %v589_v18, %v337_v24  ;;  %v368_v35 = vadd.f32 %v589_v18, %v345_v25  ;;  %v338_v36 = vmul.f32 %v428_v16, %v219_v32  ;;  %v346_v37 = vmul.f32 %v428_v16, %v251_v33 }
  0xfa   :  { %v378_v38 = vmax.f32 %v362_v28, 0.0  ;;  %v386_v39 = vmax.f32 %v370_v29, 0.0  ;;  %v363_v40 = vadd.f32 %v589_v18, %v340_v30  ;;  %v371_v41 = vadd.f32 %v589_v18, %v348_v31 }
  0xfb   :  { %v376_v42 = vmax.f32 %v360_v34, 0.0  ;;  %v384_v43 = vmax.f32 %v368_v35, 0.0  ;;  %v361_v44 = vadd.f32 %v589_v18, %v338_v36  ;;  %v369_v45 = vadd.f32 %v589_v18, %v346_v37 }
  0xfc   :  { %394 = vst [vmem:[%s659_s4 + $0x10] sm:$0xff] %v378_v38  ;;  %402 = vst [vmem:[%s659_s4 + $0x50] sm:$0xff] %v386_v39  ;;  %v379_v46 = vmax.f32 %v363_v40, 0.0  ;;  %v387_v47 = vmax.f32 %v371_v41, 0.0 }
  0xfd   :  { %392 = vst [vmem:[%s659_s4] sm:$0xff] %v376_v42  ;;  %400 = vst [vmem:[%s659_s4 + $0x40] sm:$0xff] %v384_v43  ;;  %v377_v48 = vmax.f32 %v361_v44, 0.0  ;;  %v385_v49 = vmax.f32 %v369_v45, 0.0  ;;  %v468_v50 = vpop.f32.mrb[4].mxu0  ;;  %v476_v51 = vpop.f32.mrb[4].mxu1 }
  0xfe   :  { %395 = vst [vmem:[%s659_s4 + $0x18] sm:$0xff] %v379_v46  ;;  %403 = vst [vmem:[%s659_s4 + $0x58] sm:$0xff] %v387_v47  ;;  %v343_v52 = vmul.f32 %v468_v50, %v428_v16  ;;  %v351_v53 = vmul.f32 %v476_v51, %v428_v16  ;;  %v232_v54 = vpop.f32.mrb[5].mxu0  ;;  %v264_v55 = vpop.f32.mrb[5].mxu1 }
  0xff   :  { %393 = vst [vmem:[%s659_s4 + $0x8] sm:$0xff] %v377_v48  ;;  %401 = vst [vmem:[%s659_s4 + $0x48] sm:$0xff] %v385_v49  ;;  %v341_v56 = vmul.f32 %v428_v16, %v232_v54  ;;  %v349_v57 = vmul.f32 %v428_v16, %v264_v55  ;;  %v469_v58 = vpop.f32.mrb[6].mxu0  ;;  %v477_v59 = vpop.f32.mrb[6].mxu1 }
 0x100   :  { %v366_v60 = vadd.f32 %v589_v18, %v343_v52  ;;  %v374_v61 = vadd.f32 %v589_v18, %v351_v53  ;;  %v344_v62 = vmul.f32 %v469_v58, %v428_v16  ;;  %v352_v63 = vmul.f32 %v477_v59, %v428_v16  ;;  %v235_v0 = vpop.f32.mrb[7].mxu0  ;;  %v267_v1 = vpop.f32.mrb[7].mxu1 }
 0x101   :  { %v364_v2 = vadd.f32 %v589_v18, %v341_v56  ;;  %v372_v3 = vadd.f32 %v589_v18, %v349_v57  ;;  %v342_v4 = vmul.f32 %v428_v16, %v235_v0  ;;  %v350_v5 = vmul.f32 %v428_v16, %v267_v1 }
 0x102   :  { %v382_v6 = vmax.f32 %v366_v60, 0.0  ;;  %v390_v7 = vmax.f32 %v374_v61, 0.0  ;;  %v367_v8 = vadd.f32 %v589_v18, %v344_v62  ;;  %v375_v9 = vadd.f32 %v589_v18, %v352_v63 }
 0x103   :  { %v380_v10 = vmax.f32 %v364_v2, 0.0  ;;  %v388_v11 = vmax.f32 %v372_v3, 0.0  ;;  %v365_v12 = vadd.f32 %v589_v18, %v342_v4  ;;  %v373_v13 = vadd.f32 %v589_v18, %v350_v5 }
 0x104   :  { %398 = vst [vmem:[%s659_s4 + $0x30] sm:$0xff] %v382_v6  ;;  %406 = vst [vmem:[%s659_s4 + $0x70] sm:$0xff] %v390_v7  ;;  %v383_v14 = vmax.f32 %v367_v8, 0.0  ;;  %v391_v15 = vmax.f32 %v375_v9, 0.0 }
 0x105   :  { %396 = vst [vmem:[%s659_s4 + $0x20] sm:$0xff] %v380_v10  ;;  %404 = vst [vmem:[%s659_s4 + $0x60] sm:$0xff] %v388_v11  ;;  %v381_v16 = vmax.f32 %v365_v12, 0.0  ;;  %v389_v17 = vmax.f32 %v373_v13, 0.0 }
 0x106   :  { %399 = vst [vmem:[%s659_s4 + $0x38] sm:$0xff] %v383_v14  ;;  %407 = vst [vmem:[%s659_s4 + $0x78] sm:$0xff] %v391_v15 }
 0x107   :  { %397 = vst [vmem:[%s659_s4 + $0x28] sm:$0xff] %v381_v16  ;;  %405 = vst [vmem:[%s659_s4 + $0x68] sm:$0xff] %v389_v17 }

// kernel: pspnet_forward.3
= control target key start
LH: loop header
LB: loop body
LE: loop exit
PB: predicated region body
PF: predicated region fallthrough
CT: control target
= control target key end

     0   :  { %s12381_s0 = inlined_call_operand.vmem [shape: f32[2,10,10,128], index: 0, kind: input, shape index: {}]   ;;  %s12382_s1 = inlined_call_operand.vmem [shape: f32[8,64], index: 1, kind: input, shape index: {}]   ;;  %s12383_s2 = inlined_call_operand.vmem [shape: f32[8,64], index: 2, kind: input, shape index: {}]   ;;  %s12384_s3 = inlined_call_operand.vmem [shape: f32[16,64], index: 3, kind: input, shape index: {}]   ;;  %s12385_s4 = inlined_call_operand.vmem [shape: f32[40,64], index: 4, kind: input, shape index: {}]   ;;  %s12386_s5 = inlined_call_operand.vmem [shape: f32[64,8], index: 5, kind: input, shape index: {}]   ;;  %s12387_s6 = inlined_call_operand.vmem [shape: f32[64,8], index: 6, kind: input, shape index: {}]   ;;  %s12388_s7 = inlined_call_operand.vmem [shape: f32[64,16], index: 7, kind: input, shape index: {}]   ;;  %s12389_s8 = inlined_call_operand.vmem [shape: f32[64,40], index: 8, kind: input, shape index: {}]   ;;  %s12390_s9 = inlined_call_operand.vmem [shape: f32[4,128,32], index: 9, kind: input, shape index: {}]   ;;  %s12391_s10 = inlined_call_operand.vmem [shape: f32[4,32], index: 10, kind: input, shape index: {}]   ;;  %s12392_s11 = inlined_call_operand.vmem [shape: f32[4,32], index: 11, kind: input, shape index: {}]   ;;  %s12393_s12 = inlined_call_operand.vmem [shape: bf16[9,128,128], index: 12, kind: input, shape index: {}]   ;;  %s12394_s13 = inlined_call_operand.vmem [shape: bf16[9,128,128], index: 13, kind: input, shape index: {}]   ;;  %s12395_s14 = inlined_call_operand.vmem [shape: f32[1,128], index: 14, kind: input, shape index: {}]   ;;  %s12396_s15 = inlined_call_operand.vmem [shape: f32[1,128], index: 15, kind: input, shape index: {}]   ;;  %s12397_s16 = inlined_call_operand.vmem [shape: f32[128,128], index: 16, kind: input, shape index: {}]   ;;  %s12398_s17 = inlined_call_operand.vmem [shape: f32[1,128], index: 17, kind: input, shape index: {}]   ;;  %s12399_s18 = inlined_call_operand.vmem [shape: f32[1024,64], index: 18, kind: input, shape index: {}]   ;;  %s12400_s19 = inlined_call_operand.vmem [shape: f32[2,32,32,128], index: 19, kind: output, shape index: {}]  }
   0x1   :  { %12413 = sst [smem:[#allocation14_spill]] %s12381_s0  ;;  %s10128_s0 = smov 0  }
   0x2   :  { %12414 = sst [smem:[#allocation15_spill]] %s12382_s1 }
   0x3   :  { %12415 = sst [smem:[#allocation16_spill]] %s12383_s2 }
   0x4   :  { %12416 = sst [smem:[#allocation17_spill]] %s12384_s3 }
   0x5 LB: > { %s7146_s30 = sadd.s32 4294967295, %s10019_s0   ;;  %p7150_p0 = scmp.ge.s32.totalorder %s10019_s0, 1  ;;  %s10019_s0 = sphi %s10128_s0, %s29_s0  }
   0x6   : > { %p537_p1 = scmp.lt.s32.totalorder %s10019_s0, 3 }
   0x8   : > { %p538_p2 = pnand %p7150_p0, %p537_p1 }
   0xa   : > { %541 = sbr.rel (%p538_p2) target bundleno = 3191 (0xc77), region = 96 }
  0x11   : > { %p593_p3 = scmp.lt.s32.totalorder %s7146_s30, 1  ;;  %v10021_v0 = vmov 0.0|0.0   ;;  %vm10022_vm0 = vmmov 0   ;;  %v10023_v1 = vmov 0.0   ;;  %v688_v2 = vld [vmem:[%s12390_s9] sm:$0xff]  ;;  %v689_v3 = vld [vmem:[%s12390_s9 + $0x8] sm:$0xff] }
  0x12   : > { %9438 = vmatprep.subr.bf16.mxu0 %v10021_v0  ;;  %8464 = vmatprep.mubr.msk.f32.mxu0 %vm10022_vm0, %v10023_v1  ;;  %v690_v4 = vld [vmem:[%s12390_s9 + $0x10] sm:$0xff]  ;;  %v9451_v5 = vpack.c.bf16 %v689_v3, %v688_v2  ;;  %v691_v6 = vld [vmem:[%s12390_s9 + $0x18] sm:$0xff]  ;;  %v692_v8 = vld [vmem:[%s12390_s9 + $0x20] sm:$0xff]  ;;  %s12417_s1 = sld [smem:[#allocation14_spill]]  ;;  %vm614_vm1 = vcmask 523264   ;;  %s12418_s27 = sld [smem:[#allocation15_spill]] }
  0x13   : > { %s12458_s30 = smov (!%p593_p3, %s7146_s30), 1  ;;  %9450 = vmatprep.subr.bf16.mxu1 %v10021_v0  ;;  %8499 = vmatprep.mubr.msk.f32.mxu1 %vm10022_vm0, %v10023_v1  ;;  %v9454_v7 = vpack.c.bf16 %v691_v6, %v690_v4  ;;  %v693_v9 = vld [vmem:[%s12390_s9 + $0x28] sm:$0xff]  ;;  %v694_v16 = vld [vmem:[%s12390_s9 + $0x30] sm:$0xff]  ;;  %v695_v17 = vld [vmem:[%s12390_s9 + $0x38] sm:$0xff]  ;;  %s12419_s23 = sld [smem:[#allocation16_spill]]  ;;  %vm795_vm2 = vcmask 64512  }
  0x14   : > { %s9790_s3 = smul.u32 160, %s12458_s30  ;;  %9452 = vmatpush3.bf16.msra.mxu1 %v9451_v5  ;;  %v9457_v15 = vpack.c.bf16 %v693_v9, %v692_v8  ;;  %v696_v21 = vld [vmem:[%s12390_s9 + $0x40] sm:$0xff]  ;;  %v697_v22 = vld [vmem:[%s12390_s9 + $0x48] sm:$0xff]  ;;  %v9460_v23 = vpack.c.bf16 %v695_v17, %v694_v16  ;;  %v698_v27 = vld [vmem:[%s12390_s9 + $0x50] sm:$0xff]  ;;  %vm1435_vm3 = vcmask 130048   ;;  %s10024_s24 = smov 32  }
  0x15   : > { %9453 = vmatprep.subr.bf16.mxu1 %v10021_v0  ;;  %v699_v28 = vld [vmem:[%s12390_s9 + $0x58] sm:$0xff]  ;;  %v9463_v29 = vpack.c.bf16 %v697_v22, %v696_v21  ;;  %v700_v31 = vld [vmem:[%s12390_s9 + $0x60] sm:$0xff]  ;;  %v701_v32 = vld [vmem:[%s12390_s9 + $0x68] sm:$0xff]  ;;  %s10025_s25 = smov 64   ;;  %vm1815_vm4 = vcmask 326656   ;;  %s10027_s20 = smov 96  }
  0x16   : > { %v9466_v34 = vpack.c.bf16 %v699_v28, %v698_v27  ;;  %v702_v35 = vld [vmem:[%s12390_s9 + $0x70] sm:$0xff]  ;;  %v703_v36 = vld [vmem:[%s12390_s9 + $0x78] sm:$0xff]  ;;  %v9469_v37 = vpack.c.bf16 %v701_v32, %v700_v31  ;;  %v787_v42 = vld [vmem:[%s12386_s5] sm:$0xff]  ;;  %vm2041_vm5 = vcmask 261120   ;;  %vm2058_vm6 = vcmask 785408   ;;  %s7908_s28 = sshll.u32 %s12458_s30, 10 }
  0x17   : > { %v9472_v38 = vpack.c.bf16 %v703_v36, %v702_v35  ;;  %v7163_v47 = vld [vmem:[%s12391_s10] ss:$0 sm:$0xff]  ;;  %v7175_v54 = vld [vmem:[%s12390_s9 + $0x88] sm:$0xff]  ;;  %v7176_v58 = vld [vmem:[%s12390_s9 + $0x90] sm:$0xff]  ;;  %vm2200_vm7 = vcmask 1043456   ;;  %vm2206_vm9 = vcmask 1040384  }
  0x18   : > { %s10167_s22 = scalar_lea.vmem %s12417_s1, %s9790_s3  ;;  %9455 = vmatpush3.bf16.msra.mxu1 %v9454_v7  ;;  %v613_v33 = vld [vmem:[%s12418_s27] sm:$0xff]  ;;  %s12420_s27 = sld [smem:[#allocation17_spill]]  ;;  %v788_v56 = vld [vmem:[%s12386_s5 + $0x8] sm:$0xff]  ;;  %v7177_v59 = vld [vmem:[%s12390_s9 + $0x98] sm:$0xff]  ;;  %vm2201_vm8 = vsmask.f32 7938 }
  0x19   : > { %v7154_v10 = vld [vmem:[%s10167_s22 + $0x11] sm:$0xff]  ;;  %v7155_v11 = vld [vmem:[%s10167_s22 + $0x21] sm:$0xff]  ;;  %9456 = vmatprep.subr.bf16.mxu1 %v10021_v0  ;;  %v7164_v49 = vld [vmem:[%s12392_s11] ss:$0 sm:$0xff]  ;;  %v9490_v61 = vpack.c.bf16 %v7177_v59, %v7176_v58  ;;  %vm2207_vm10 = vsmask.f32 256 }
  0x1a   : > { %v7156_v12 = vld [vmem:[%s10167_s22 + $0x31] sm:$0xff]  ;;  %v10172_v13 = vpack.c.bf16 %v7155_v11, %v7154_v10  ;;  %v7157_v14 = vld [vmem:[%s10167_s22 + $0x41] sm:$0xff]  ;;  %vm10788_vm11 = vmand %vm2200_vm7, %vm2201_vm8  ;;  %vm2580_vm13 = vsmask.f32 3328  ;;  %vm2581_vm14 = vsmask.f32 7440 }
  0x1b   : > { %v7158_v18 = vld [vmem:[%s10167_s22 + $0x51] sm:$0xff]  ;;  %v7159_v19 = vld [vmem:[%s10167_s22 + $0x61] sm:$0xff]  ;;  %v10185_v20 = vpack.c.bf16 %v7157_v14, %v7156_v12  ;;  %vm10796_vm12 = vmand %vm2206_vm9, %vm2207_vm10 }
  0x1c   : > { %9440 = vmatpush3.bf16.msra.mxu0 %v10172_v13  ;;  %9458 = vmatpush3.bf16.msra.mxu1 %v9457_v15  ;;  %v7160_v24 = vld [vmem:[%s10167_s22 + $0x71] sm:$0xff]  ;;  %v7161_v25 = vld [vmem:[%s10167_s22 + $0x81] sm:$0xff]  ;;  %v10198_v26 = vpack.c.bf16 %v7159_v19, %v7158_v18  ;;  %vm10872_vm15 = vmor %vm2580_vm13, %vm2581_vm14 }
  0x1d   : > { %9441 = vmatprep.subr.bf16.mxu0 %v10021_v0  ;;  %9459 = vmatprep.subr.bf16.mxu1 %v10021_v0  ;;  %v10209_v30 = vpack.c.bf16 %v7161_v25, %v7160_v24  ;;  %v925_v39 = vld [vmem:[%s12419_s23] sm:$0xff]  ;;  %v789_v60 = vld [vmem:[%s12386_s5 + $0x10] sm:$0xff]  ;;  %v790_v62 = vld [vmem:[%s12386_s5 + $0x18] sm:$0xff] }
  0x1e   : > { %v1236_v45 = vld [vmem:[%s12420_s27] sm:$0xff]  ;;  %v1237_v46 = vld [vmem:[%s12420_s27 + $0x8] sm:$0xff]  ;;  %v7180_v6 = vld [vmem:[%s12390_s9 + $0xb0] sm:$0xff] }
  0x1f   : > { %v7174_v53 = vld [vmem:[%s12390_s9 + $0x80] sm:$0xff]  ;;  %v7179_v2 = vld [vmem:[%s12390_s9 + $0xa8] sm:$0xff]  ;;  %v7181_v7 = vld [vmem:[%s12390_s9 + $0xb8] sm:$0xff] }
  0x20   : > { %9443 = vmatpush3.bf16.msra.mxu0 %v10185_v20  ;;  %9461 = vmatpush3.bf16.msra.mxu1 %v9460_v23  ;;  %v9487_v57 = vpack.c.bf16 %v7175_v54, %v7174_v53  ;;  %v7178_v63 = vld [vmem:[%s12390_s9 + $0xa0] sm:$0xff]  ;;  %v792_v5 = vld [vmem:[%s12386_s5 + $0x28] sm:$0xff]  ;;  %v793_v8 = vld [vmem:[%s12386_s5 + $0x30] sm:$0xff]  ;;  %v9496_v9 = vpack.c.bf16 %v7181_v7, %v7180_v6 }
  0x21   : > { %9444 = vmatprep.subr.bf16.mxu0 %v10021_v0  ;;  %9462 = vmatprep.subr.bf16.mxu1 %v10021_v0  ;;  %v791_v3 = vld [vmem:[%s12386_s5 + $0x20] sm:$0xff]  ;;  %v9493_v4 = vpack.c.bf16 %v7179_v2, %v7178_v63  ;;  %v794_v10 = vld [vmem:[%s12386_s5 + $0x38] sm:$0xff]  ;;  %v7183_v12 = vld [vmem:[%s12390_s9 + $0xc8] sm:$0xff] }
  0x22   : > { %v7182_v11 = vld [vmem:[%s12390_s9 + $0xc0] sm:$0xff]  ;;  %v7184_v15 = vld [vmem:[%s12390_s9 + $0xd0] sm:$0xff]  ;;  %v7185_v16 = vld [vmem:[%s12390_s9 + $0xd8] sm:$0xff] }
  0x23   : > { %v9499_v14 = vpack.c.bf16 %v7183_v12, %v7182_v11  ;;  %v9502_v17 = vpack.c.bf16 %v7185_v16, %v7184_v15  ;;  %v7186_v18 = vld [vmem:[%s12390_s9 + $0xe0] sm:$0xff]  ;;  %v7187_v19 = vld [vmem:[%s12390_s9 + $0xe8] sm:$0xff]  ;;  %v7188_v22 = vld [vmem:[%s12390_s9 + $0xf0] sm:$0xff] }
  0x24   : > { %9446 = vmatpush3.bf16.msra.mxu0 %v10198_v26  ;;  %9464 = vmatpush3.bf16.msra.mxu1 %v9463_v29  ;;  %v9505_v21 = vpack.c.bf16 %v7187_v19, %v7186_v18  ;;  %v7189_v23 = vld [vmem:[%s12390_s9 + $0xf8] sm:$0xff]  ;;  %v1099_v25 = vld [vmem:[%s12387_s6] sm:$0xff]  ;;  %v7207_v54 = vld [vmem:[%s12390_s9 + $0x128] sm:$0xff] }
  0x25   : > { %9447 = vmatprep.subr.bf16.mxu0 %v10021_v0  ;;  %9465 = vmatprep.subr.bf16.mxu1 %v10021_v0  ;;  %v9508_v24 = vpack.c.bf16 %v7189_v23, %v7188_v22  ;;  %v7206_v53 = vld [vmem:[%s12390_s9 + $0x120] sm:$0xff]  ;;  %v7208_v58 = vld [vmem:[%s12390_s9 + $0x130] sm:$0xff]  ;;  %v7209_v59 = vld [vmem:[%s12390_s9 + $0x138] sm:$0xff] }
  0x26   : > { %v7210_v63 = vld [vmem:[%s12390_s9 + $0x140] sm:$0xff]  ;;  %v7211_v2 = vld [vmem:[%s12390_s9 + $0x148] sm:$0xff]  ;;  %v7213_v6 = vld [vmem:[%s12390_s9 + $0x158] sm:$0xff] }
  0x27   : > { %v7216_v11 = vld [vmem:[%s12390_s9 + $0x170] sm:$0xff]  ;;  %v7217_v12 = vld [vmem:[%s12390_s9 + $0x178] sm:$0xff]  ;;  %v1427_v15 = vld [vmem:[%s12388_s7] sm:$0xff] }
  0x28   : > { %9449 = vmatpush3.bf16.msra.mxu0 %v10209_v30  ;;  %9467 = vmatpush3.bf16.msra.mxu1 %v9466_v34 }
  0x29   : > { %9474 = vmatprep.subr.bf16.mxu0 %v10021_v0  ;;  %9468 = vmatprep.subr.bf16.mxu1 %v10021_v0 }
  0x2b   : > { %8465 = vmatmul.mubr.msk.f32.vlgmr.msra.gmra.mrb[0].mxu0 %vm614_vm1, %v613_v33 }
  0x2c   : > { %9476 = vmatpush3.bf16.msra.mxu0 %v10172_v13  ;;  %8532 = vmatprep.mubr.msk.f32.mxu0 %vm10022_vm0, %v10023_v1 }
  0x2d   : > { %9477 = vmatprep.subr.bf16.mxu0 %v10021_v0  ;;  %9470 = vmatpush3.bf16.msra.mxu1 %v9469_v37 }
  0x2e   : > { %9471 = vmatprep.subr.bf16.mxu1 %v10021_v0 }
  0x30   : > { %9479 = vmatpush3.bf16.msra.mxu0 %v10185_v20 }
  0x31   : > { %9480 = vmatprep.subr.bf16.mxu0 %v10021_v0  ;;  %9473 = vmatpush3.bf16.msra.mxu1 %v9472_v38  ;;  %v7190_v38 = vld [vmem:[%s12391_s10 + $0x1] ss:$0 sm:$0xff] }
  0x34   : > { %9482 = vmatpush3.bf16.msra.mxu0 %v10198_v26 }
  0x35   : > { %9483 = vmatprep.subr.bf16.mxu0 %v10021_v0 }
  0x38   : > { %9485 = vmatpush3.bf16.msra.mxu0 %v10209_v30 }
  0x39   : > { %9511 = vmatprep.subr.bf16.mxu0 %v10172_v13 }
  0x3b   : > { %8533 = vmatmul.mubr.msk.f32.vlgmr.msra.gmra.mrb[2].mxu0 %vm614_vm1, %v925_v39 }
  0x3c   : > { %9513 = vmatpush3.bf16.msra.mxu0 %v10172_v13  ;;  %8600 = vmatprep.mubr.msk.f32.mxu0 %vm614_vm1, %v1236_v45 }
  0x3d   : > { %9515 = vmatprep.subr.bf16.mxu0 %v10185_v20 }
  0x40   : > { %9517 = vmatpush3.bf16.msra.mxu0 %v10185_v20 }
  0x41   : > { %9519 = vmatprep.subr.bf16.mxu0 %v10198_v26 }
  0x44   : > { %9521 = vmatpush3.bf16.msra.mxu0 %v10198_v26 }
  0x45   : > { %9523 = vmatprep.subr.bf16.mxu0 %v10209_v30 }
  0x48   : > { %9525 = vmatpush3.bf16.msra.mxu0 %v10209_v30 }
  0x4b   : > { %8601 = vmatmul.mubr.msk.f32.vlgmr.msra.gmra.mrb[4].mxu0 %vm614_vm1, %v1237_v46  ;;  %v7204_v46 = vld [vmem:[%s12390_s9 + $0x110] sm:$0xff] }
  0xfe   : > { %v684_v40 = vpop.f32.mrb[0].mxu0 }
  0xff   : > { %v8466_v41 = vpop.f32.mrb[1].mxu0  ;;  %8500 = vmatmul.mubr.f32.vlgmr.msra.gmra.mrb[0].mxu1 %v684_v40  ;;  %v7191_v40 = vld [vmem:[%s12392_s11 + $0x1] ss:$0 sm:$0xff] }
 0x100   : > { %8504 = vmatprep.mubr.msk.f32.mxu1 %vm795_vm2, %v787_v42 }
 0x10e   : > { %v10258_v43 = vpop.f32.mrb[2].mxu0 }
 0x10f   : > { %v8534_v44 = vpop.f32.mrb[3].mxu0 }
 0x110   : > { %v7203_v44 = vld [vmem:[%s12390_s9 + $0x108] sm:$0xff] }
 0x11e   : > { %v10365_v27 = vpop.f32.mrb[4].mxu0 }
 0x11f   : > { %v1310_v28 = vpop.f32.mrb[5].mxu0 }
 0x1d2   : > { %v770_v48 = vpop.f32.mrb[0].mxu1 }
 0x1d3   : > { %v779_v50 = vmul.f32 %v7163_v47, %v770_v48  ;;  %v8501_v51 = vpop.f32.mrb[1].mxu1  ;;  %v7205_v47 = vld [vmem:[%s12390_s9 + $0x118] sm:$0xff] }
 0x1d4   : > { %v9530_v51 = vpack.c.bf16 %v7205_v47, %v7204_v46 }
 0x1d5   : > { %v785_v52 = vadd.f32 %v7164_v49, %v779_v50  ;;  %v1100_v50 = vld [vmem:[%s12387_s6 + $0x8] sm:$0xff] }
 0x1d7   : > { %v786_v55 = vmax.f32 %v785_v52, 0.0  ;;  %v1101_v52 = vld [vmem:[%s12387_s6 + $0x10] sm:$0xff] }
 0x1d9   : > { %8502 = vmatprep.subr.mxu1 %v786_v55 }
 0x1da   : > { %8503 = vmatpush3.msra.mxu1 %v786_v55  ;;  %v1102_v55 = vld [vmem:[%s12387_s6 + $0x18] sm:$0xff] }
 0x1db   : > { %8505 = vmatmul.mubr.msk.f32.vlgmr.msra.gmra.mrb[2].mxu1 %vm795_vm2, %v788_v56  ;;  %9486 = vmatprep.subr.bf16.mxu1 %v10021_v0  ;;  %v9534_v56 = vpack.c.bf16 %v7207_v54, %v7206_v53  ;;  %v1433_v53 = vld [vmem:[%s12388_s7 + $0x30] sm:$0xff]  ;;  %v7233_v54 = vld [vmem:[%s12390_s9 + $0x180] sm:$0xff] }
 0x1dc   : > { %9488 = vmatpush3.bf16.msra.mxu1 %v9487_v57  ;;  %8507 = vmatprep.mubr.msk.f32.mxu1 %vm795_vm2, %v789_v60  ;;  %v1103_v57 = vld [vmem:[%s12387_s6 + $0x20] sm:$0xff]  ;;  %v1104_v60 = vld [vmem:[%s12387_s6 + $0x28] sm:$0xff] }
 0x1dd   : > { %9489 = vmatprep.subr.bf16.mxu1 %v10021_v0 }
 0x1df   : > { %8508 = vmatmul.mubr.msk.f32.gmra.mrb[4].mxu1 %vm795_vm2, %v790_v62  ;;  %v1105_v62 = vld [vmem:[%s12387_s6 + $0x30] sm:$0xff] }
 0x1e0   : > { %9491 = vmatpush3.bf16.msra.mxu1 %v9490_v61  ;;  %8510 = vmatprep.mubr.msk.f32.mxu1 %vm795_vm2, %v791_v3  ;;  %v9538_v61 = vpack.c.bf16 %v7209_v59, %v7208_v58  ;;  %v1106_v3 = vld [vmem:[%s12387_s6 + $0x38] sm:$0xff] }
 0x1e1   : > { %9492 = vmatprep.subr.bf16.mxu1 %v10021_v0  ;;  %v7236_v58 = vld [vmem:[%s12390_s9 + $0x198] sm:$0xff] }
 0x1e3   : > { %8511 = vmatmul.mubr.msk.f32.gmra.mrb[6].mxu1 %vm795_vm2, %v792_v5  ;;  %v7212_v5 = vld [vmem:[%s12390_s9 + $0x150] sm:$0xff] }
 0x1e4   : > { %9494 = vmatpush3.bf16.msra.mxu1 %v9493_v4  ;;  %8513 = vmatprep.mubr.msk.f32.mxu1 %vm795_vm2, %v793_v8  ;;  %v9542_v4 = vpack.c.bf16 %v7211_v2, %v7210_v63  ;;  %v9546_v7 = vpack.c.bf16 %v7213_v6, %v7212_v5  ;;  %v7214_v8 = vld [vmem:[%s12390_s9 + $0x160] sm:$0xff]  ;;  %v7239_v2 = vld [vmem:[%s12390_s9 + $0x1b0] sm:$0xff] }
 0x1e5   : > { %9495 = vmatprep.subr.bf16.mxu1 %v10021_v0  ;;  %v1569_v6 = vld [vmem:[%s12385_s4 + $0x20] sm:$0xff] }
 0x1e7   : > { %8514 = vmatmul.mubr.msk.f32.gmra.mrb[8].mxu1 %vm795_vm2, %v794_v10 }
 0x1e8   : > { %9497 = vmatpush3.bf16.msra.mxu1 %v9496_v9  ;;  %8567 = vmatprep.mubr.msk.f32.mxu1 %vm10022_vm0, %v10023_v1  ;;  %v7215_v9 = vld [vmem:[%s12390_s9 + $0x168] sm:$0xff] }
 0x1e9   : > { %9498 = vmatprep.subr.bf16.mxu1 %v10021_v0  ;;  %v9550_v10 = vpack.c.bf16 %v7215_v9, %v7214_v8  ;;  %v7242_v8 = vld [vmem:[%s12390_s9 + $0x1c8] sm:$0xff] }
 0x1ec   : > { %9500 = vmatpush3.bf16.msra.mxu1 %v9499_v14  ;;  %v9554_v14 = vpack.c.bf16 %v7217_v12, %v7216_v11  ;;  %v7244_v11 = vld [vmem:[%s12390_s9 + $0x1d8] sm:$0xff] }
 0x1ed   : > { %9501 = vmatprep.subr.bf16.mxu1 %v10021_v0 }
 0x1f0   : > { %9503 = vmatpush3.bf16.msra.mxu1 %v9502_v17 }
 0x1f1   : > { %9504 = vmatprep.subr.bf16.mxu1 %v10021_v0 }
 0x1f4   : > { %9506 = vmatpush3.bf16.msra.mxu1 %v9505_v21 }
 0x1f5   : > { %9507 = vmatprep.subr.bf16.mxu1 %v10021_v0 }
 0x1f8   : > { %9509 = vmatpush3.bf16.msra.mxu1 %v9508_v24 }
 0x1fb   : > { %8568 = vmatmul.mubr.f32.vlgmr.msra.gmra.mrb[10].mxu1 %v10258_v43  ;;  %v7202_v43 = vld [vmem:[%s12390_s9 + $0x100] sm:$0xff] }
 0x1fc   : > { %8572 = vmatprep.mubr.msk.f32.mxu1 %vm795_vm2, %v1099_v25  ;;  %v9526_v49 = vpack.c.bf16 %v7203_v44, %v7202_v43 }
 0x2ae   : > { %v10367_v29 = vpop.f32.mrb[2].mxu1 }
 0x2af   : > { %v10369_v31 = vpop.f32.mrb[3].mxu1 }
 0x2b2   : > { %v10371_v32 = vpop.f32.mrb[4].mxu1 }
 0x2b3   : > { %v10373_v33 = vpop.f32.mrb[5].mxu1 }
 0x2b6   : > { %v10375_v34 = vpop.f32.mrb[6].mxu1 }
 0x2b7   : > { %v10377_v35 = vpop.f32.mrb[7].mxu1 }
 0x2ba   : > { %v10379_v36 = vpop.f32.mrb[8].mxu1 }
 0x2bb   : > { %v10381_v37 = vpop.f32.mrb[9].mxu1 }
 0x2ce   : > { %v1082_v39 = vpop.f32.mrb[10].mxu1 }
 0x2cf   : > { %v1091_v41 = vmul.f32 %v7190_v38, %v1082_v39  ;;  %v8569_v42 = vpop.f32.mrb[11].mxu1  ;;  %v7218_v38 = vld [vmem:[%s12391_s10 + $0x2] ss:$0 sm:$0xff] }
 0x2d1   : > { %v1097_v45 = vadd.f32 %v7191_v40, %v1091_v41  ;;  %v7219_v40 = vld [vmem:[%s12392_s11 + $0x2] ss:$0 sm:$0xff] }
 0x2d3   : > { %v1098_v48 = vmax.f32 %v1097_v45, 0.0 }
 0x2d5   : > { %8570 = vmatprep.subr.mxu1 %v1098_v48 }
 0x2d6   : > { %8571 = vmatpush3.msra.mxu1 %v1098_v48 }
 0x2d7   : > { %8573 = vmatmul.mubr.msk.f32.vlgmr.msra.gmra.mrb[12].mxu1 %vm795_vm2, %v1100_v50  ;;  %9527 = vmatprep.subr.bf16.mxu1 %v9526_v49  ;;  %v1429_v50 = vld [vmem:[%s12388_s7 + $0x10] sm:$0xff] }
 0x2d8   : > { %9529 = vmatpush3.bf16.msra.mxu1 %v9526_v49  ;;  %8575 = vmatprep.mubr.msk.f32.mxu1 %vm795_vm2, %v1101_v52  ;;  %v1428_v49 = vld [vmem:[%s12388_s7 + $0x8] sm:$0xff]  ;;  %v1431_v52 = vld [vmem:[%s12388_s7 + $0x20] sm:$0xff] }
 0x2d9   : > { %9531 = vmatprep.subr.bf16.mxu1 %v9530_v51 }
 0x2db   : > { %8576 = vmatmul.mubr.msk.f32.gmra.mrb[14].mxu1 %vm795_vm2, %v1102_v55  ;;  %v7234_v55 = vld [vmem:[%s12390_s9 + $0x188] sm:$0xff] }
 0x2dc   : > { %9533 = vmatpush3.bf16.msra.mxu1 %v9530_v51  ;;  %8578 = vmatprep.mubr.msk.f32.mxu1 %vm795_vm2, %v1103_v57  ;;  %v1430_v51 = vld [vmem:[%s12388_s7 + $0x18] sm:$0xff]  ;;  %v7235_v57 = vld [vmem:[%s12390_s9 + $0x190] sm:$0xff] }
 0x2dd   : > { %9535 = vmatprep.subr.bf16.mxu1 %v9534_v56  ;;  %v9578_v59 = vpack.c.bf16 %v7236_v58, %v7235_v57 }
 0x2df   : > { %8579 = vmatmul.mubr.msk.f32.gmra.mrb[16].mxu1 %vm795_vm2, %v1104_v60  ;;  %v7237_v60 = vld [vmem:[%s12390_s9 + $0x1a0] sm:$0xff] }
 0x2e0   : > { %9537 = vmatpush3.bf16.msra.mxu1 %v9534_v56  ;;  %8581 = vmatprep.mubr.msk.f32.mxu1 %vm795_vm2, %v1105_v62  ;;  %v9575_v56 = vpack.c.bf16 %v7234_v55, %v7233_v54  ;;  %v1567_v62 = vld [vmem:[%s12385_s4 + $0x10] sm:$0xff] }
 0x2e1   : > { %9539 = vmatprep.subr.bf16.mxu1 %v9538_v61 }
 0x2e3   : > { %8582 = vmatmul.mubr.msk.f32.gmra.mrb[18].mxu1 %vm795_vm2, %v1106_v3  ;;  %v7240_v3 = vld [vmem:[%s12390_s9 + $0x1b8] sm:$0xff]  ;;  %vm3024_vm2 = vcmask 1046532  }
 0x2e4   : > { %9541 = vmatpush3.bf16.msra.mxu1 %v9538_v61  ;;  %8635 = vmatprep.mubr.f32.mxu1 %v1310_v28  ;;  %v7238_v61 = vld [vmem:[%s12390_s9 + $0x1a8] sm:$0xff]  ;;  %v9584_v5 = vpack.c.bf16 %v7240_v3, %v7239_v2 }
 0x2e5   : > { %9543 = vmatprep.subr.bf16.mxu1 %v9542_v4  ;;  %v9581_v63 = vpack.c.bf16 %v7238_v61, %v7237_v60 }
 0x2e8   : > { %9545 = vmatpush3.bf16.msra.mxu1 %v9542_v4  ;;  %v1568_v4 = vld [vmem:[%s12385_s4 + $0x18] sm:$0xff] }
 0x2e9   : > { %9547 = vmatprep.subr.bf16.mxu1 %v9546_v7 }
 0x2ec   : > { %9549 = vmatpush3.bf16.msra.mxu1 %v9546_v7  ;;  %v7241_v7 = vld [vmem:[%s12390_s9 + $0x1c0] sm:$0xff] }
 0x2ed   : > { %9551 = vmatprep.subr.bf16.mxu1 %v9550_v10  ;;  %v9587_v9 = vpack.c.bf16 %v7242_v8, %v7241_v7 }
 0x2f0   : > { %9553 = vmatpush3.bf16.msra.mxu1 %v9550_v10  ;;  %v7243_v10 = vld [vmem:[%s12390_s9 + $0x1d0] sm:$0xff] }
 0x2f1   : > { %9555 = vmatprep.subr.bf16.mxu1 %v9554_v14  ;;  %v9590_v12 = vpack.c.bf16 %v7244_v11, %v7243_v10 }
 0x2f4   : > { %9557 = vmatpush3.bf16.msra.mxu1 %v9554_v14  ;;  %v7245_v14 = vld [vmem:[%s12390_s9 + $0x1e0] sm:$0xff] }
 0x2f7   : > { %8636 = vmatmul.mubr.f32.vlgmr.msra.gmra.mrb[20].mxu1 %v10365_v27 }
 0x2f8   : > { %8642 = vmatprep.mubr.msk.f32.mxu1 %vm1435_vm3, %v1427_v15  ;;  %v7246_v15 = vld [vmem:[%s12390_s9 + $0x1e8] sm:$0xff] }
 0x3aa   : > { %v8574_v16 = vpop.f32.mrb[12].mxu1 }
 0x3ab   : > { %v1197_v17 = vpop.f32.mrb[13].mxu1 }
 0x3ac   : > { %v9806_v18 = vpack.i.bf16 %v8574_v16, %v1197_v17  ;;  %v9593_v16 = vpack.c.bf16 %v7246_v15, %v7245_v14  ;;  %v7247_v17 = vld [vmem:[%s12390_s9 + $0x1f0] sm:$0xff] }
 0x3ae   : > { %9807 = vrot.lane.b32.xlu0 %v9806_v18, %s10024_s24  ;;  %v10471_v19 = vpop.f32.mrb[14].mxu1  ;;  %v7248_v18 = vld [vmem:[%s12390_s9 + $0x1f8] sm:$0xff] }
 0x3af   : > { %v1207_v21 = vpop.f32.mrb[15].mxu1 }
 0x3b2   : > { %1957 = vrot.lane.b32.xlu0 %v1207_v21, %s10024_s24  ;;  %v10474_v22 = vpop.f32.mrb[16].mxu1  ;;  %v9596_v21 = vpack.c.bf16 %v7248_v18, %v7247_v17 }
 0x3b3   : > { %v10476_v23 = vpop.f32.mrb[17].mxu1 }
 0x3b4   : > { %v9821_v24 = vpack.i.bf16 %v10476_v23, %v10471_v19  ;;  %v9864_v19 = vld [vmem:[%s12394_s13 + $0x68] sm:$0xff]  }
 0x3b6   : > { %v10480_v25 = vpop.f32.mrb[18].mxu1 }
 0x3b7   : > { %v10482_v27 = vpop.f32.mrb[19].mxu1 }
 0x3b8   : > { %v9826_v28 = vpack.i.bf16 %v10482_v27, %v10474_v22  ;;  %v10741_v27 = vld [vmem:[%s12393_s12] sm:$0xff]  }
 0x3ca   : > { %v8637_v39 = vpop.f32.mrb[20].mxu1 }
 0x3cb   : > { %v1417_v41 = vmul.f32 %v8637_v39, %v7218_v38  ;;  %v1402_v42 = vpop.f32.mrb[21].mxu1 }
 0x3cc   : > { %v1416_v43 = vmul.f32 %v7218_v38, %v1402_v42 }
 0x3cd   : > { %v1424_v44 = vadd.f32 %v7219_v40, %v1417_v41 }
 0x3ce   : > { %v1423_v45 = vadd.f32 %v7219_v40, %v1416_v43 }
 0x3cf   : > { %v1426_v46 = vmax.f32 %v1424_v44, 0.0 }
 0x3d0   : > { %v1425_v47 = vmax.f32 %v1423_v45, 0.0 }
 0x3d2   : > { %v9558_v48 = vpack.c.bf16 %v1426_v46, %v1425_v47 }
 0x3d4   : > { %9559 = vmatprep.subr.bf16.mxu1 %v9558_v48 }
 0x3d5   : > { %9561 = vmatpush3.bf16.msra.mxu1 %v9558_v48 }
 0x3d6   : > { %9562 = vmatprep.subr.bf16.mxu1 %v10021_v0 }
 0x3d8   : > { %8643 = vmatmul.mubr.msk.f32.vlgmr.msra.gmra.mrb[22].mxu1 %vm1435_vm3, %v1428_v49 }
 0x3d9   : > { %9564 = vmatpush3.bf16.msra.mxu1 %v10172_v13  ;;  %8645 = vmatprep.mubr.msk.f32.mxu1 %vm1435_vm3, %v1429_v50  ;;  %v1432_v13 = vld [vmem:[%s12388_s7 + $0x28] sm:$0xff] }
 0x3da   : > { %9565 = vmatprep.subr.bf16.mxu1 %v10021_v0 }
 0x3dc   : > { %8646 = vmatmul.mubr.msk.f32.gmra.mrb[24].mxu1 %vm1435_vm3, %v1430_v51 }
 0x3dd   : > { %9567 = vmatpush3.bf16.msra.mxu1 %v10185_v20  ;;  %8648 = vmatprep.mubr.msk.f32.mxu1 %vm1435_vm3, %v1431_v52  ;;  %v1434_v20 = vld [vmem:[%s12388_s7 + $0x38] sm:$0xff] }
 0x3de   : > { %9568 = vmatprep.subr.bf16.mxu1 %v10021_v0 }
 0x3e0   : > { %8649 = vmatmul.mubr.msk.f32.gmra.mrb[26].mxu1 %vm1435_vm3, %v1432_v13 }
 0x3e1   : > { %9570 = vmatpush3.bf16.msra.mxu1 %v10198_v26  ;;  %8651 = vmatprep.mubr.msk.f32.mxu1 %vm1435_vm3, %v1433_v53  ;;  %v1565_v26 = vld [vmem:[%s12385_s4] sm:$0xff] }
 0x3e2   : > { %9571 = vmatprep.subr.bf16.mxu1 %v10021_v0 }
 0x3e4   : > { %8652 = vmatmul.mubr.msk.f32.gmra.mrb[28].mxu1 %vm1435_vm3, %v1434_v20 }
 0x3e5   : > { %9573 = vmatpush3.bf16.msra.mxu1 %v10209_v30  ;;  %8670 = vmatprep.mubr.msk.f32.mxu1 %vm10022_vm0, %v10023_v1  ;;  %v1566_v30 = vld [vmem:[%s12385_s4 + $0x8] sm:$0xff] }
 0x3e6   : > { %9574 = vmatprep.subr.bf16.mxu1 %v10021_v0 }
 0x3e8   : > { %8671 = vmatmul.mubr.msk.f32.vlgmr.msra.gmra.mrb[30].mxu1 %vm614_vm1, %v1565_v26  ;;  %v1807_v26 = vld [vmem:[%s12389_s8] sm:$0xff] }
 0x3e9   : > { %8673 = vmatprep.mubr.msk.f32.mxu1 %vm10022_vm0, %v10023_v1  ;;  %9576 = vmatpush3.bf16.msra.mxu1 %v9575_v56  ;;  %v7249_v56 = vld [vmem:[%s12391_s10 + $0x3] ss:$0 sm:$0xff] }
 0x3ea   : > { %9577 = vmatprep.subr.bf16.mxu1 %v10021_v0  ;;  %8742 = vmatprep.mubr.msk.f32.mxu0 %vm1815_vm4, %v1807_v26  ;;  %v9855_v26 = vld [vmem:[%s12394_s13 + $0x18] sm:$0xff]  }
 0x3ec   : > { %8674 = vmatmul.mubr.msk.f32.gmra.mrb[32].mxu1 %vm614_vm1, %v1566_v30 }
 0x3ed   : > { %8676 = vmatprep.mubr.msk.f32.mxu1 %vm10022_vm0, %v10023_v1  ;;  %9579 = vmatpush3.bf16.msra.mxu1 %v9578_v59 }
 0x3ee   : > { %9580 = vmatprep.subr.bf16.mxu1 %v10021_v0 }
 0x3f0   : > { %8677 = vmatmul.mubr.msk.f32.gmra.mrb[34].mxu1 %vm614_vm1, %v1567_v62 }
 0x3f1   : > { %8679 = vmatprep.mubr.msk.f32.mxu1 %vm10022_vm0, %v10023_v1  ;;  %9582 = vmatpush3.bf16.msra.mxu1 %v9581_v63 }
 0x3f2   : > { %9583 = vmatprep.subr.bf16.mxu1 %v10021_v0 }
 0x3f4   : > { %8680 = vmatmul.mubr.msk.f32.gmra.mrb[36].mxu1 %vm614_vm1, %v1568_v4 }
 0x3f5   : > { %8682 = vmatprep.mubr.msk.f32.mxu1 %vm10022_vm0, %v10023_v1  ;;  %9585 = vmatpush3.bf16.msra.mxu1 %v9584_v5 }
 0x3f6   : > { %9586 = vmatprep.subr.bf16.mxu1 %v10021_v0 }
 0x3f8   : > { %8683 = vmatmul.mubr.msk.f32.gmra.mrb[38].mxu1 %vm614_vm1, %v1569_v6 }
 0x3f9   : > { %8717 = vmatprep.mubr.msk.f32.mxu1 %vm10022_vm0, %v10023_v1  ;;  %9588 = vmatpush3.bf16.msra.mxu1 %v9587_v9 }
 0x3fa   : > { %9589 = vmatprep.subr.bf16.mxu1 %v10021_v0 }
 0x3fd   : > { %9591 = vmatpush3.bf16.msra.mxu1 %v9590_v12 }
 0x3fe   : > { %9592 = vmatprep.subr.bf16.mxu1 %v10021_v0 }
 0x401   : > { %9594 = vmatpush3.bf16.msra.mxu1 %v9593_v16 }
 0x402   : > { %9595 = vmatprep.subr.bf16.mxu1 %v10021_v0 }
 0x405   : > { %9597 = vmatpush3.bf16.msra.mxu1 %v9596_v21 }
 0x4ab   : > { %v8644_v38 = vpop.f32.mrb[22].mxu1 }
 0x4ac   : > { %v1526_v39 = vpop.f32.mrb[23].mxu1 }
 0x4ad   : > { %v9811_v40 = vpack.i.bf16 %v8644_v38, %v1526_v39 }
 0x4af   : > { %9812 = vrot.lane.b32.xlu1 %v9811_v40, %s10025_s25  ;;  %v10617_v41 = vpop.f32.mrb[24].mxu1  ;;  %v1808_v40 = vld [vmem:[%s12389_s8 + $0x8] sm:$0xff] }
 0x4b0   : > { %v1536_v42 = vpop.f32.mrb[25].mxu1 }
 0x4b3   : > { %1989 = vrot.lane.b32.xlu1 %v1536_v42, %s10025_s25  ;;  %v10620_v0 = vpop.f32.mrb[26].mxu1  ;;  %v1809_v42 = vld [vmem:[%s12389_s8 + $0x10] sm:$0xff] }
 0x4b4   : > { %v10622_v43 = vpop.f32.mrb[27].mxu1 }
 0x4b5   : > { %v9831_v44 = vpack.i.bf16 %v10622_v43, %v10617_v41  ;;  %v9870_v41 = vld [vmem:[%s12394_s13 + $0x78] sm:$0xff]  }
 0x4b7   : > { %v10626_v45 = vpop.f32.mrb[28].mxu1 }
 0x4b8   : > { %v10628_v46 = vpop.f32.mrb[29].mxu1 }
 0x4b9   : > { %v9836_v47 = vpack.i.bf16 %v10628_v46, %v10620_v0  ;;  %v10760_v0 = vld [vmem:[%s12393_s12 + $0x80] sm:$0xff]  }
 0x4bb   : > { %v1651_v48 = vpop.f32.mrb[30].mxu1 }
 0x4bc   : > { %v8672_v49 = vpop.f32.mrb[31].mxu1  ;;  %8718 = vmatmul.mubr.f32.vlgmr.msra.gmra.mrb[40].mxu1 %v1651_v48  ;;  %v1810_v48 = vld [vmem:[%s12389_s8 + $0x18] sm:$0xff] }
 0x4bd   : > { %8720 = vmatprep.mubr.msk.f32.mxu1 %vm10022_vm0, %v10023_v1  ;;  %v1811_v49 = vld [vmem:[%s12389_s8 + $0x20] sm:$0xff] }
 0x4bf   : > { %v1656_v50 = vpop.f32.mrb[32].mxu1 }
 0x4c0   : > { %v8675_v51 = vpop.f32.mrb[33].mxu1  ;;  %8721 = vmatmul.mubr.f32.gmra.mrb[42].mxu1 %v1656_v50  ;;  %v1812_v50 = vld [vmem:[%s12389_s8 + $0x28] sm:$0xff] }
 0x4c1   : > { %8723 = vmatprep.mubr.msk.f32.mxu1 %vm10022_vm0, %v10023_v1  ;;  %v1813_v51 = vld [vmem:[%s12389_s8 + $0x30] sm:$0xff] }
 0x4c3   : > { %v1661_v52 = vpop.f32.mrb[34].mxu1 }
 0x4c4   : > { %v8678_v13 = vpop.f32.mrb[35].mxu1  ;;  %8724 = vmatmul.mubr.f32.gmra.mrb[44].mxu1 %v1661_v52  ;;  %v1814_v52 = vld [vmem:[%s12389_s8 + $0x38] sm:$0xff] }
 0x4c5   : > { %8726 = vmatprep.mubr.msk.f32.mxu1 %vm10022_vm0, %v10023_v1  ;;  %v9851_v13 = vld [vmem:[%s12394_s13] sm:$0xff]  }
 0x4c6   : > { %8754 = vmatprep.subr.bf16.mxu1 %v9851_v13 }
 0x4c7   : > { %v1666_v53 = vpop.f32.mrb[36].mxu1  ;;  %8755 = vmatpush3.bf16.msra.mxu1 %v9851_v13 }
 0x4c8   : > { %v8681_v20 = vpop.f32.mrb[37].mxu1  ;;  %8727 = vmatmul.mubr.f32.gmra.mrb[46].mxu1 %v1666_v53  ;;  %v9852_v53 = vld [vmem:[%s12394_s13 + $0x8] sm:$0xff]  }
 0x4c9   : > { %8729 = vmatprep.mubr.msk.f32.mxu1 %vm10022_vm0, %v10023_v1  ;;  %v7250_v1 = vld [vmem:[%s12392_s11 + $0x3] ss:$0 sm:$0xff]  ;;  %8756 = vmatprep.subr.bf16.mxu1 %v9852_v53  ;;  %vm3023_vm0 = vcmask 1042432  }
 0x4ca   : > { %v9854_v20 = vld [vmem:[%s12394_s13 + $0x40] sm:$0xff]   ;;  %vm10936_vm3 = vmor %vm3023_vm0, %vm3024_vm2 }
 0x4cb   : > { %v1671_v54 = vpop.f32.mrb[38].mxu1  ;;  %8757 = vmatpush3.bf16.msra.mxu1 %v9852_v53 }
 0x4cc   : > { %v8684_v55 = vpop.f32.mrb[39].mxu1  ;;  %8730 = vmatmul.mubr.f32.gmra.mrb[48].mxu1 %v1671_v54  ;;  %v10026_v54 = vmov 0  }
 0x4cd   : > { %2069 = vst [vmem:[#allocation2 + $0x8] sm:$0xf] %v10026_v54  ;;  %2070 = vst [vmem:[#allocation2 + $0xc] sm:$0x1] %v10026_v54  ;;  %v9853_v55 = vld [vmem:[%s12394_s13 + $0x10] sm:$0xff]  }
 0x4ce   : > { %2071 = vst [vmem:[#allocation2 + $0x10] sm:$0xf] %v10026_v54  ;;  %2072 = vst [vmem:[#allocation2 + $0x14] sm:$0x1] %v10026_v54  ;;  %8758 = vmatprep.subr.bf16.mxu1 %v9853_v55 }
 0x4cf   : > { %2067 = vst [vmem:[#allocation2] sm:$0xf] %v10026_v54  ;;  %2068 = vst [vmem:[#allocation2 + $0x4] sm:$0x1] %v10026_v54  ;;  %8759 = vmatpush3.bf16.msra.mxu1 %v9853_v55 }
 0x4d0   : > { %2073 = vst [vmem:[#allocation2 + $0x18] sm:$0xf] %v10026_v54  ;;  %2074 = vst [vmem:[#allocation2 + $0x1c] sm:$0x1] %v10026_v54  ;;  %8760 = vmatprep.subr.bf16.mxu1 %v9855_v26 }
 0x4d1   : > { %2075 = vst [vmem:[#allocation2 + $0x20] sm:$0xf] %v10026_v54  ;;  %2076 = vst [vmem:[#allocation2 + $0x24] sm:$0x1] %v10026_v54 }
 0x4d2   : > { %2077 = vst [vmem:[#allocation2 + $0x28] sm:$0xf] %v10026_v54  ;;  %2078 = vst [vmem:[#allocation2 + $0x2c] sm:$0x1] %v10026_v54 }
 0x4d3   : > { %2079 = vst [vmem:[#allocation2 + $0x30] sm:$0xf] %v10026_v54  ;;  %2080 = vst [vmem:[#allocation2 + $0x34] sm:$0x1] %v10026_v54  ;;  %8761 = vmatpush3.bf16.msra.mxu1 %v9855_v26 }
 0x4d4   : > { %2081 = vst [vmem:[#allocation2 + $0x38] sm:$0xf] %v10026_v54  ;;  %2082 = vst [vmem:[#allocation2 + $0x3c] sm:$0x1] %v10026_v54 }
 0x4d5   : > { %2083 = vst [vmem:[#allocation2 + $0x40] sm:$0xf] %v10026_v54  ;;  %2084 = vst [vmem:[#allocation2 + $0x44] sm:$0x1] %v10026_v54 }
 0x4d6   : > { %2085 = vst [vmem:[#allocation2 + $0x48] sm:$0xf] %v10026_v54  ;;  %2086 = vst [vmem:[#allocation2 + $0x4c] sm:$0x1] %v10026_v54 }
 0x521   : > { %v9813_v43 = vpop.permute.xlu1 %9812 }
 0x58f   : > { %v1758_v57 = vpop.f32.mrb[40].mxu1 }
 0x590   : > { %v1787_v58 = vmul.f32 %v7249_v56, %v1758_v57  ;;  %v8719_v30 = vpop.f32.mrb[41].mxu1  ;;  %v9857_v57 = vld [vmem:[%s12394_s13 + $0x20] sm:$0xff]  }
 0x591   : > { %8762 = vmatprep.subr.bf16.mxu1 %v9857_v57 }
 0x592   : > { %v1797_v60 = vadd.f32 %v7250_v1, %v1787_v58  ;;  %v9858_v58 = vld [vmem:[%s12394_s13 + $0x50] sm:$0xff]   ;;  %8763 = vmatpush3.bf16.msra.mxu1 %v9857_v57 }
 0x593   : > { %v1763_v59 = vpop.f32.mrb[42].mxu1 }
 0x594   : > { %v1788_v61 = vmul.f32 %v7249_v56, %v1763_v59  ;;  %v8722_v62 = vpop.f32.mrb[43].mxu1  ;;  %v1802_v3 = vmax.f32 %v1797_v60, 0.0  ;;  %v9859_v59 = vld [vmem:[%s12394_s13 + $0x28] sm:$0xff]  }
 0x595   : > { %8764 = vmatprep.subr.bf16.mxu1 %v9859_v59 }
 0x596   : > { %v1798_v63 = vadd.f32 %v7250_v1, %v1788_v61  ;;  %v9860_v61 = vld [vmem:[%s12394_s13 + $0x58] sm:$0xff]   ;;  %8765 = vmatpush3.bf16.msra.mxu1 %v9859_v59 }
 0x597   : > { %v1768_v2 = vpop.f32.mrb[44].mxu1 }
 0x598   : > { %v1803_v4 = vmax.f32 %v1798_v63, 0.0  ;;  %v1789_v5 = vmul.f32 %v7249_v56, %v1768_v2  ;;  %v8725_v6 = vpop.f32.mrb[45].mxu1  ;;  %v9861_v2 = vld [vmem:[%s12394_s13 + $0x30] sm:$0xff]  }
 0x599   : > { %8766 = vmatprep.subr.bf16.mxu1 %v9861_v2  ;;  %v9863_v6 = vld [vmem:[%s12394_s13 + $0x38] sm:$0xff]  }
 0x59a   : > { %v9598_v7 = vpack.c.bf16 %v1803_v4, %v1802_v3  ;;  %v1799_v9 = vadd.f32 %v7250_v1, %v1789_v5  ;;  %v9862_v3 = vld [vmem:[%s12394_s13 + $0x60] sm:$0xff]   ;;  %8767 = vmatpush3.bf16.msra.mxu1 %v9861_v2  ;;  %v2209_v2 = vld [vmem:[#allocation2 + $0xc] sm:$0x1] }
 0x59b   : > { %v1773_v8 = vpop.f32.mrb[46].mxu1  ;;  %8768 = vmatprep.subr.bf16.mxu1 %v9863_v6 }
 0x59c   : > { %v1790_v10 = vmul.f32 %v7249_v56, %v1773_v8  ;;  %v8728_v11 = vpop.f32.mrb[47].mxu1  ;;  %9599 = vmatprep.subr.bf16.mxu0 %v9598_v7  ;;  %v1804_v15 = vmax.f32 %v1799_v9, 0.0  ;;  %v9815_v9 = vunpack.i.h.bf16 %v9813_v43 }
 0x59d   : > { %9601 = vmatpush3.bf16.msra.mxu0 %v9598_v7 }
 0x59e   : > { %v1800_v12 = vadd.f32 %v7250_v1, %v1790_v10  ;;  %8769 = vmatpush3.bf16.msra.mxu1 %v9863_v6  ;;  %v1990_v10 = vpop.permute.xlu1 %1989 }
 0x59f   : > { %v1778_v14 = vpop.f32.mrb[48].mxu1  ;;  %8778 = vmatprep.subr.bf16.mxu1 %v10741_v27 }
 0x5a0   : > { %v1805_v16 = vmax.f32 %v1800_v12, 0.0  ;;  %v1791_v17 = vmul.f32 %v7249_v56, %v1778_v14  ;;  %v8731_v18 = vpop.f32.mrb[49].mxu1  ;;  %v9856_v56 = vld [vmem:[%s12394_s13 + $0x48] sm:$0xff]  }
 0x5a2   : > { %v1801_v21 = vadd.f32 %v7250_v1, %v1791_v17  ;;  %v9602_v38 = vpack.c.bf16 %v1805_v16, %v1804_v15 }
 0x5a4   : > { %v1806_v39 = vmax.f32 %v1801_v21, 0.0  ;;  %9603 = vmatprep.subr.bf16.mxu0 %v9602_v38 }
 0x5a5   : > { %9605 = vmatpush3.bf16.msra.mxu0 %v9602_v38 }
 0x5a6   : > { %8740 = vmatprep.subr.mxu0 %v1806_v39 }
 0x5a9   : > { %8741 = vmatpush3.msra.mxu0 %v1806_v39 }
 0x5aa   : > { %8743 = vmatmul.mubr.msk.f32.vlgmr.msra.gmra.mrb[6].mxu0 %vm1815_vm4, %v1808_v40  ;;  %8826 = vmatprep.subr.bf16.mxu0 %v9854_v20  ;;  %v10771_v40 = vld [vmem:[#allocation2 + $0x4] sm:$0x1] }
 0x5ab   : > { %8745 = vmatprep.mubr.msk.f32.mxu0 %vm1815_vm4, %v1809_v42  ;;  %8827 = vmatpush3.bf16.msra.mxu0 %v9854_v20 }
 0x5ac   : > { %8828 = vmatprep.subr.bf16.mxu0 %v9856_v56 }
 0x5ae   : > { %8746 = vmatmul.mubr.msk.f32.gmra.mrb[8].mxu0 %vm1815_vm4, %v1810_v48 }
 0x5af   : > { %8748 = vmatprep.mubr.msk.f32.mxu0 %vm1815_vm4, %v1811_v49  ;;  %8829 = vmatpush3.bf16.msra.mxu0 %v9856_v56 }
 0x5b0   : > { %8830 = vmatprep.subr.bf16.mxu0 %v9858_v58 }
 0x5b2   : > { %8749 = vmatmul.mubr.msk.f32.gmra.mrb[10].mxu0 %vm1815_vm4, %v1812_v50 }
 0x5b3   : > { %8751 = vmatprep.mubr.msk.f32.mxu0 %vm1815_vm4, %v1813_v51  ;;  %8831 = vmatpush3.bf16.msra.mxu0 %v9858_v58 }
 0x5b4   : > { %8832 = vmatprep.subr.bf16.mxu0 %v9860_v61 }
 0x5b6   : > { %8752 = vmatmul.mubr.msk.f32.gmra.mrb[12].mxu0 %vm1815_vm4, %v1814_v52 }
 0x5b7   : > { %8833 = vmatpush3.bf16.msra.mxu0 %v9860_v61 }
 0x5b8   : > { %8834 = vmatprep.subr.bf16.mxu0 %v9862_v3 }
 0x5bb   : > { %8835 = vmatpush3.bf16.msra.mxu0 %v9862_v3 }
 0x5bc   : > { %8836 = vmatprep.subr.bf16.mxu0 %v9864_v19 }
 0x5bf   : > { %8837 = vmatpush3.bf16.msra.mxu0 %v9864_v19 }
 0x67d   : > { %v8744_v30 = vpop.f32.mrb[6].mxu0 }
 0x67e   : > { %v1906_v1 = vpop.f32.mrb[7].mxu0 }
 0x67f   : > { %v9816_v60 = vpack.i.bf16 %v8744_v30, %v1906_v1 }
 0x681   : > { %9817 = vrot.lane.b32.xlu0 %v9816_v60, %s10027_s20  ;;  %v8747_v62 = vpop.f32.mrb[8].mxu0 }
 0x682   : > { %v1916_v63 = vpop.f32.mrb[9].mxu0 }
 0x683   : > { %2021 = vrot.lane.b32.xlu1 %v1916_v63, %s10027_s20  ;;  %v2203_v63 = vld [vmem:[#allocation2 + $0x8] sm:$0xf] }
 0x685   : > { %9822 = vrot.lane.b32.xlu0 %v9821_v24, %s10024_s24  ;;  %v8750_v4 = vpop.f32.mrb[10].mxu0 }
 0x686   : > { %v1926_v5 = vpop.f32.mrb[11].mxu0 }
 0x687   : > { %v9841_v7 = vpack.i.bf16 %v1926_v5, %v8747_v62  ;;  %9827 = vrot.lane.b32.xlu1 %v9826_v28, %s10024_s24  ;;  %v9868_v28 = vld [vmem:[%s12394_s13 + $0x70] sm:$0xff]  }
 0x688   : > { %8838 = vmatprep.subr.bf16.mxu0 %v9868_v28 }
 0x689   : > { %9832 = vrot.lane.b32.xlu0 %v9831_v44, %s10025_s25  ;;  %v8753_v23 = vpop.f32.mrb[12].mxu0  ;;  %8839 = vmatpush3.bf16.msra.mxu0 %v9868_v28  ;;  %v2564_v44 = vld [vmem:[#allocation2] sm:$0xf] }
 0x68a   : > { %v1936_v24 = vpop.f32.mrb[13].mxu0  ;;  %8840 = vmatprep.subr.bf16.mxu0 %v9870_v41  ;;  %v2584_v11 = vshrl.u32 %v2564_v44, 16  ;;  %v2587_v12 = vshll.u32 %v2564_v44, 16 }
 0x68b   : > { %9837 = vrot.lane.b32.xlu1 %v9836_v47, %s10025_s25  ;;  %v9846_v22 = vpack.i.bf16 %v1936_v24, %v8750_v4  ;;  %v2215_v24 = vld [vmem:[#allocation2 + $0x14] sm:$0x1] }
 0x68c   : > { %v10776_v49 = vrot.slane %v2587_v12, 5 }
 0x68d   : > { %9842 = vrot.lane.b32.xlu0 %v9841_v7, %s10027_s20  ;;  %8841 = vmatpush3.bf16.msra.mxu0 %v9870_v41 }
 0x68e   : > { %8850 = vmatprep.subr.bf16.mxu0 %v10760_v0 }
 0x68f   : > { %9847 = vrot.lane.b32.xlu1 %v9846_v22, %s10027_s20 }
 0x691   : > { %1967 = vrot.lane.b32.xlu0 %v10480_v25, %s10024_s24  ;;  %v9808_v25 = vpop.permute.xlu0 %9807 }
 0x692   : > { %v9810_v46 = vunpack.i.h.bf16 %v9808_v25  ;;  %v9809_v47 = vunpack.i.l.bf16 %v9808_v25 }
 0x693   : > { %1999 = vrot.lane.b32.xlu1 %v10626_v45, %s10025_s25  ;;  %v9814_v45 = vunpack.i.l.bf16 %v9813_v43 }
 0x694   : > { %v2043_v14 = vsel %vm2041_vm5, %v10367_v29, %v9810_v46  ;;  %v2042_v15 = vsel %vm2041_vm5, %v10369_v31, %v9809_v47  ;;  %v10774_v29 = vrot.slane %v2584_v11, 4  ;;  %v2593_v31 = vshll.u32 %v10771_v40, 16  ;;  %v2218_v47 = vld [vmem:[#allocation2 + $0x18] sm:$0xf] }
 0x695   : > { %2031 = vrot.lane.b32.xlu0 %v8753_v23, %s10027_s20  ;;  %v1958_v8 = vpop.permute.xlu0 %1957  ;;  %v2051_v18 = vsel %vm614_vm1, %v2043_v14, %v9815_v9  ;;  %v2050_v21 = vsel %vm614_vm1, %v2042_v15, %v9814_v45  ;;  %v2212_v23 = vld [vmem:[#allocation2 + $0x10] sm:$0xf]  ;;  %s12163_s20 = scalar_lea.vmem %s12400_s19, %s7908_s28 }
 0x696   : > { %v2044_v16 = vsel %vm2041_vm5, %v10373_v33, %v1958_v8  ;;  %v2590_v58 = vor.u32 %v10776_v49, %v10774_v29  ;;  %v10784_v30 = vrot.slane %v2593_v31, 5  ;;  %v2221_v8 = vld [vmem:[#allocation2 + $0x1c] sm:$0x1] }
 0x697   : > { %v2052_v42 = vsel %vm614_vm1, %v2044_v16, %v1990_v10 }
 0x6f3   : > { %v9818_v17 = vpop.permute.xlu0 %9817 }
 0x6f4   : > { %v9820_v38 = vunpack.i.h.bf16 %v9818_v17  ;;  %v9819_v39 = vunpack.i.l.bf16 %v9818_v17 }
 0x6f5   : > { %v2022_v48 = vpop.permute.xlu1 %2021 }
 0x6f6   : > { %v2060_v33 = vsel %vm2058_vm6, %v2051_v18, %v9820_v38  ;;  %v2059_v50 = vsel %vm2058_vm6, %v2050_v21, %v9819_v39  ;;  %v2061_v51 = vsel %vm2058_vm6, %v2052_v42, %v2022_v48 }
 0x6f7   : > { %v7910_v52 = vpack.c.bf16 %v2060_v33, %v2060_v33  ;;  %v7909_v13 = vpack.c.bf16 %v2059_v50, %v2059_v50  ;;  %v7911_v53 = vpack.c.bf16 %v2061_v51, %v2061_v51  ;;  %v9823_v20 = vpop.permute.xlu0 %9822  ;;  %v10820_v50 = vld [vmem:[%s10167_s22 + $0x50] sm:$0xff]  ;;  %v10823_v51 = vld [vmem:[%s10167_s22 + $0x60] sm:$0xff] }
 0x6f8   : > { %v9825_v54 = vunpack.i.h.bf16 %v9823_v20  ;;  %v9824_v55 = vunpack.i.l.bf16 %v9823_v20 }
 0x6f9   : > { %v2128_v26 = vshrl.u32 %v7910_v52, 16  ;;  %v2120_v56 = vshrl.u32 %v7909_v13, 16  ;;  %v9828_v57 = vpop.permute.xlu1 %9827  ;;  %v2131_v1 = vshll.u32 %v7910_v52, 16  ;;  %v2123_v59 = vshll.u32 %v7909_v13, 16 }
 0x6fa   : > { %v2136_v60 = vshrl.u32 %v7911_v53, 16  ;;  %v2139_v61 = vshll.u32 %v7911_v53, 16  ;;  %v2046_v5 = vsel %vm2041_vm5, %v10377_v35, %v9825_v54  ;;  %v9830_v6 = vunpack.i.h.bf16 %v9828_v57 }
 0x6fb   : > { %v2130_v3 = vrot.slane %v2128_v26, 7  ;;  %v2122_v4 = vrot.slane %v2120_v56, 7  ;;  %v9833_v7 = vpop.permute.xlu0 %9832  ;;  %v2045_v28 = vsel %vm2041_vm5, %v10371_v32, %v9824_v55  ;;  %v9829_v41 = vunpack.i.l.bf16 %v9828_v57 }
 0x6fc   : > { %v2138_v22 = vrot.slane %v2136_v60, 7  ;;  %v9834_v25 = vunpack.i.l.bf16 %v9833_v7  ;;  %v2048_v11 = vsel %vm2041_vm5, %v10381_v37, %v9830_v6  ;;  %v9835_v12 = vunpack.i.h.bf16 %v9833_v7 }
 0x6fd   : > { %v2133_v43 = vor.u32 %v2131_v1, %v2130_v3  ;;  %v2134_v44 = vrot.slane %v2130_v3, 4  ;;  %v2125_v46 = vor.u32 %v2123_v59, %v2122_v4  ;;  %v2126_v35 = vrot.slane %v2122_v4, 4  ;;  %v9838_v9 = vpop.permute.xlu1 %9837 }
 0x6fe   : > { %v2141_v45 = vor.u32 %v2139_v61, %v2138_v22  ;;  %v2142_v10 = vrot.slane %v2138_v22, 4  ;;  %v2047_v21 = vsel %vm2041_vm5, %v10375_v34, %v9829_v41  ;;  %v2053_v38 = vsel %vm614_vm1, %v2045_v28, %v9834_v25  ;;  %v2227_v22 = vld [vmem:[#allocation2 + $0x24] sm:$0x1]  ;;  %v2230_v28 = vld [vmem:[#allocation2 + $0x28] sm:$0xf] }
 0x6ff   : > { %v2213_v14 = vsel %vm10788_vm11, %v2133_v43, %v2212_v23  ;;  %v2216_v32 = vsel %vm10796_vm12, %v2134_v44, %v2215_v24  ;;  %v2204_v15 = vsel %vm10788_vm11, %v2125_v46, %v2203_v63  ;;  %v2210_v16 = vsel %vm10796_vm12, %v2126_v35, %v2209_v2  ;;  %v9843_v17 = vpop.permute.xlu0 %9842  ;;  %v2224_v24 = vld [vmem:[#allocation2 + $0x20] sm:$0xf]  ;;  %v2233_v41 = vld [vmem:[#allocation2 + $0x2c] sm:$0x1] }
 0x700   : > { %2214 = vst [vmem:[#allocation2 + $0x10] sm:$0xf] %v2213_v14  ;;  %2217 = vst [vmem:[#allocation2 + $0x14] sm:$0x1] %v2216_v32  ;;  %v2219_v37 = vsel %vm10788_vm11, %v2141_v45, %v2218_v47  ;;  %v2222_v18 = vsel %vm10796_vm12, %v2142_v10, %v2221_v8  ;;  %v9840_v39 = vunpack.i.h.bf16 %v9838_v9  ;;  %v9839_v42 = vunpack.i.l.bf16 %v9838_v9  ;;  %v2239_v47 = vld [vmem:[#allocation2 + $0x34] sm:$0x1] }
 0x701   : > { %2205 = vst [vmem:[#allocation2 + $0x8] sm:$0xf] %v2204_v15  ;;  %2211 = vst [vmem:[#allocation2 + $0xc] sm:$0x1] %v2210_v16  ;;  %v9845_v48 = vunpack.i.h.bf16 %v9843_v17  ;;  %v9844_v31 = vunpack.i.l.bf16 %v9843_v17  ;;  %v9848_v33 = vpop.permute.xlu1 %9847  ;;  %v2054_v52 = vsel %vm614_vm1, %v2046_v5, %v9835_v12  ;;  %v10839_v4 = vrot.slane %v2590_v58, 4 }
 0x702   : > { %2220 = vst [vmem:[#allocation2 + $0x18] sm:$0xf] %v2219_v37  ;;  %2223 = vst [vmem:[#allocation2 + $0x1c] sm:$0x1] %v2222_v18  ;;  %v9850_v13 = vunpack.i.h.bf16 %v9848_v33  ;;  %v9849_v53 = vunpack.i.l.bf16 %v9848_v33  ;;  %v2055_v20 = vsel %vm614_vm1, %v2047_v21, %v9839_v42  ;;  %v2056_v54 = vsel %vm614_vm1, %v2048_v11, %v9840_v39  ;;  %v2236_v58 = vld [vmem:[#allocation2 + $0x30] sm:$0xf] }
 0x703   : > { %v2063_v55 = vsel %vm2058_vm6, %v2054_v52, %v9845_v48  ;;  %v2062_v26 = vsel %vm2058_vm6, %v2053_v38, %v9844_v31  ;;  %v1968_v56 = vpop.permute.xlu0 %1967  ;;  %v2242_v17 = vld [vmem:[#allocation2 + $0x38] sm:$0xf]  ;;  %v2245_v37 = vld [vmem:[#allocation2 + $0x3c] sm:$0x1] }
 0x704   : > { %v7913_v57 = vpack.c.bf16 %v2063_v55, %v2063_v55  ;;  %v7912_v1 = vpack.c.bf16 %v2062_v26, %v2062_v26  ;;  %v2065_v59 = vsel %vm2058_vm6, %v2056_v54, %v9850_v13  ;;  %v2064_v60 = vsel %vm2058_vm6, %v2055_v20, %v9849_v53 }
 0x705   : > { %v7915_v61 = vpack.c.bf16 %v2065_v59, %v2065_v59  ;;  %v7914_v63 = vpack.c.bf16 %v2064_v60, %v2064_v60  ;;  %v2049_v2 = vsel %vm2041_vm5, %v10379_v36, %v1968_v56  ;;  %v2000_v3 = vpop.permute.xlu1 %1999  ;;  %v9869_v36 = vld [vmem:[%s12393_s12 + $0x8] sm:$0xff]   ;;  %v9995_v59 = vld [vmem:[%s12393_s12 + $0x220] sm:$0xff]  }
 0x706   : > { %v2152_v5 = vshrl.u32 %v7913_v57, 16  ;;  %v2155_v6 = vshll.u32 %v7913_v57, 16  ;;  %v2144_v7 = vshrl.u32 %v7912_v1, 16  ;;  %v2147_v23 = vshll.u32 %v7912_v1, 16  ;;  %v9871_v57 = vld [vmem:[%s12393_s12 + $0x10] sm:$0xff]  }
 0x707   : > { %v2168_v25 = vshrl.u32 %v7915_v61, 16  ;;  %v2171_v43 = vshll.u32 %v7915_v61, 16  ;;  %v2160_v44 = vshrl.u32 %v7914_v63, 16  ;;  %v2163_v46 = vshll.u32 %v7914_v63, 16  ;;  %v2032_v35 = vpop.permute.xlu0 %2031  ;;  %v2568_v53 = vld [vmem:[#allocation2 + $0x10] sm:$0xf] }
 0x708   : > { %v2154_v29 = vrot.slane %v2152_v5, 7  ;;  %v2146_v49 = vrot.slane %v2144_v7, 7  ;;  %v2057_v8 = vsel %vm614_vm1, %v2049_v2, %v2000_v3  ;;  %v9865_v9 = vld [vmem:[#allocation2] ss:$8 sps:$4 sm:$0xff]   ;;  %v10846_v48 = vld [vmem:[#allocation2 + $0xc] sm:$0x1] }
 0x709   : > { %v2170_v45 = vrot.slane %v2168_v25, 7  ;;  %v2162_v10 = vrot.slane %v2160_v44, 7  ;;  %v2066_v11 = vsel %vm2058_vm6, %v2057_v8, %v2032_v35  ;;  %v9867_v12 = vld [vmem:[#allocation2 + $0x10] ss:$8 sps:$4 sm:$0xff]   ;;  %8770 = vmatprep.mubr.bf16.mxu1 %v9865_v9  ;;  %v2566_v42 = vld [vmem:[#allocation2 + $0x8] sm:$0xf]  ;;  %v2596_v25 = vsel %vm10872_vm15, %v10839_v4, %v10784_v30 }
 0x70a   : > { %v2157_v14 = vor.u32 %v2155_v6, %v2154_v29  ;;  %v2158_v32 = vrot.slane %v2154_v29, 4  ;;  %v2149_v15 = vor.u32 %v2147_v23, %v2146_v49  ;;  %v2150_v16 = vrot.slane %v2146_v49, 4  ;;  %8771 = vmatmul.mubr.bf16.vlgmr.msra.gmra.mrb[52].mxu1 %v9867_v12  ;;  %v10857_v20 = vld [vmem:[#allocation2 + $0x14] sm:$0x1]  ;;  %v2570_v54 = vld [vmem:[#allocation2 + $0x18] sm:$0xf] }
 0x70b   : > { %v2173_v18 = vor.u32 %v2171_v43, %v2170_v45  ;;  %v2174_v21 = vrot.slane %v2170_v45, 4  ;;  %v2165_v38 = vor.u32 %v2163_v46, %v2162_v10  ;;  %v2166_v39 = vrot.slane %v2162_v10, 4  ;;  %8779 = vmatpush3.bf16.msra.mxu1 %v10741_v27  ;;  %v9874_v46 = vld [vmem:[%s12393_s12 + $0x18] sm:$0xff]   ;;  %v2251_v8 = vld [vmem:[#allocation2 + $0x44] sm:$0x1] }
 0x70c   : > { %v2231_v31 = vsel %vm10788_vm11, %v2157_v14, %v2230_v28  ;;  %v2234_v33 = vsel %vm10796_vm12, %v2158_v32, %v2233_v41  ;;  %v2225_v52 = vsel %vm10788_vm11, %v2149_v15, %v2224_v24  ;;  %v2228_v13 = vsel %vm10796_vm12, %v2150_v16, %v2227_v22  ;;  %8780 = vmatprep.subr.bf16.mxu1 %v9869_v36  ;;  %v10878_v22 = vld [vmem:[#allocation2 + $0x1c] sm:$0x1]  ;;  %v2248_v28 = vld [vmem:[#allocation2 + $0x40] sm:$0xf] }
 0x70d   : > { %2232 = vst [vmem:[#allocation2 + $0x28] sm:$0xf] %v2231_v31  ;;  %2235 = vst [vmem:[#allocation2 + $0x2c] sm:$0x1] %v2234_v33  ;;  %v2243_v55 = vsel %vm10788_vm11, %v2173_v18, %v2242_v17  ;;  %v2246_v26 = vsel %vm10796_vm12, %v2174_v21, %v2245_v37  ;;  %v2237_v56 = vsel %vm10788_vm11, %v2165_v38, %v2236_v58  ;;  %v2598_v60 = vshrl.u32 %v2566_v42, 16  ;;  %v2254_v58 = vld [vmem:[%s10167_s22] sm:$0xff] }
 0x70e   : > { %2226 = vst [vmem:[#allocation2 + $0x20] sm:$0xf] %v2225_v52  ;;  %2229 = vst [vmem:[#allocation2 + $0x24] sm:$0x1] %v2228_v13  ;;  %v2240_v27 = vsel %vm10796_vm12, %v2166_v39, %v2239_v47  ;;  %v7916_v1 = vpack.c.bf16 %v2066_v11, %v2066_v11  ;;  %v2601_v61 = vshll.u32 %v2566_v42, 16  ;;  %v2607_v63 = vshll.u32 %v10846_v48, 16 }
 0x70f   : > { %2244 = vst [vmem:[#allocation2 + $0x38] sm:$0xf] %v2243_v55  ;;  %2247 = vst [vmem:[#allocation2 + $0x3c] sm:$0x1] %v2246_v26  ;;  %v2612_v2 = vshrl.u32 %v2568_v53, 16  ;;  %v2615_v3 = vshll.u32 %v2568_v53, 16  ;;  %8781 = vmatpush3.bf16.msra.mxu1 %v9869_v36 }
 0x710   : > { %2238 = vst [vmem:[#allocation2 + $0x30] sm:$0xf] %v2237_v56  ;;  %2241 = vst [vmem:[#allocation2 + $0x34] sm:$0x1] %v2240_v27  ;;  %v2621_v5 = vshll.u32 %v10857_v20, 16  ;;  %v2626_v6 = vshrl.u32 %v2570_v54, 16  ;;  %8782 = vmatprep.subr.bf16.mxu1 %v9871_v57 }
 0x711   : > { %v2176_v7 = vshrl.u32 %v7916_v1, 16  ;;  %v2600_v23 = vrot.slane %v2598_v60, 4  ;;  %v2603_v24 = vrot.slane %v2601_v61, 5  ;;  %v2179_v41 = vshll.u32 %v7916_v1, 16  ;;  %v10889_v47 = vld [vmem:[%s10167_s22 + $0x10] sm:$0xff]  ;;  %v9877_v32 = vld [vmem:[%s12393_s12 + $0x20] sm:$0xff]  }
 0x712   : > { %v2614_v43 = vrot.slane %v2612_v2, 4  ;;  %v2617_v44 = vrot.slane %v2615_v3, 5  ;;  %v2628_v29 = vrot.slane %v2626_v6, 4  ;;  %v2629_v49 = vshll.u32 %v2570_v54, 16  ;;  %v10896_v18 = vld [vmem:[#allocation2 + $0x10] sm:$0xe] }
 0x713   : > { %v2178_v35 = vrot.slane %v2176_v7, 7  ;;  %v2604_v36 = vor.u32 %v2603_v24, %v2600_v23  ;;  %v2609_v9 = vrot.slane %v2607_v63, 5  ;;  %v2623_v10 = vrot.slane %v2621_v5, 5  ;;  %8783 = vmatpush3.bf16.msra.mxu1 %v9871_v57  ;;  %v9879_v27 = vld [vmem:[%s12393_s12 + $0x28] sm:$0xff]  }
 0x714   : > { %v2618_v45 = vor.u32 %v2617_v44, %v2614_v43  ;;  %v2635_v11 = vshll.u32 %v10878_v22, 16  ;;  %v2631_v14 = vrot.slane %v2629_v49, 5  ;;  %8784 = vmatprep.subr.bf16.mxu1 %v9874_v46  ;;  %v2270_v37 = vpack.c.bf16 %v10889_v47, %v2254_v58  ;;  %v2574_v62 = vld [vmem:[#allocation2 + $0x28] sm:$0xf]  ;;  %v10908_v19 = vld [vmem:[#allocation2 + $0x2c] sm:$0x1] }
 0x715   : > { %v2181_v30 = vor.u32 %v2179_v41, %v2178_v35  ;;  %v2182_v4 = vrot.slane %v2178_v35, 4  ;;  %v2605_v12 = vrot.slane %v2604_v36, 4  ;;  %v9873_v17 = vld [vmem:[#allocation2 + $0x20] ss:$8 sps:$4 sm:$0xff]   ;;  %v10906_v53 = vld [vmem:[#allocation2 + $0x24] sm:$0x1] }
 0x716   : > { %v2619_v15 = vrot.slane %v2618_v45, 4  ;;  %v2637_v16 = vrot.slane %v2635_v11, 5  ;;  %v2632_v42 = vor.u32 %v2631_v14, %v2628_v29  ;;  %8774 = vmatprep.mubr.bf16.mxu1 %v9873_v17  ;;  %v2572_v13 = vld [vmem:[#allocation2 + $0x20] sm:$0xf]  ;;  %v2649_v56 = vshll.u32 %v10906_v53, 16  ;;  %v9875_v2 = vld [vmem:[%s12393_s12 + $0x88] sm:$0xff]  }
 0x717   : > { %v2249_v21 = vsel %vm10788_vm11, %v2181_v30, %v2248_v28  ;;  %v2252_v38 = vsel %vm10796_vm12, %v2182_v4, %v2251_v8  ;;  %v2610_v39 = vsel %vm10872_vm15, %v2605_v12, %v2609_v9  ;;  %v9876_v31 = vld [vmem:[#allocation2 + $0x30] ss:$8 sps:$4 sm:$0xff]   ;;  %8785 = vmatpush3.bf16.msra.mxu1 %v9874_v46  ;;  %v2640_v55 = vshrl.u32 %v2572_v13, 16  ;;  %v10921_v28 = vld [vmem:[#allocation2 + $0x34] sm:$0x1] }
 0x718   : > { %2250 = vst [vmem:[#allocation2 + $0x40] sm:$0xf] %v2249_v21  ;;  %2253 = vst [vmem:[#allocation2 + $0x44] sm:$0x1] %v2252_v38  ;;  %v7327_v33 = vcombine.low %v2596_v25, %v2610_v39  ;;  %v2624_v52 = vsel %vm10872_vm15, %v2619_v15, %v2623_v10  ;;  %v2633_v54 = vrot.slane %v2632_v42, 4  ;;  %v2643_v26 = vshll.u32 %v2572_v13, 16  ;;  %8775 = vmatmul.mubr.bf16.gmra.mrb[56].mxu1 %v9876_v31 }
 0x719   : > { %v2654_v57 = vshrl.u32 %v2574_v62, 16  ;;  %v2657_v1 = vshll.u32 %v2574_v62, 16  ;;  %v2663_v60 = vshll.u32 %v10908_v19, 16  ;;  %v2576_v61 = vld [vmem:[#allocation2 + $0x30] sm:$0xf]  ;;  %8786 = vmatprep.subr.bf16.mxu1 %v9877_v32  ;;  %v2642_v3 = vrot.slane %v2640_v55, 4  ;;  %8794 = vmatprep.mubr.bf16.mxu1 %v2270_v37 }
 0x71a   : > { %8842 = vmatprep.mubr.bf16.mxu0 %v7327_v33  ;;  %v2638_v63 = vsel %vm10872_vm15, %v2633_v54, %v2637_v16  ;;  %v2645_v5 = vrot.slane %v2643_v26, 5  ;;  %v7341_v6 = vrot.slane %v10896_v18, 9  ;;  %v2578_v41 = vld [vmem:[#allocation2 + $0x38] sm:$0xf]  ;;  %v2651_v43 = vrot.slane %v2649_v56, 5  ;;  %v9881_v8 = vld [vmem:[%s12393_s12 + $0x30] sm:$0xff]  }
 0x71b   : > { %v7328_v7 = vcombine.low %v2624_v52, %v2638_v63  ;;  %v2656_v23 = vrot.slane %v2654_v57, 4  ;;  %v2659_v24 = vrot.slane %v2657_v1, 5  ;;  %8787 = vmatpush3.bf16.msra.mxu1 %v9877_v32  ;;  %v10923_v44 = vld [vmem:[#allocation2 + $0x3c] sm:$0x1]  ;;  %v2668_v46 = vshrl.u32 %v2576_v61, 16  ;;  %v9878_v4 = vld [vmem:[%s12393_s12 + $0x90] sm:$0xff]  }
 0x71c   : > { %v2646_v25 = vor.u32 %v2645_v5, %v2642_v3  ;;  %v2671_v35 = vshll.u32 %v2576_v61, 16  ;;  %8788 = vmatprep.subr.bf16.mxu1 %v9879_v27  ;;  %v2665_v29 = vrot.slane %v2663_v60, 5  ;;  %v2682_v49 = vshrl.u32 %v2578_v41, 16  ;;  %v3002_v9 = vld [vmem:[#allocation2 + $0x18] sm:$0xe]  ;;  %v2991_v13 = vld [vmem:[%s10167_s22 + $0x2] sm:$0xff] }
 0x71d   : > { %8843 = vmatmul.mubr.bf16.vlgmr.msra.gmra.mrb[16].mxu0 %v7328_v7  ;;  %v2660_v36 = vor.u32 %v2659_v24, %v2656_v23  ;;  %v2685_v58 = vshll.u32 %v2578_v41, 16  ;;  %v2670_v10 = vrot.slane %v2668_v46, 4  ;;  %v2677_v30 = vshll.u32 %v10921_v28, 16  ;;  %v9883_v39 = vld [vmem:[%s12393_s12 + $0x38] sm:$0xff]   ;;  %v10970_v57 = vld [vmem:[%s10167_s22 + $0x30] sm:$0xff]  ;;  %v9885_v61 = vld [vmem:[%s12393_s12 + $0x40] sm:$0xff]  }
 0x71e   : > { %8851 = vmatpush3.bf16.msra.mxu0 %v10760_v0  ;;  %v2647_v45 = vrot.slane %v2646_v25, 4  ;;  %v2673_v11 = vrot.slane %v2671_v35, 5  ;;  %v2684_v14 = vrot.slane %v2682_v49, 4  ;;  %v2691_v15 = vshll.u32 %v10923_v44, 16  ;;  %v9880_v54 = vld [vmem:[%s12393_s12 + $0x98] sm:$0xff]   ;;  %v9882_v5 = vld [vmem:[%s12393_s12 + $0xa0] sm:$0xff]  }
 0x71f   : > { %8852 = vmatprep.subr.bf16.mxu0 %v9875_v2  ;;  %v2661_v12 = vrot.slane %v2660_v36, 4  ;;  %v2687_v32 = vrot.slane %v2685_v58, 5  ;;  %8789 = vmatpush3.bf16.msra.mxu1 %v9879_v27  ;;  %v3036_v37 = vrot.slane %v10857_v20, 5  ;;  %v7342_v18 = vrot.slane %v3002_v9, 9  ;;  %v10951_v20 = vld [vmem:[%s10167_s22 + $0x12] sm:$0xff]  ;;  %v10967_v27 = vld [vmem:[%s10167_s22 + $0x20] sm:$0xff] }
 0x720   : > { %v2652_v16 = vsel %vm10872_vm15, %v2647_v45, %v2651_v43  ;;  %v2674_v17 = vor.u32 %v2673_v11, %v2670_v10  ;;  %8790 = vmatprep.subr.bf16.mxu1 %v9881_v8  ;;  %v3040_v42 = vrot.slane %v10878_v22, 5  ;;  %v2679_v52 = vrot.slane %v2677_v30, 5  ;;  %v9887_v23 = vld [vmem:[%s12393_s12 + $0x48] sm:$0xff]   ;;  %v10997_v41 = vld [vmem:[%s10167_s22 + $0x70] sm:$0xff]  ;;  %v9891_v49 = vld [vmem:[%s12393_s12 + $0x58] sm:$0xff]  }
 0x721   : > { %v2666_v21 = vsel %vm10872_vm15, %v2661_v12, %v2665_v29  ;;  %v2688_v38 = vor.u32 %v2687_v32, %v2684_v14  ;;  %v10955_v62 = vsel %vm10936_vm3, %v7341_v6, %v3036_v37  ;;  %v2693_v55 = vrot.slane %v2691_v15, 5  ;;  %v9884_v24 = vld [vmem:[%s12393_s12 + $0xa8] sm:$0xff]   ;;  %v9889_v25 = vld [vmem:[%s12393_s12 + $0x50] sm:$0xff]   ;;  %v9888_v58 = vld [vmem:[%s12393_s12 + $0xb8] sm:$0xff]  }
 0x722   : > { %8853 = vmatpush3.bf16.msra.mxu0 %v9875_v2  ;;  %v7329_v31 = vcombine.low %v2652_v16, %v2666_v21  ;;  %v2675_v33 = vrot.slane %v2674_v17, 4  ;;  %v10962_v26 = vsel %vm10936_vm3, %v7342_v18, %v3040_v42  ;;  %v3058_v63 = vpack.c.bf16 %v10951_v20, %v2991_v13  ;;  %v10981_v2 = vld [vmem:[%s10167_s22 + $0x40] sm:$0xff]  ;;  %v11004_v46 = vld [vmem:[%s10167_s22 + $0x11] sm:$0xff]  ;;  %v4114_v10 = vld [vmem:[#allocation2 + $0x8] sm:$0xe] }
 0x723   : > { %8854 = vmatprep.subr.bf16.mxu0 %v9878_v4  ;;  %v2689_v22 = vrot.slane %v2688_v38, 4  ;;  %8791 = vmatpush3.bf16.msra.mxu1 %v9881_v8  ;;  %v2271_v6 = vpack.c.bf16 %v10970_v57, %v10967_v27  ;;  %v2272_v7 = vpack.c.bf16 %v10820_v50, %v10981_v2  ;;  %v2556_v43 = vld [vmem:[%s10167_s22 + $0x1] sm:$0xff]  ;;  %v9886_v35 = vld [vmem:[%s12393_s12 + $0xb0] sm:$0xff]   ;;  %v2273_v36 = vpack.c.bf16 %v10997_v41, %v10823_v51  ;;  %v11034_v12 = vld [vmem:[#allocation2 + $0xc] sm:$0x1] }
 0x724   : > { %8846 = vmatprep.mubr.bf16.mxu0 %v7329_v31  ;;  %v2680_v56 = vsel %vm10872_vm15, %v2675_v33, %v2679_v52  ;;  %8792 = vmatprep.subr.bf16.mxu1 %v9883_v39  ;;  %v2695_v29 = vpack.c.bf16 %v11004_v46, %v2556_v43  ;;  %v11018_v8 = vld [vmem:[#allocation2] sm:$0xe]  ;;  %v11024_v45 = vld [vmem:[%s10167_s22 + $0x32] sm:$0xff]  ;;  %v3028_v37 = vrot.slane %v10771_v40, 5  ;;  %v9895_v18 = vld [vmem:[%s12393_s12 + $0x68] sm:$0xff]   ;;  %v7527_v38 = vrot.slane %v4114_v10, 9 }
 0x725   : > { %v2694_v60 = vsel %vm10872_vm15, %v2689_v22, %v2693_v55  ;;  %v11021_v9 = vld [vmem:[%s10167_s22 + $0x22] sm:$0xff]  ;;  %v7339_v32 = vrot.slane %v11018_v8, 9  ;;  %v11040_v15 = vld [vmem:[#allocation2 + $0x14] sm:$0x1]  ;;  %v4115_v16 = vld [vmem:[#allocation2 + $0x10] sm:$0xe] }
 0x726   : > { %8855 = vmatpush3.bf16.msra.mxu0 %v9878_v4  ;;  %v7330_v3 = vcombine.low %v2680_v56, %v2694_v60  ;;  %v9890_v11 = vld [vmem:[%s12394_s13 + $0x80] sm:$0xff]   ;;  %v11032_v4 = vld [vmem:[#allocation2 + $0x8] sm:$0xe]  ;;  %v11043_v17 = vld [vmem:[%s10167_s22 + $0x52] sm:$0xff]  ;;  %v4140_v31 = vrot.slane %v11034_v12, 5  ;;  %v3059_v40 = vpack.c.bf16 %v11024_v45, %v11021_v9  ;;  %v7528_v22 = vrot.slane %v4115_v16, 9 }
 0x727   : > { %8856 = vmatprep.subr.bf16.mxu0 %v9880_v54  ;;  %8793 = vmatpush3.bf16.msra.mxu1 %v9883_v39  ;;  %v9893_v30 = vld [vmem:[%s12393_s12 + $0x60] sm:$0xff]   ;;  %v11049_v21 = vld [vmem:[#allocation2 + $0x1c] sm:$0x1]  ;;  %v7340_v39 = vrot.slane %v11032_v4, 9  ;;  %v4116_v33 = vld [vmem:[#allocation2 + $0x18] sm:$0xe] }
 0x728   : > { %8847 = vmatmul.mubr.bf16.gmra.mrb[20].mxu0 %v7330_v3  ;;  %8802 = vmatprep.subr.bf16.mxu1 %v9885_v61  ;;  %v11037_v14 = vld [vmem:[%s10167_s22 + $0x42] sm:$0xff]  ;;  %v11060_v13 = vld [vmem:[#allocation2 + $0x2c] sm:$0x1]  ;;  %v4144_v55 = vrot.slane %v11040_v15, 5  ;;  %v4119_v3 = vld [vmem:[#allocation2 + $0x30] sm:$0xe] }
 0x729   : > { %8866 = vmatprep.mubr.bf16.mxu0 %v3058_v63  ;;  %v11052_v42 = vld [vmem:[#allocation2 + $0x24] sm:$0x1]  ;;  %v9892_v52 = vld [vmem:[%s12394_s13 + $0x88] sm:$0xff]   ;;  %v4117_v56 = vld [vmem:[#allocation2 + $0x20] sm:$0xe]  ;;  %v3060_v60 = vpack.c.bf16 %v11043_v17, %v11037_v14  ;;  %v4156_v4 = vrot.slane %v11060_v13, 5 }
 0x72a   : > { %8857 = vmatpush3.bf16.msra.mxu0 %v9880_v54  ;;  %8795 = vmatmul.mubr.bf16.vlgmr.msra.gmra.mrb[52].mxu1 %v2271_v6  ;;  %v11062_v54 = vld [vmem:[#allocation2 + $0x34] sm:$0x1]  ;;  %v4118_v63 = vld [vmem:[#allocation2 + $0x28] sm:$0xe]  ;;  %v4152_v8 = vrot.slane %v11052_v42, 5  ;;  %v7532_v16 = vrot.slane %v4119_v3, 9 }
 0x72b   : > { %8858 = vmatprep.subr.bf16.mxu0 %v9882_v5  ;;  %8803 = vmatpush3.bf16.msra.mxu1 %v9885_v61  ;;  %v11067_v61 = vld [vmem:[#allocation2 + $0x3c] sm:$0x1]  ;;  %v11073_v6 = vld [vmem:[%s10167_s22 + $0x72] sm:$0xff]  ;;  %v7531_v10 = vrot.slane %v4118_v63, 9  ;;  %v4801_v43 = vld [vmem:[#allocation2 + $0x24] sm:$0x1] }
 0x72c   : > { %8798 = vmatprep.mubr.bf16.mxu1 %v2272_v7  ;;  %8804 = vmatprep.subr.bf16.mxu1 %v9887_v23  ;;  %12429 = vst [vmem:[#allocation3_spill] sm:$0xff] %v11073_v6  ;;  %v9897_v7 = vld [vmem:[%s12393_s12 + $0x70] sm:$0xff]  }
 0x72d   : > { %v9909_v0 = vld [vmem:[%s12393_s12 + $0xf0] sm:$0xff]  }
 0x72e   : > { %8859 = vmatpush3.bf16.msra.mxu0 %v9882_v5  ;;  %v11070_v5 = vld [vmem:[%s10167_s22 + $0x62] sm:$0xff] }
 0x72f   : > { %8860 = vmatprep.subr.bf16.mxu0 %v9884_v24  ;;  %8805 = vmatpush3.bf16.msra.mxu1 %v9887_v23  ;;  %v11080_v23 = vsel %vm10936_vm3, %v7527_v38, %v4140_v31  ;;  %v4160_v38 = vrot.slane %v11062_v54, 5  ;;  %v4121_v31 = vld [vmem:[#allocation2 + $0x40] sm:$0xe] }
 0x730   : > { %8806 = vmatprep.subr.bf16.mxu1 %v9889_v25  ;;  %12430 = vst [vmem:[#allocation4_spill] sm:$0xff] %v11080_v23  ;;  %v7534_v3 = vrot.slane %v4121_v31, 9  ;;  %v4811_v31 = vld [vmem:[#allocation2 + $0x4c] sm:$0x1]  ;;  %v4809_v23 = vld [vmem:[#allocation2 + $0x44] sm:$0x1] }
 0x732   : > { %8861 = vmatpush3.bf16.msra.mxu0 %v9884_v24  ;;  %8799 = vmatmul.mubr.bf16.gmra.mrb[56].mxu1 %v2273_v36  ;;  %v11084_v24 = vsel %vm10936_vm3, %v7528_v22, %v4144_v55  ;;  %v4148_v36 = vrot.slane %v11049_v21, 5  ;;  %v11115_v55 = vsel %vm10936_vm3, %v7531_v10, %v4156_v4  ;;  %v11149_v10 = vld [vmem:[%s10167_s22 + $0x41] sm:$0xff]  ;;  %v11152_v4 = vld [vmem:[%s10167_s22 + $0x51] sm:$0xff] }
 0x733   : > { %8862 = vmatprep.subr.bf16.mxu0 %v9886_v35  ;;  %8807 = vmatpush3.bf16.msra.mxu1 %v9889_v25  ;;  %12431 = vst [vmem:[#allocation5_spill] sm:$0xff] %v11084_v24  ;;  %v4120_v25 = vld [vmem:[#allocation2 + $0x38] sm:$0xe]  ;;  %12434 = vst [vmem:[#allocation8_spill] sm:$0xff] %v11115_v55  ;;  %v5230_v22 = vld [vmem:[#allocation2 + $0x20] sm:$0xe] }
 0x734   : > { %8818 = vmatprep.mubr.bf16.mxu1 %v2695_v29  ;;  %8808 = vmatprep.subr.bf16.mxu1 %v9891_v49  ;;  %v3032_v29 = vrot.slane %v10846_v48, 5  ;;  %v9894_v48 = vld [vmem:[%s12394_s13 + $0x90] sm:$0xff]   ;;  %v5233_v24 = vld [vmem:[#allocation2 + $0x38] sm:$0xe] }
 0x736   : > { %8863 = vmatpush3.bf16.msra.mxu0 %v9886_v35  ;;  %v7529_v35 = vrot.slane %v4116_v33, 9 }
 0x737   : > { %8864 = vmatprep.subr.bf16.mxu0 %v9888_v58  ;;  %8809 = vmatpush3.bf16.msra.mxu1 %v9891_v49  ;;  %v11090_v49 = vld [vmem:[#allocation2 + $0x44] sm:$0x1] }
 0x738   : > { %8810 = vmatprep.subr.bf16.mxu1 %v9893_v30  ;;  %v11102_v33 = vsel %vm10936_vm3, %v7529_v35, %v4148_v36  ;;  %v9896_v35 = vld [vmem:[%s12394_s13 + $0x98] sm:$0xff]  }
 0x739   : > { %12432 = vst [vmem:[#allocation6_spill] sm:$0xff] %v11102_v33 }
 0x73a   : > { %8865 = vmatpush3.bf16.msra.mxu0 %v9888_v58  ;;  %v7530_v58 = vrot.slane %v4117_v56, 9  ;;  %v11119_v56 = vsel %vm10936_vm3, %v7532_v16, %v4160_v38  ;;  %v2697_v16 = vpack.c.bf16 %v11152_v4, %v11149_v10  ;;  %v9900_v38 = vld [vmem:[%s12394_s13 + $0xa8] sm:$0xff]  }
 0x73b   : > { %8874 = vmatprep.subr.bf16.mxu0 %v9890_v11  ;;  %8811 = vmatpush3.bf16.msra.mxu1 %v9893_v30  ;;  %v3029_v30 = vsel %vm10936_vm3, %v7339_v32, %v3028_v37  ;;  %v7533_v32 = vrot.slane %v4120_v25, 9  ;;  %v4164_v37 = vrot.slane %v11067_v61, 5  ;;  %12435 = vst [vmem:[#allocation9_spill] sm:$0xff] %v11119_v56  ;;  %v4168_v25 = vrot.slane %v11090_v49, 5 }
 0x73c   : > { %8812 = vmatprep.subr.bf16.mxu1 %v9895_v18 }
 0x73d   : > { %8867 = vmatmul.mubr.bf16.vlgmr.msra.gmra.mrb[16].mxu0 %v3059_v40  ;;  %v3061_v40 = vpack.c.bf16 %v11073_v6, %v11070_v5  ;;  %v11138_v36 = vsel %vm10936_vm3, %v7534_v3, %v4168_v25  ;;  %v5228_v3 = vld [vmem:[#allocation2 + $0x10] sm:$0xe]  ;;  %v5234_v6 = vld [vmem:[#allocation2 + $0x40] sm:$0xe] }
 0x73e   : > { %8875 = vmatpush3.bf16.msra.mxu0 %v9890_v11  ;;  %8870 = vmatprep.mubr.bf16.mxu0 %v3060_v60  ;;  %v11106_v11 = vsel %vm10936_vm3, %v7530_v58, %v4152_v8  ;;  %v3033_v60 = vsel %vm10936_vm3, %v7340_v39, %v3032_v29  ;;  %v11134_v39 = vsel %vm10936_vm3, %v7533_v32, %v4164_v37  ;;  %v11141_v58 = vld [vmem:[%s10167_s22 + $0x21] sm:$0xff]  ;;  %v11144_v8 = vld [vmem:[%s10167_s22 + $0x31] sm:$0xff]  ;;  %v5235_v37 = vld [vmem:[#allocation2 + $0x48] sm:$0xe]  ;;  %v7715_v34 = vrot.slane %v5228_v3, 9 }
 0x73f   : > { %8876 = vmatprep.subr.bf16.mxu0 %v9892_v52  ;;  %12433 = vst [vmem:[#allocation7_spill] sm:$0xff] %v11106_v11  ;;  %8813 = vmatpush3.bf16.msra.mxu1 %v9895_v18  ;;  %v9899_v18 = vld [vmem:[%s12393_s12 + $0x78] sm:$0xff]   ;;  %12436 = vst [vmem:[#allocation10_spill] sm:$0xff] %v11134_v39  ;;  %v7387_v29 = vcombine.low %v3029_v30, %v3033_v60  ;;  %v2696_v30 = vpack.c.bf16 %v11144_v8, %v11141_v58  ;;  %v9901_v60 = vld [vmem:[%s12394_s13 + $0xb0] sm:$0xff]  }
 0x740   : > { %8814 = vmatprep.subr.bf16.mxu1 %v9897_v7  ;;  %12437 = vst [vmem:[#allocation11_spill] sm:$0xff] %v11138_v36  ;;  %v11168_v32 = vld [vmem:[%s10167_s22 + $0x71] sm:$0xff]  ;;  %v5231_v36 = vld [vmem:[#allocation2 + $0x28] sm:$0xe]  ;;  %v4803_v39 = vld [vmem:[#allocation2 + $0x2c] sm:$0x1] }
 0x741   : > { %v5232_v11 = vld [vmem:[#allocation2 + $0x30] sm:$0xe]  ;;  %v7718_v33 = vrot.slane %v5231_v36, 9 }
 0x742   : > { %8877 = vmatpush3.bf16.msra.mxu0 %v9892_v52  ;;  %v3004_v52 = vld [vmem:[#allocation2 + $0x28] sm:$0xe] }
 0x743   : > { %8878 = vmatprep.subr.bf16.mxu0 %v9894_v48  ;;  %8815 = vmatpush3.bf16.msra.mxu1 %v9897_v7  ;;  %v9898_v7 = vld [vmem:[%s12394_s13 + $0xa0] sm:$0xff]  }
 0x744   : > { %8816 = vmatprep.subr.bf16.mxu1 %v9899_v18 }
 0x745   : > { %8871 = vmatmul.mubr.bf16.gmra.mrb[20].mxu0 %v3061_v40  ;;  %v3003_v40 = vld [vmem:[#allocation2 + $0x20] sm:$0xe] }
 0x746   : > { %8879 = vmatpush3.bf16.msra.mxu0 %v9894_v48  ;;  %8890 = vmatprep.mubr.bf16.mxu0 %v7387_v29  ;;  %v11165_v48 = vld [vmem:[%s10167_s22 + $0x61] sm:$0xff]  ;;  %v5229_v29 = vld [vmem:[#allocation2 + $0x18] sm:$0xe]  ;;  %v7343_v63 = vrot.slane %v3003_v40, 9  ;;  %v4805_v40 = vld [vmem:[#allocation2 + $0x34] sm:$0x1] }
 0x747   : > { %8880 = vmatprep.subr.bf16.mxu0 %v9896_v35  ;;  %8817 = vmatpush3.bf16.msra.mxu1 %v9899_v18  ;;  %v11173_v18 = vld [vmem:[#allocation2 + $0x14] sm:$0x1]  ;;  %v2698_v25 = vpack.c.bf16 %v11168_v32, %v11165_v48  ;;  %v7716_v56 = vrot.slane %v5229_v29, 9 }
 0x748   : > { %12438 = vst [vmem:[#allocation12_spill] sm:$0xff] %v11173_v18  ;;  %v5254_v1 = vrot.slane %v11173_v18, 5  ;;  %v4807_v18 = vld [vmem:[#allocation2 + $0x3c] sm:$0x1] }
 0x74a   : > { %8881 = vmatpush3.bf16.msra.mxu0 %v9896_v35  ;;  %8819 = vmatmul.mubr.bf16.vlgmr.msra.gmra.mrb[52].mxu1 %v2696_v30  ;;  %v11177_v35 = vld [vmem:[#allocation2 + $0x1c] sm:$0x1]  ;;  %v7722_v30 = vrot.slane %v5235_v37, 9  ;;  %v7344_v37 = vrot.slane %v3004_v52, 9  ;;  %v11188_v3 = vsel %vm10936_vm3, %v7715_v34, %v5254_v1  ;;  %v5270_v1 = vrot.slane %v4805_v40, 5 }
 0x74b   : > { %8882 = vmatprep.subr.bf16.mxu0 %v9898_v7  ;;  %8822 = vmatprep.mubr.bf16.mxu1 %v2697_v16  ;;  %12439 = vst [vmem:[#allocation13_spill] sm:$0xff] %v11177_v35  ;;  %v5282_v16 = vrot.slane %v4811_v31, 5  ;;  %v5258_v55 = vrot.slane %v11177_v35, 5  ;;  %v9902_v31 = vld [vmem:[%s12394_s13 + $0xb8] sm:$0xff]   ;;  %v5262_v35 = vrot.slane %v4801_v43, 5  ;;  %v9903_v43 = vld [vmem:[%s12393_s12 + $0xc0] sm:$0xff]  }
 0x74c   : > { %v5278_v40 = vrot.slane %v4809_v23, 5 }
 0x74d   : > { %v11192_v29 = vsel %vm10936_vm3, %v7716_v56, %v5258_v55  ;;  %v7720_v55 = vrot.slane %v5233_v24, 9  ;;  %v5274_v56 = vrot.slane %v4807_v18, 5  ;;  %v3006_v18 = vld [vmem:[#allocation2 + $0x38] sm:$0xe] }
 0x74e   : > { %8883 = vmatpush3.bf16.msra.mxu0 %v9898_v7  ;;  %v3044_v7 = vrot.slane %v10906_v53, 5  ;;  %v3048_v53 = vrot.slane %v10908_v19, 5  ;;  %v7763_v52 = vcombine.low %v11188_v3, %v11192_v29  ;;  %v7719_v19 = vrot.slane %v5232_v11, 9  ;;  %v10006_v3 = vld [vmem:[%s12394_s13 + $0x238] sm:$0xff]   ;;  %v5628_v29 = vld [vmem:[%s12397_s16 + $0x50] sm:$0xff] }
 0x74f   : > { %8884 = vmatprep.subr.bf16.mxu0 %v9900_v38  ;;  %v11209_v11 = vsel %vm10936_vm3, %v7722_v30, %v5282_v16  ;;  %v11223_v30 = vsel %vm10936_vm3, %v7720_v55, %v5274_v56  ;;  %v3371_v56 = vpack.c.bf16 %v10981_v2, %v10970_v57  ;;  %v9915_v2 = vld [vmem:[%s12394_s13 + $0xd8] sm:$0xff]  }
 0x750   : > { %v3049_v24 = vsel %vm10936_vm3, %v7344_v37, %v3048_v53  ;;  %v3052_v37 = vrot.slane %v10921_v28, 5  ;;  %v3056_v53 = vrot.slane %v10923_v44, 5  ;;  %v3370_v44 = vpack.c.bf16 %v10967_v27, %v10889_v47  ;;  %v9908_v47 = vld [vmem:[%s12393_s12 + $0xe8] sm:$0xff]   ;;  %v9910_v27 = vld [vmem:[%s12393_s12 + $0xf8] sm:$0xff]  }
 0x752   : > { %8885 = vmatpush3.bf16.msra.mxu0 %v9900_v38  ;;  %8823 = vmatmul.mubr.bf16.gmra.mrb[56].mxu1 %v2698_v25  ;;  %v7717_v38 = vrot.slane %v5230_v22, 9  ;;  %v5266_v25 = vrot.slane %v4803_v39, 5  ;;  %v3005_v39 = vld [vmem:[#allocation2 + $0x30] sm:$0xe] }
 0x753   : > { %8886 = vmatprep.subr.bf16.mxu0 %v9901_v60  ;;  %v7345_v23 = vrot.slane %v3005_v39, 9  ;;  %v9912_v39 = vld [vmem:[%s12394_s13 + $0xc8] sm:$0xff]  }
 0x754   : > { %v11198_v34 = vsel %vm10936_vm3, %v7717_v38, %v5262_v35  ;;  %v11205_v22 = vsel %vm10936_vm3, %v7718_v33, %v5266_v25  ;;  %v7721_v35 = vrot.slane %v5234_v6, 9  ;;  %v3045_v33 = vsel %vm10936_vm3, %v7343_v63, %v3044_v7  ;;  %v9904_v6 = vld [vmem:[%s12393_s12 + $0xc8] sm:$0xff]  }
 0x755   : > { %v7764_v36 = vcombine.low %v11198_v34, %v11205_v22  ;;  %v7389_v7 = vcombine.low %v3045_v33, %v3049_v24  ;;  %v12440_v25 = vcombine.low %v10955_v62, %v10962_v26  ;;  %v9906_v62 = vld [vmem:[%s12393_s12 + $0xd8] sm:$0xff]   ;;  %v9907_v26 = vld [vmem:[%s12393_s12 + $0xe0] sm:$0xff]   ;;  %v9913_v33 = vld [vmem:[%s12394_s13 + $0xd0] sm:$0xff]  }
 0x756   : > { %8887 = vmatpush3.bf16.msra.mxu0 %v9901_v60  ;;  %v11215_v60 = vsel %vm10936_vm3, %v7719_v19, %v5270_v1  ;;  %v11229_v38 = vsel %vm10936_vm3, %v7721_v35, %v5278_v40  ;;  %v9905_v19 = vld [vmem:[%s12393_s12 + $0xd0] sm:$0xff]   ;;  %v3053_v1 = vsel %vm10936_vm3, %v7345_v23, %v3052_v37  ;;  %v12441_v35 = vpack.c.bf16 %v10823_v51, %v10820_v50  ;;  %v11277_v40 = vld [vmem:[%s10167_s22 + $0x80] sm:$0xff]  ;;  %v9917_v51 = vld [vmem:[%s12394_s13 + $0xe8] sm:$0xff]  }
 0x757   : > { %8888 = vmatprep.subr.bf16.mxu0 %v9902_v31  ;;  %v7765_v16 = vcombine.low %v11215_v60, %v11223_v30  ;;  %v7766_v63 = vcombine.low %v11229_v38, %v11209_v11  ;;  %v3373_v57 = vpack.c.bf16 %v11277_v40, %v10997_v41  ;;  %v9914_v24 = vld [vmem:[#allocation2 + $0x8] ss:$8 sps:$4 sm:$0xff]   ;;  %v9916_v50 = vld [vmem:[%s12394_s13 + $0xe0] sm:$0xff]   ;;  %v5633_v60 = vld [vmem:[%s12397_s16 + $0x78] sm:$0xff] }
 0x758   : > { %v9918_v41 = vld [vmem:[%s12394_s13 + $0xf0] sm:$0xff]   ;;  %v9920_v23 = vld [vmem:[#allocation2 + $0x18] ss:$8 sps:$4 sm:$0xff]   ;;  %v5631_v22 = vld [vmem:[%s12397_s16 + $0x68] sm:$0xff] }
 0x759   : > { %v9922_v37 = vld [vmem:[#allocation2 + $0x28] ss:$8 sps:$4 sm:$0xff]   ;;  %v5630_v34 = vld [vmem:[%s12397_s16 + $0x60] sm:$0xff] }
 0x75a   : > { %8889 = vmatpush3.bf16.msra.mxu0 %v9902_v31  ;;  %v7346_v31 = vrot.slane %v3006_v18, 9  ;;  %v9919_v18 = vld [vmem:[%s12394_s13 + $0xf8] sm:$0xff]   ;;  %v9630_v11 = vpack.c.bf16 %v5631_v22, %v5630_v34  ;;  %v7775_v38 = vld [vmem:[%s12395_s14] ss:$0 sm:$0xff] }
 0x75b   : > { %8898 = vmatprep.subr.bf16.mxu0 %v9903_v43 }
 0x75c   : > { %v3057_v28 = vsel %vm10936_vm3, %v7346_v31, %v3056_v53  ;;  %v9925_v31 = vld [vmem:[%s12393_s12 + $0x110] sm:$0xff]   ;;  %v3810_v53 = vpack.c.bf16 %v11141_v58, %v11004_v46  ;;  %v9928_v46 = vld [vmem:[%s12393_s12 + $0x128] sm:$0xff]  }
 0x75d   : > { %8891 = vmatmul.mubr.bf16.vlgmr.msra.gmra.mrb[16].mxu0 %v12440_v25  ;;  %v7390_v55 = vcombine.low %v3053_v1, %v3057_v28  ;;  %v9924_v25 = vld [vmem:[#allocation2 + $0x38] ss:$8 sps:$4 sm:$0xff]   ;;  %v3682_v58 = vld [vmem:[#allocation2 + $0x8] sm:$0xf]  ;;  %v3684_v28 = vld [vmem:[#allocation2 + $0x10] sm:$0xf] }
 0x75e   : > { %8894 = vmatprep.mubr.bf16.mxu0 %v7389_v7  ;;  %8899 = vmatpush3.bf16.msra.mxu0 %v9903_v43  ;;  %v9911_v43 = vld [vmem:[%s12394_s13 + $0xc0] sm:$0xff]   ;;  %v9923_v7 = vld [vmem:[%s12393_s12 + $0x108] sm:$0xff]  }
 0x75f   : > { %8900 = vmatprep.subr.bf16.mxu0 %v9904_v6  ;;  %v9927_v1 = vld [vmem:[%s12393_s12 + $0x120] sm:$0xff]  }
 0x762   : > { %8901 = vmatpush3.bf16.msra.mxu0 %v9904_v6  ;;  %v9921_v6 = vld [vmem:[%s12393_s12 + $0x100] sm:$0xff]  }
 0x763   : > { %8902 = vmatprep.subr.bf16.mxu0 %v9905_v19 }
 0x765   : > { %8895 = vmatmul.mubr.bf16.gmra.mrb[20].mxu0 %v7390_v55  ;;  %v3699_v55 = vshrl.u32 %v3682_v58, 16 }
 0x766   : > { %8903 = vmatpush3.bf16.msra.mxu0 %v9905_v19  ;;  %8914 = vmatprep.mubr.bf16.mxu0 %v3370_v44  ;;  %v9926_v19 = vld [vmem:[%s12393_s12 + $0x118] sm:$0xff]   ;;  %v9929_v44 = vld [vmem:[%s12393_s12 + $0x130] sm:$0xff]  }
 0x767   : > { %8904 = vmatprep.subr.bf16.mxu0 %v9906_v62 }
 0x76a   : > { %8905 = vmatpush3.bf16.msra.mxu0 %v9906_v62  ;;  %v3702_v62 = vshll.u32 %v3682_v58, 16 }
 0x76b   : > { %8906 = vmatprep.subr.bf16.mxu0 %v9907_v26 }
 0x76e   : > { %8907 = vmatpush3.bf16.msra.mxu0 %v9907_v26  ;;  %v3713_v26 = vshrl.u32 %v3684_v28, 16 }
 0x76f   : > { %8908 = vmatprep.subr.bf16.mxu0 %v9908_v47 }
 0x772   : > { %8909 = vmatpush3.bf16.msra.mxu0 %v9908_v47  ;;  %v3716_v47 = vshll.u32 %v3684_v28, 16 }
 0x773   : > { %8910 = vmatprep.subr.bf16.mxu0 %v9909_v0 }
 0x776   : > { %8911 = vmatpush3.bf16.msra.mxu0 %v9909_v0  ;;  %v9930_v0 = vld [vmem:[%s12393_s12 + $0x138] sm:$0xff]  }
 0x777   : > { %8912 = vmatprep.subr.bf16.mxu0 %v9910_v27 }
 0x77a   : > { %8913 = vmatpush3.bf16.msra.mxu0 %v9910_v27  ;;  %v3701_v27 = vrot.slane %v3699_v55, 4 }
 0x77b   : > { %8922 = vmatprep.subr.bf16.mxu0 %v9911_v43 }
 0x77d   : > { %8915 = vmatmul.mubr.bf16.vlgmr.msra.gmra.mrb[16].mxu0 %v3371_v56  ;;  %v3715_v56 = vrot.slane %v3713_v26, 4 }
 0x77e   : > { %8923 = vmatpush3.bf16.msra.mxu0 %v9911_v43  ;;  %8918 = vmatprep.mubr.bf16.mxu0 %v12441_v35  ;;  %v3704_v43 = vrot.slane %v3702_v62, 5  ;;  %v9931_v35 = vld [vmem:[%s12394_s13 + $0x100] sm:$0xff]   ;;  %v9936_v62 = vld [vmem:[%s12394_s13 + $0x128] sm:$0xff]  }
 0x77f   : > { %8924 = vmatprep.subr.bf16.mxu0 %v9912_v39 }
 0x782   : > { %8925 = vmatpush3.bf16.msra.mxu0 %v9912_v39  ;;  %v3718_v39 = vrot.slane %v3716_v47, 5 }
 0x783   : > { %8926 = vmatprep.subr.bf16.mxu0 %v9913_v33 }
 0x785   : > { %8919 = vmatmul.mubr.bf16.gmra.mrb[20].mxu0 %v3373_v57  ;;  %v3705_v57 = vor.u32 %v3704_v43, %v3701_v27 }
 0x786   : > { %8927 = vmatpush3.bf16.msra.mxu0 %v9913_v33  ;;  %8938 = vmatprep.mubr.bf16.mxu0 %v9914_v24  ;;  %v3811_v33 = vpack.c.bf16 %v11149_v10, %v11144_v8  ;;  %v3812_v24 = vpack.c.bf16 %v11165_v48, %v11152_v4  ;;  %v11338_v8 = vld [vmem:[%s10167_s22 + $0x81] sm:$0xff]  ;;  %v9933_v10 = vld [vmem:[%s12394_s13 + $0x110] sm:$0xff]  }
 0x787   : > { %8928 = vmatprep.subr.bf16.mxu0 %v9915_v2 }
 0x78a   : > { %8929 = vmatpush3.bf16.msra.mxu0 %v9915_v2  ;;  %v3719_v2 = vor.u32 %v3718_v39, %v3715_v56  ;;  %v3696_v39 = vld [vmem:[#allocation2 + $0x40] sm:$0xf] }
 0x78b   : > { %8930 = vmatprep.subr.bf16.mxu0 %v9916_v50 }
 0x78e   : > { %8931 = vmatpush3.bf16.msra.mxu0 %v9916_v50  ;;  %v9932_v50 = vld [vmem:[%s12394_s13 + $0x108] sm:$0xff]  }
 0x78f   : > { %8932 = vmatprep.subr.bf16.mxu0 %v9917_v51 }
 0x792   : > { %8933 = vmatpush3.bf16.msra.mxu0 %v9917_v51  ;;  %v3708_v51 = vshll.u32 %v11034_v12, 16 }
 0x793   : > { %8934 = vmatprep.subr.bf16.mxu0 %v9918_v41 }
 0x794   : > { %v3710_v4 = vrot.slane %v3708_v51, 5 }
 0x796   : > { %8935 = vmatpush3.bf16.msra.mxu0 %v9918_v41  ;;  %v3722_v41 = vshll.u32 %v11040_v15, 16 }
 0x797   : > { %8936 = vmatprep.subr.bf16.mxu0 %v9919_v18 }
 0x798   : > { %v3724_v48 = vrot.slane %v3722_v41, 5  ;;  %v3797_v41 = vshrl.u32 %v3696_v39, 16 }
 0x79a   : > { %8937 = vmatpush3.bf16.msra.mxu0 %v9919_v18  ;;  %v3706_v18 = vrot.slane %v3705_v57, 4  ;;  %v9937_v57 = vld [vmem:[%s12394_s13 + $0x130] sm:$0xff]  }
 0x79b   : > { %8946 = vmatprep.subr.bf16.mxu0 %v9921_v6 }
 0x79c   : > { %v3711_v12 = vsel %vm10872_vm15, %v3706_v18, %v3710_v4  ;;  %v3800_v18 = vshll.u32 %v3696_v39, 16  ;;  %v3750_v4 = vshll.u32 %v11052_v42, 16  ;;  %v9940_v39 = vld [vmem:[%s12393_s12 + $0x148] sm:$0xff]  }
 0x79d   : > { %8939 = vmatmul.mubr.bf16.vlgmr.msra.gmra.mrb[16].mxu0 %v9920_v23  ;;  %v3813_v23 = vpack.c.bf16 %v11338_v8, %v11168_v32  ;;  %v9935_v32 = vld [vmem:[%s12394_s13 + $0x120] sm:$0xff]  }
 0x79e   : > { %8942 = vmatprep.mubr.bf16.mxu0 %v9922_v37  ;;  %8947 = vmatpush3.bf16.msra.mxu0 %v9921_v6  ;;  %v3720_v6 = vrot.slane %v3719_v2, 4 }
 0x79f   : > { %8948 = vmatprep.subr.bf16.mxu0 %v9923_v7 }
 0x7a0   : > { %v3725_v15 = vsel %vm10872_vm15, %v3720_v6, %v3724_v48 }
 0x7a1   : > { %v7507_v37 = vcombine.low %v3711_v12, %v3725_v15  ;;  %v9938_v12 = vld [vmem:[%s12394_s13 + $0x138] sm:$0xff]  }
 0x7a2   : > { %8949 = vmatpush3.bf16.msra.mxu0 %v9923_v7  ;;  %v9934_v7 = vld [vmem:[%s12394_s13 + $0x118] sm:$0xff]  }
 0x7a3   : > { %8950 = vmatprep.subr.bf16.mxu0 %v9925_v31 }
 0x7a5   : > { %8943 = vmatmul.mubr.bf16.gmra.mrb[20].mxu0 %v9924_v25  ;;  %v3686_v25 = vld [vmem:[#allocation2 + $0x18] sm:$0xf] }
 0x7a6   : > { %8951 = vmatpush3.bf16.msra.mxu0 %v9925_v31  ;;  %8962 = vmatprep.mubr.bf16.mxu0 %v3810_v53  ;;  %v3688_v31 = vld [vmem:[#allocation2 + $0x20] sm:$0xf]  ;;  %v3692_v53 = vld [vmem:[#allocation2 + $0x30] sm:$0xf]  ;;  %v3730_v55 = vshll.u32 %v3686_v25, 16 }
 0x7a7   : > { %8952 = vmatprep.subr.bf16.mxu0 %v9926_v19  ;;  %v3769_v58 = vshrl.u32 %v3692_v53, 16  ;;  %v3772_v28 = vshll.u32 %v3692_v53, 16  ;;  %v3799_v53 = vrot.slane %v3797_v41, 4 }
 0x7a9   : > { %v3771_v43 = vrot.slane %v3769_v58, 4  ;;  %v3774_v56 = vrot.slane %v3772_v28, 5  ;;  %v9939_v28 = vld [vmem:[%s12393_s12 + $0x140] sm:$0xff]  }
 0x7aa   : > { %8953 = vmatpush3.bf16.msra.mxu0 %v9926_v19  ;;  %v3741_v19 = vshrl.u32 %v3688_v31, 16 }
 0x7ab   : > { %8954 = vmatprep.subr.bf16.mxu0 %v9927_v1  ;;  %v3775_v6 = vor.u32 %v3774_v56, %v3771_v43 }
 0x7ae   : > { %8955 = vmatpush3.bf16.msra.mxu0 %v9927_v1  ;;  %v3744_v1 = vshll.u32 %v3688_v31, 16 }
 0x7af   : > { %8956 = vmatprep.subr.bf16.mxu0 %v9928_v46 }
 0x7b0   : > { %v3746_v27 = vrot.slane %v3744_v1, 5  ;;  %v3752_v1 = vrot.slane %v3750_v4, 5  ;;  %v9946_v4 = vld [vmem:[%s12393_s12 + $0x178] sm:$0xff]  }
 0x7b2   : > { %8957 = vmatpush3.bf16.msra.mxu0 %v9928_v46  ;;  %v3690_v46 = vld [vmem:[#allocation2 + $0x28] sm:$0xf] }
 0x7b3   : > { %8958 = vmatprep.subr.bf16.mxu0 %v9929_v44  ;;  %v3755_v26 = vshrl.u32 %v3690_v46, 16  ;;  %v3758_v47 = vshll.u32 %v3690_v46, 16 }
 0x7b5   : > { %v3757_v2 = vrot.slane %v3755_v26, 4 }
 0x7b6   : > { %8959 = vmatpush3.bf16.msra.mxu0 %v9929_v44  ;;  %v3727_v44 = vshrl.u32 %v3686_v25, 16  ;;  %v3764_v25 = vshll.u32 %v11060_v13, 16 }
 0x7b7   : > { %8960 = vmatprep.subr.bf16.mxu0 %v9930_v0 }
 0x7b8   : > { %v3766_v26 = vrot.slane %v3764_v25, 5  ;;  %v9952_v25 = vld [vmem:[%s12394_s13 + $0x168] sm:$0xff]  }
 0x7ba   : > { %8961 = vmatpush3.bf16.msra.mxu0 %v9930_v0  ;;  %v3743_v0 = vrot.slane %v3741_v19, 4  ;;  %v3776_v19 = vrot.slane %v3775_v6, 4  ;;  %v9942_v6 = vld [vmem:[%s12393_s12 + $0x158] sm:$0xff]  }
 0x7bb   : > { %8970 = vmatprep.subr.bf16.mxu0 %v9931_v35 }
 0x7bc   : > { %v3747_v51 = vor.u32 %v3746_v27, %v3743_v0  ;;  %v3806_v27 = vshll.u32 %v11090_v49, 16  ;;  %v9941_v49 = vld [vmem:[%s12393_s12 + $0x150] sm:$0xff]  }
 0x7bd   : > { %8963 = vmatmul.mubr.bf16.vlgmr.msra.gmra.mrb[16].mxu0 %v3811_v33  ;;  %v3732_v33 = vrot.slane %v3730_v55, 5 }
 0x7be   : > { %8971 = vmatpush3.bf16.msra.mxu0 %v9931_v35  ;;  %8966 = vmatprep.mubr.bf16.mxu0 %v3812_v24  ;;  %v3729_v35 = vrot.slane %v3727_v44, 4  ;;  %v3760_v24 = vrot.slane %v3758_v47, 5  ;;  %v3748_v31 = vrot.slane %v3747_v51, 4 }
 0x7bf   : > { %8972 = vmatprep.subr.bf16.mxu0 %v9932_v50 }
 0x7c0   : > { %v3761_v15 = vor.u32 %v3760_v24, %v3757_v2  ;;  %v3808_v24 = vrot.slane %v3806_v27, 5 }
 0x7c2   : > { %8973 = vmatpush3.bf16.msra.mxu0 %v9932_v50  ;;  %v3694_v50 = vld [vmem:[#allocation2 + $0x38] sm:$0xf]  ;;  %v3762_v44 = vrot.slane %v3761_v15, 4  ;;  %v9948_v15 = vld [vmem:[%s12394_s13 + $0x148] sm:$0xff]  }
 0x7c3   : > { %8974 = vmatprep.subr.bf16.mxu0 %v9933_v10  ;;  %v3783_v48 = vshrl.u32 %v3694_v50, 16 }
 0x7c4   : > { %v3767_v56 = vsel %vm10872_vm15, %v3762_v44, %v3766_v26  ;;  %v9957_v26 = vld [vmem:[%s12393_s12 + $0x190] sm:$0xff]  }
 0x7c5   : > { %8967 = vmatmul.mubr.bf16.gmra.mrb[20].mxu0 %v3813_v23  ;;  %v3786_v23 = vshll.u32 %v3694_v50, 16  ;;  %v3785_v46 = vrot.slane %v3783_v48, 4  ;;  %v9947_v48 = vld [vmem:[%s12394_s13 + $0x140] sm:$0xff]  }
 0x7c6   : > { %8975 = vmatpush3.bf16.msra.mxu0 %v9933_v10  ;;  %8986 = vmatprep.mubr.bf16.mxu0 %v7507_v37  ;;  %v3733_v10 = vor.u32 %v3732_v33, %v3729_v35  ;;  %v3736_v37 = vshll.u32 %v11049_v21, 16  ;;  %v3753_v21 = vsel %vm10872_vm15, %v3748_v31, %v3752_v1  ;;  %v3792_v33 = vshll.u32 %v11067_v61, 16  ;;  %v12444_v31 = vld [vmem:[#allocation5_spill] sm:$0xff] }
 0x7c7   : > { %8976 = vmatprep.subr.bf16.mxu0 %v9934_v7  ;;  %v3788_v58 = vrot.slane %v3786_v23, 5  ;;  %v4170_v61 = vpack.c.bf16 %v11021_v9, %v10951_v20  ;;  %v9944_v20 = vld [vmem:[%s12393_s12 + $0x168] sm:$0xff]   ;;  %v9945_v9 = vld [vmem:[%s12393_s12 + $0x170] sm:$0xff]   ;;  %v4171_v23 = vpack.c.bf16 %v11037_v14, %v11024_v45  ;;  %v9955_v1 = vld [vmem:[%s12393_s12 + $0x180] sm:$0xff]  }
 0x7c8   : > { %v3734_v42 = vrot.slane %v3733_v10, 4  ;;  %v3738_v55 = vrot.slane %v3736_v37, 5  ;;  %v3794_v50 = vrot.slane %v3792_v33, 5  ;;  %v9943_v10 = vld [vmem:[%s12393_s12 + $0x160] sm:$0xff]   ;;  %v9949_v37 = vld [vmem:[%s12394_s13 + $0x150] sm:$0xff]  }
 0x7c9   : > { %v3789_v0 = vor.u32 %v3788_v58, %v3785_v46  ;;  %v12442_v45 = vld [vmem:[#allocation3_spill] sm:$0xff]  ;;  %v9956_v46 = vld [vmem:[%s12393_s12 + $0x188] sm:$0xff]  }
 0x7ca   : > { %8977 = vmatpush3.bf16.msra.mxu0 %v9934_v7  ;;  %v3778_v7 = vshll.u32 %v11062_v54, 16  ;;  %v3739_v47 = vsel %vm10872_vm15, %v3734_v42, %v3738_v55  ;;  %v9954_v42 = vld [vmem:[%s12394_s13 + $0x178] sm:$0xff]   ;;  %v12446_v58 = vld [vmem:[#allocation6_spill] sm:$0xff]  ;;  %v12450_v55 = vld [vmem:[#allocation9_spill] sm:$0xff] }
 0x7cb   : > { %8978 = vmatprep.subr.bf16.mxu0 %v9935_v32  ;;  %v7508_v43 = vcombine.low %v3739_v47, %v3753_v21  ;;  %v3790_v2 = vrot.slane %v3789_v0, 4  ;;  %v7587_v47 = vld [vmem:[%s10167_s22 + $0x20] sm:$0xff]  ;;  %v7588_v0 = vld [vmem:[%s10167_s22 + $0x30] sm:$0xff] }
 0x7cc   : > { %v3780_v54 = vrot.slane %v3778_v7, 5  ;;  %v11419_v7 = vld [vmem:[%s10167_s22 + $0x82] sm:$0xff]  ;;  %v12453_v33 = vld [vmem:[#allocation11_spill] sm:$0xff] }
 0x7cd   : > { %v3795_v41 = vsel %vm10872_vm15, %v3790_v2, %v3794_v50  ;;  %v4173_v14 = vpack.c.bf16 %v11419_v7, %v12442_v45 }
 0x7ce   : > { %8979 = vmatpush3.bf16.msra.mxu0 %v9935_v32  ;;  %v3802_v32 = vrot.slane %v3800_v18, 5  ;;  %v3781_v13 = vsel %vm10872_vm15, %v3776_v19, %v3780_v54  ;;  %v9953_v19 = vld [vmem:[%s12394_s13 + $0x170] sm:$0xff]   ;;  %v12449_v54 = vld [vmem:[#allocation8_spill] sm:$0xff] }
 0x7cf   : > { %8980 = vmatprep.subr.bf16.mxu0 %v9936_v62  ;;  %v7509_v35 = vcombine.low %v3767_v56, %v3781_v13  ;;  %v12451_v21 = vcombine.low %v12449_v54, %v12450_v55  ;;  %v4484_v56 = vpack.c.bf16 %v7588_v0, %v7587_v47  ;;  %v9978_v54 = vld [vmem:[%s12393_s12 + $0x1d8] sm:$0xff]   ;;  %v5618_v55 = vld [vmem:[%s12397_s16] sm:$0xff] }
 0x7d0   : > { %v5621_v0 = vld [vmem:[%s12397_s16 + $0x18] sm:$0xff] }
 0x7d2   : > { %8981 = vmatpush3.bf16.msra.mxu0 %v9936_v62  ;;  %v3803_v62 = vor.u32 %v3802_v32, %v3799_v53  ;;  %v9951_v32 = vld [vmem:[%s12394_s13 + $0x160] sm:$0xff]  }
 0x7d3   : > { %8982 = vmatprep.subr.bf16.mxu0 %v9937_v57 }
 0x7d6   : > { %8983 = vmatpush3.bf16.msra.mxu0 %v9937_v57  ;;  %v3804_v57 = vrot.slane %v3803_v62, 4 }
 0x7d7   : > { %8984 = vmatprep.subr.bf16.mxu0 %v9938_v12 }
 0x7d8   : > { %v3809_v51 = vsel %vm10872_vm15, %v3804_v57, %v3808_v24  ;;  %v9959_v24 = vld [vmem:[%s12393_s12 + $0x1a0] sm:$0xff]  }
 0x7d9   : > { %v7510_v18 = vcombine.low %v3795_v41, %v3809_v51  ;;  %v9960_v41 = vld [vmem:[%s12393_s12 + $0x1a8] sm:$0xff]  }
 0x7da   : > { %8985 = vmatpush3.bf16.msra.mxu0 %v9938_v12  ;;  %v4172_v12 = vpack.c.bf16 %v11070_v5, %v11043_v17  ;;  %v9950_v17 = vld [vmem:[%s12394_s13 + $0x158] sm:$0xff]  }
 0x7db   : > { %8994 = vmatprep.subr.bf16.mxu0 %v9939_v28  ;;  %v12443_v5 = vld [vmem:[#allocation4_spill] sm:$0xff] }
 0x7dc   : > { %v12445_v53 = vcombine.low %v12443_v5, %v12444_v31  ;;  %v9968_v5 = vld [vmem:[%s12394_s13 + $0x1a0] sm:$0xff]   ;;  %v9970_v31 = vld [vmem:[%s12394_s13 + $0x1b0] sm:$0xff]  }
 0x7dd   : > { %8987 = vmatmul.mubr.bf16.vlgmr.msra.gmra.mrb[16].mxu0 %v7508_v43 }
 0x7de   : > { %8990 = vmatprep.mubr.bf16.mxu0 %v7509_v35  ;;  %8995 = vmatpush3.bf16.msra.mxu0 %v9939_v28  ;;  %v12447_v28 = vld [vmem:[#allocation7_spill] sm:$0xff]  ;;  %v12452_v35 = vld [vmem:[#allocation10_spill] sm:$0xff] }
 0x7df   : > { %8996 = vmatprep.subr.bf16.mxu0 %v9940_v39  ;;  %v12448_v44 = vcombine.low %v12446_v58, %v12447_v28  ;;  %v12454_v57 = vcombine.low %v12452_v35, %v12453_v33  ;;  %v7648_v58 = vld [vmem:[%s10167_s22 + $0x31] sm:$0xff]  ;;  %v5622_v35 = vld [vmem:[%s12397_s16 + $0x20] sm:$0xff]  ;;  %v5623_v33 = vld [vmem:[%s12397_s16 + $0x28] sm:$0xff] }
 0x7e2   : > { %8997 = vmatpush3.bf16.msra.mxu0 %v9940_v39  ;;  %v9958_v39 = vld [vmem:[%s12393_s12 + $0x198] sm:$0xff]  }
 0x7e3   : > { %8998 = vmatprep.subr.bf16.mxu0 %v9941_v49 }
 0x7e5   : > { %8991 = vmatmul.mubr.bf16.gmra.mrb[20].mxu0 %v7510_v18  ;;  %v9962_v18 = vld [vmem:[%s12393_s12 + $0x1b8] sm:$0xff]  }
 0x7e6   : > { %8999 = vmatpush3.bf16.msra.mxu0 %v9941_v49  ;;  %9010 = vmatprep.mubr.bf16.mxu0 %v4170_v61  ;;  %v9961_v61 = vld [vmem:[%s12393_s12 + $0x1b0] sm:$0xff]  }
 0x7e7   : > { %9000 = vmatprep.subr.bf16.mxu0 %v9942_v6 }
 0x7ea   : > { %9001 = vmatpush3.bf16.msra.mxu0 %v9942_v6  ;;  %v7589_v6 = vld [vmem:[%s10167_s22 + $0x40] sm:$0xff] }
 0x7eb   : > { %9002 = vmatprep.subr.bf16.mxu0 %v9943_v10 }
 0x7ee   : > { %9003 = vmatpush3.bf16.msra.mxu0 %v9943_v10  ;;  %v7590_v10 = vld [vmem:[%s10167_s22 + $0x50] sm:$0xff] }
 0x7ef   : > { %9004 = vmatprep.subr.bf16.mxu0 %v9944_v20 }
 0x7f2   : > { %9005 = vmatpush3.bf16.msra.mxu0 %v9944_v20  ;;  %v9963_v20 = vld [vmem:[%s12394_s13 + $0x180] sm:$0xff]  }
 0x7f3   : > { %9006 = vmatprep.subr.bf16.mxu0 %v9945_v9 }
 0x7f6   : > { %9007 = vmatpush3.bf16.msra.mxu0 %v9945_v9  ;;  %v7591_v9 = vld [vmem:[%s10167_s22 + $0x60] sm:$0xff] }
 0x7f7   : > { %9008 = vmatprep.subr.bf16.mxu0 %v9946_v4 }
 0x7fa   : > { %9009 = vmatpush3.bf16.msra.mxu0 %v9946_v4  ;;  %v7592_v4 = vld [vmem:[%s10167_s22 + $0x70] sm:$0xff] }
 0x7fb   : > { %9018 = vmatprep.subr.bf16.mxu0 %v9947_v48 }
 0x7fd   : > { %9011 = vmatmul.mubr.bf16.vlgmr.msra.gmra.mrb[16].mxu0 %v4171_v23  ;;  %v4486_v23 = vpack.c.bf16 %v7592_v4, %v7591_v9  ;;  %v5626_v9 = vld [vmem:[%s12397_s16 + $0x40] sm:$0xff]  ;;  %v5627_v4 = vld [vmem:[%s12397_s16 + $0x48] sm:$0xff] }
 0x7fe   : > { %9019 = vmatpush3.bf16.msra.mxu0 %v9947_v48  ;;  %9014 = vmatprep.mubr.bf16.mxu0 %v4172_v12  ;;  %v4485_v48 = vpack.c.bf16 %v7590_v10, %v7589_v6  ;;  %v9964_v12 = vld [vmem:[%s12394_s13 + $0x188] sm:$0xff]   ;;  %v4798_v6 = vld [vmem:[#allocation2 + $0x18] sm:$0xf] }
 0x7ff   : > { %9020 = vmatprep.subr.bf16.mxu0 %v9948_v15 }
 0x802   : > { %9021 = vmatpush3.bf16.msra.mxu0 %v9948_v15  ;;  %v7594_v15 = vld [vmem:[%s10167_s22 + $0x90] sm:$0xff] }
 0x803   : > { %9022 = vmatprep.subr.bf16.mxu0 %v9949_v37  ;;  %v4487_v45 = vpack.c.bf16 %v7594_v15, %v11277_v40  ;;  %v9969_v40 = vld [vmem:[%s12394_s13 + $0x1a8] sm:$0xff]   ;;  %v4830_v15 = vshll.u32 %v4798_v6, 16 }
 0x805   : > { %9015 = vmatmul.mubr.bf16.gmra.mrb[20].mxu0 %v4173_v14  ;;  %v9967_v14 = vld [vmem:[%s12394_s13 + $0x198] sm:$0xff]  }
 0x806   : > { %9023 = vmatpush3.bf16.msra.mxu0 %v9949_v37  ;;  %9034 = vmatprep.mubr.bf16.mxu0 %v12445_v53  ;;  %v9965_v37 = vld [vmem:[%s12394_s13 + $0x190] sm:$0xff]   ;;  %v9971_v53 = vld [vmem:[%s12394_s13 + $0x1b8] sm:$0xff]  }
 0x807   : > { %9024 = vmatprep.subr.bf16.mxu0 %v9950_v17 }
 0x80a   : > { %9025 = vmatpush3.bf16.msra.mxu0 %v9950_v17  ;;  %v9966_v17 = vld [vmem:[#allocation2 + $0x10] ss:$8 sps:$4 sm:$0xff]  }
 0x80b   : > { %9026 = vmatprep.subr.bf16.mxu0 %v9951_v32 }
 0x80e   : > { %9027 = vmatpush3.bf16.msra.mxu0 %v9951_v32  ;;  %v9973_v32 = vld [vmem:[%s12393_s12 + $0x1c0] sm:$0xff]  }
 0x80f   : > { %9028 = vmatprep.subr.bf16.mxu0 %v9952_v25 }
 0x812   : > { %9029 = vmatpush3.bf16.msra.mxu0 %v9952_v25  ;;  %v9972_v25 = vld [vmem:[#allocation2 + $0x20] ss:$8 sps:$4 sm:$0xff]  }
 0x813   : > { %9030 = vmatprep.subr.bf16.mxu0 %v9953_v19 }
 0x816   : > { %9031 = vmatpush3.bf16.msra.mxu0 %v9953_v19  ;;  %v9975_v19 = vld [vmem:[%s12393_s12 + $0x1c8] sm:$0xff]  }
 0x817   : > { %9032 = vmatprep.subr.bf16.mxu0 %v9954_v42 }
 0x81a   : > { %9033 = vmatpush3.bf16.msra.mxu0 %v9954_v42  ;;  %v9974_v42 = vld [vmem:[#allocation2 + $0x30] ss:$8 sps:$4 sm:$0xff]  }
 0x81b   : > { %9042 = vmatprep.subr.bf16.mxu0 %v9955_v1 }
 0x81d   : > { %9035 = vmatmul.mubr.bf16.vlgmr.msra.gmra.mrb[16].mxu0 %v12448_v44  ;;  %v11456_v62 = vpop.f32.mrb[52].mxu1  ;;  %v9976_v44 = vld [vmem:[#allocation2 + $0x40] ss:$8 sps:$4 sm:$0xff]  }
 0x81e   : > { %9038 = vmatprep.mubr.bf16.mxu0 %v12451_v21  ;;  %9043 = vmatpush3.bf16.msra.mxu0 %v9955_v1  ;;  %v11461_v13 = vpop.f32.mrb[53].mxu1  ;;  %v9977_v1 = vld [vmem:[%s12393_s12 + $0x1d0] sm:$0xff]   ;;  %v5619_v21 = vld [vmem:[%s12397_s16 + $0x8] sm:$0xff] }
 0x81f   : > { %9044 = vmatprep.subr.bf16.mxu0 %v9956_v46  ;;  %v11465_v27 = vpop.f32.mrb[54].mxu1  ;;  %v9606_v47 = vpack.c.bf16 %v5619_v21, %v5618_v55  ;;  %v12456_v55 = vld [vmem:[#allocation13_spill] sm:$0xff] }
 0x820   : > { %v11467_v43 = vpop.f32.mrb[55].mxu1  ;;  %v4836_v21 = vshll.u32 %v12456_v55, 16 }
 0x821   : > { %9607 = vmatprep.subr.bf16.mxu1 %v9606_v47 }
 0x822   : > { %9045 = vmatpush3.bf16.msra.mxu0 %v9956_v46  ;;  %v7647_v46 = vld [vmem:[%s10167_s22 + $0x21] sm:$0xff]  ;;  %9609 = vmatpush3.bf16.msra.mxu1 %v9606_v47 }
 0x823   : > { %9046 = vmatprep.subr.bf16.mxu0 %v9957_v26  ;;  %v4924_v28 = vpack.c.bf16 %v7648_v58, %v7647_v46 }
 0x825   : > { %9039 = vmatmul.mubr.bf16.gmra.mrb[20].mxu0 %v12454_v57  ;;  %v11475_v2 = vpop.f32.mrb[56].mxu1  ;;  %v9614_v57 = vpack.c.bf16 %v5623_v33, %v5622_v35  ;;  %v4838_v35 = vrot.slane %v4836_v21, 5 }
 0x826   : > { %9047 = vmatpush3.bf16.msra.mxu0 %v9957_v26  ;;  %9058 = vmatprep.mubr.bf16.mxu0 %v4484_v56  ;;  %v11480_v49 = vpop.f32.mrb[57].mxu1  ;;  %v5620_v26 = vld [vmem:[%s12397_s16 + $0x10] sm:$0xff]  ;;  %v9979_v56 = vld [vmem:[%s12393_s12 + $0x1e0] sm:$0xff]  }
 0x827   : > { %9048 = vmatprep.subr.bf16.mxu0 %v9958_v39  ;;  %v11482_v50 = vpop.f32.mrb[58].mxu1 }
 0x828   : > { %v11484_v51 = vpop.f32.mrb[59].mxu1 }
 0x82a   : > { %9049 = vmatpush3.bf16.msra.mxu0 %v9958_v39  ;;  %v9610_v39 = vpack.c.bf16 %v5621_v0, %v5620_v26  ;;  %v7654_v0 = vld [vmem:[%s10167_s22 + $0x91] sm:$0xff] }
 0x82b   : > { %9050 = vmatprep.subr.bf16.mxu0 %v9959_v24  ;;  %v4927_v33 = vpack.c.bf16 %v7654_v0, %v11338_v8  ;;  %v4806_v8 = vld [vmem:[#allocation2 + $0x38] sm:$0xf]  ;;  %v10007_v0 = vld [vmem:[#allocation2 + $0x24] sm:$0x1] }
 0x82c   : > { %9611 = vmatprep.subr.bf16.mxu1 %v9610_v39 }
 0x82d   : > { %9613 = vmatpush3.bf16.msra.mxu1 %v9610_v39 }
 0x82e   : > { %9051 = vmatpush3.bf16.msra.mxu0 %v9959_v24  ;;  %v9980_v24 = vld [vmem:[%s12393_s12 + $0x1e8] sm:$0xff]   ;;  %9615 = vmatprep.subr.bf16.mxu1 %v9614_v57 }
 0x82f   : > { %9052 = vmatprep.subr.bf16.mxu0 %v9960_v41 }
 0x831   : > { %9617 = vmatpush3.bf16.msra.mxu1 %v9614_v57 }
 0x832   : > { %9053 = vmatpush3.bf16.msra.mxu0 %v9960_v41  ;;  %v5624_v41 = vld [vmem:[%s12397_s16 + $0x30] sm:$0xff] }
 0x833   : > { %9054 = vmatprep.subr.bf16.mxu0 %v9961_v61 }
 0x836   : > { %9055 = vmatpush3.bf16.msra.mxu0 %v9961_v61  ;;  %v5625_v61 = vld [vmem:[%s12397_s16 + $0x38] sm:$0xff] }
 0x837   : > { %9056 = vmatprep.subr.bf16.mxu0 %v9962_v18  ;;  %v9618_v10 = vpack.c.bf16 %v5625_v61, %v5624_v41  ;;  %v9986_v41 = vld [vmem:[%s12394_s13 + $0x1d8] sm:$0xff]  }
 0x839   : > { %9619 = vmatprep.subr.bf16.mxu1 %v9618_v10 }
 0x83a   : > { %9057 = vmatpush3.bf16.msra.mxu0 %v9962_v18  ;;  %v4796_v18 = vld [vmem:[#allocation2 + $0x10] sm:$0xf]  ;;  %9621 = vmatpush3.bf16.msra.mxu1 %v9618_v10 }
 0x83b   : > { %9066 = vmatprep.subr.bf16.mxu0 %v9963_v20  ;;  %v4804_v10 = vld [vmem:[#allocation2 + $0x30] sm:$0xf] }
 0x83d   : > { %9059 = vmatmul.mubr.bf16.vlgmr.msra.gmra.mrb[16].mxu0 %v4485_v48  ;;  %v4813_v48 = vshrl.u32 %v4796_v18, 16 }
 0x83e   : > { %9067 = vmatpush3.bf16.msra.mxu0 %v9963_v20  ;;  %9062 = vmatprep.mubr.bf16.mxu0 %v4486_v23  ;;  %v9981_v20 = vld [vmem:[%s12393_s12 + $0x1f0] sm:$0xff]   ;;  %v4816_v23 = vshll.u32 %v4796_v18, 16  ;;  %v4800_v18 = vld [vmem:[#allocation2 + $0x20] sm:$0xf] }
 0x83f   : > { %9068 = vmatprep.subr.bf16.mxu0 %v9964_v12 }
 0x842   : > { %9069 = vmatpush3.bf16.msra.mxu0 %v9964_v12  ;;  %v4827_v12 = vshrl.u32 %v4798_v6, 16  ;;  %v4802_v6 = vld [vmem:[#allocation2 + $0x28] sm:$0xf] }
 0x843   : > { %9070 = vmatprep.subr.bf16.mxu0 %v9965_v37 }
 0x845   : > { %9063 = vmatmul.mubr.bf16.gmra.mrb[20].mxu0 %v4487_v45  ;;  %v9982_v45 = vld [vmem:[%s12393_s12 + $0x1f8] sm:$0xff]  }
 0x846   : > { %9071 = vmatpush3.bf16.msra.mxu0 %v9965_v37  ;;  %9082 = vmatprep.mubr.bf16.mxu0 %v9966_v17  ;;  %v9622_v37 = vpack.c.bf16 %v5627_v4, %v5626_v9  ;;  %v4818_v17 = vrot.slane %v4816_v23, 5  ;;  %v4841_v9 = vshrl.u32 %v4800_v18, 16  ;;  %v4844_v4 = vshll.u32 %v4800_v18, 16 }
 0x847   : > { %9072 = vmatprep.subr.bf16.mxu0 %v9967_v14  ;;  %v4858_v23 = vshll.u32 %v4802_v6, 16 }
 0x848   : > { %9623 = vmatprep.subr.bf16.mxu1 %v9622_v37 }
 0x849   : > { %9625 = vmatpush3.bf16.msra.mxu1 %v9622_v37  ;;  %v4883_v37 = vshrl.u32 %v4806_v8, 16 }
 0x84a   : > { %9073 = vmatpush3.bf16.msra.mxu0 %v9967_v14  ;;  %v4815_v14 = vrot.slane %v4813_v48, 4  ;;  %v4855_v48 = vshrl.u32 %v4802_v6, 16 }
 0x84b   : > { %9074 = vmatprep.subr.bf16.mxu0 %v9968_v5 }
 0x84e   : > { %9075 = vmatpush3.bf16.msra.mxu0 %v9968_v5  ;;  %v4829_v5 = vrot.slane %v4827_v12, 4  ;;  %v4869_v12 = vshrl.u32 %v4804_v10, 16 }
 0x84f   : > { %9076 = vmatprep.subr.bf16.mxu0 %v9969_v40 }
 0x852   : > { %9077 = vmatpush3.bf16.msra.mxu0 %v9969_v40  ;;  %v4832_v40 = vrot.slane %v4830_v15, 5  ;;  %v4872_v15 = vshll.u32 %v4804_v10, 16 }
 0x853   : > { %9078 = vmatprep.subr.bf16.mxu0 %v9970_v31 }
 0x854   : > { %v4833_v46 = vor.u32 %v4832_v40, %v4829_v5  ;;  %v4846_v5 = vrot.slane %v4844_v4, 5  ;;  %v4857_v40 = vrot.slane %v4855_v48, 4 }
 0x856   : > { %9079 = vmatpush3.bf16.msra.mxu0 %v9970_v31  ;;  %v7649_v31 = vld [vmem:[%s10167_s22 + $0x41] sm:$0xff]  ;;  %v4834_v47 = vrot.slane %v4833_v46, 4  ;;  %v9989_v46 = vld [vmem:[%s12394_s13 + $0x1f0] sm:$0xff]  }
 0x857   : > { %9080 = vmatprep.subr.bf16.mxu0 %v9971_v53 }
 0x85a   : > { %9081 = vmatpush3.bf16.msra.mxu0 %v9971_v53  ;;  %v7650_v53 = vld [vmem:[%s10167_s22 + $0x51] sm:$0xff] }
 0x85b   : > { %9090 = vmatprep.subr.bf16.mxu0 %v9973_v32 }
 0x85d   : > { %9083 = vmatmul.mubr.bf16.vlgmr.msra.gmra.mrb[16].mxu0 %v9972_v25  ;;  %v7651_v25 = vld [vmem:[%s10167_s22 + $0x61] sm:$0xff] }
 0x85e   : > { %9086 = vmatprep.mubr.bf16.mxu0 %v9974_v42  ;;  %9091 = vmatpush3.bf16.msra.mxu0 %v9973_v32  ;;  %v9983_v32 = vld [vmem:[%s12394_s13 + $0x1c0] sm:$0xff]   ;;  %v4925_v42 = vpack.c.bf16 %v7650_v53, %v7649_v31  ;;  %v4860_v31 = vrot.slane %v4858_v23, 5  ;;  %v4810_v53 = vld [vmem:[#allocation2 + $0x48] sm:$0xf] }
 0x85f   : > { %9092 = vmatprep.subr.bf16.mxu0 %v9975_v19 }
 0x862   : > { %9093 = vmatpush3.bf16.msra.mxu0 %v9975_v19  ;;  %v7652_v19 = vld [vmem:[%s10167_s22 + $0x71] sm:$0xff] }
 0x863   : > { %9094 = vmatprep.subr.bf16.mxu0 %v9977_v1  ;;  %v4926_v58 = vpack.c.bf16 %v7652_v19, %v7651_v25  ;;  %v4874_v25 = vrot.slane %v4872_v15, 5  ;;  %v4885_v19 = vrot.slane %v4883_v37, 4  ;;  %v9991_v15 = vld [vmem:[%s12393_s12 + $0x200] sm:$0xff]  }
 0x865   : > { %9087 = vmatmul.mubr.bf16.gmra.mrb[20].mxu0 %v9976_v44  ;;  %v12455_v44 = vld [vmem:[#allocation12_spill] sm:$0xff] }
 0x866   : > { %9095 = vmatpush3.bf16.msra.mxu0 %v9977_v1  ;;  %9106 = vmatprep.mubr.bf16.mxu0 %v4924_v28  ;;  %v4819_v1 = vor.u32 %v4818_v17, %v4815_v14  ;;  %v9984_v28 = vld [vmem:[%s12394_s13 + $0x1c8] sm:$0xff]   ;;  %v4843_v17 = vrot.slane %v4841_v9, 4 }
 0x867   : > { %9096 = vmatprep.subr.bf16.mxu0 %v9978_v54  ;;  %v9988_v14 = vld [vmem:[%s12394_s13 + $0x1e8] sm:$0xff]  }
 0x868   : > { %v4820_v26 = vrot.slane %v4819_v1, 4  ;;  %v4808_v1 = vld [vmem:[#allocation2 + $0x40] sm:$0xf] }
 0x869   : > { %v4897_v55 = vshrl.u32 %v4808_v1, 16  ;;  %v4900_v21 = vshll.u32 %v4808_v1, 16 }
 0x86a   : > { %9097 = vmatpush3.bf16.msra.mxu0 %v9978_v54  ;;  %v4822_v54 = vshll.u32 %v12455_v44, 16  ;;  %v4847_v44 = vor.u32 %v4846_v5, %v4843_v17 }
 0x86b   : > { %9098 = vmatprep.subr.bf16.mxu0 %v9979_v56  ;;  %v4902_v9 = vrot.slane %v4900_v21, 5  ;;  %v9993_v21 = vld [vmem:[%s12393_s12 + $0x210] sm:$0xff]  }
 0x86c   : > { %v4824_v39 = vrot.slane %v4822_v54, 5  ;;  %v4861_v54 = vor.u32 %v4860_v31, %v4857_v40  ;;  %v4848_v10 = vrot.slane %v4847_v44, 4  ;;  %v10011_v31 = vld [vmem:[#allocation2 + $0x4c] sm:$0x1] }
 0x86e   : > { %9099 = vmatpush3.bf16.msra.mxu0 %v9979_v56  ;;  %v9985_v56 = vld [vmem:[%s12394_s13 + $0x1d0] sm:$0xff]   ;;  %v4825_v57 = vsel %vm10872_vm15, %v4820_v26, %v4824_v39  ;;  %v10008_v39 = vld [vmem:[#allocation2 + $0x2c] sm:$0x1] }
 0x86f   : > { %9100 = vmatprep.subr.bf16.mxu0 %v9980_v24 }
 0x872   : > { %9101 = vmatpush3.bf16.msra.mxu0 %v9980_v24  ;;  %v4839_v24 = vsel %vm10872_vm15, %v4834_v47, %v4838_v35  ;;  %v4864_v35 = vshll.u32 %v10008_v39, 16 }
 0x873   : > { %9102 = vmatprep.subr.bf16.mxu0 %v9981_v20  ;;  %v7695_v61 = vcombine.low %v4825_v57, %v4839_v24  ;;  %v10009_v57 = vld [vmem:[#allocation2 + $0x34] sm:$0x1] }
 0x874   : > { %v4878_v24 = vshll.u32 %v10009_v57, 16  ;;  %v9996_v57 = vld [vmem:[%s12393_s12 + $0x228] sm:$0xff]  }
 0x876   : > { %9103 = vmatpush3.bf16.msra.mxu0 %v9981_v20  ;;  %v9987_v20 = vld [vmem:[%s12394_s13 + $0x1e0] sm:$0xff]   ;;  %v4880_v37 = vrot.slane %v4878_v24, 5  ;;  %v9997_v24 = vld [vmem:[%s12393_s12 + $0x230] sm:$0xff]  }
 0x877   : > { %9104 = vmatprep.subr.bf16.mxu0 %v9982_v45 }
 0x87a   : > { %9105 = vmatpush3.bf16.msra.mxu0 %v9982_v45  ;;  %v4886_v45 = vshll.u32 %v4806_v8, 16  ;;  %v4862_v8 = vrot.slane %v4861_v54, 4 }
 0x87b   : > { %9114 = vmatprep.subr.bf16.mxu0 %v9983_v32 }
 0x87d   : > { %9107 = vmatmul.mubr.bf16.vlgmr.msra.gmra.mrb[16].mxu0 %v4925_v42  ;;  %v4888_v42 = vrot.slane %v4886_v45, 5 }
 0x87e   : > { %9115 = vmatpush3.bf16.msra.mxu0 %v9983_v32  ;;  %9110 = vmatprep.mubr.bf16.mxu0 %v4926_v58  ;;  %v4871_v32 = vrot.slane %v4869_v12, 4  ;;  %v4911_v58 = vshrl.u32 %v4810_v53, 16  ;;  %v4866_v12 = vrot.slane %v4864_v35, 5 }
 0x87f   : > { %9116 = vmatprep.subr.bf16.mxu0 %v9984_v28  ;;  %v4889_v47 = vor.u32 %v4888_v42, %v4885_v19  ;;  %v10012_v19 = vld [vmem:[#allocation2 + $0x44] sm:$0x1] }
 0x880   : > { %v4875_v26 = vor.u32 %v4874_v25, %v4871_v32  ;;  %v4913_v18 = vrot.slane %v4911_v58, 4  ;;  %v4867_v5 = vsel %vm10872_vm15, %v4862_v8, %v4866_v12  ;;  %v4906_v42 = vshll.u32 %v10012_v19, 16  ;;  %v7712_v8 = vld [vmem:[%s10167_s22 + $0x72] sm:$0xff] }
 0x881   : > { %v4890_v48 = vrot.slane %v4889_v47, 4  ;;  %v7708_v47 = vld [vmem:[%s10167_s22 + $0x32] sm:$0xff] }
 0x882   : > { %9117 = vmatpush3.bf16.msra.mxu0 %v9984_v28  ;;  %v4914_v28 = vshll.u32 %v4810_v53, 16  ;;  %v4876_v4 = vrot.slane %v4875_v26, 4  ;;  %v4920_v53 = vshll.u32 %v10011_v31, 16  ;;  %v7707_v26 = vld [vmem:[%s10167_s22 + $0x22] sm:$0xff] }
 0x883   : > { %9118 = vmatprep.subr.bf16.mxu0 %v9985_v56  ;;  %v5284_v39 = vpack.c.bf16 %v7708_v47, %v7707_v26 }
 0x884   : > { %v4916_v6 = vrot.slane %v4914_v28, 5  ;;  %v4881_v32 = vsel %vm10872_vm15, %v4876_v4, %v4880_v37  ;;  %v4922_v54 = vrot.slane %v4920_v53, 5  ;;  %v10000_v4 = vld [vmem:[%s12394_s13 + $0x208] sm:$0xff]   ;;  %v10003_v37 = vld [vmem:[%s12394_s13 + $0x220] sm:$0xff]  }
 0x885   : > { %9111 = vmatmul.mubr.bf16.gmra.mrb[20].mxu0 %v4927_v33  ;;  %v9990_v33 = vld [vmem:[%s12394_s13 + $0x1f8] sm:$0xff]  }
 0x886   : > { %9119 = vmatpush3.bf16.msra.mxu0 %v9985_v56  ;;  %9130 = vmatprep.mubr.bf16.mxu0 %v7695_v61  ;;  %v4850_v56 = vshll.u32 %v10007_v0, 16 }
 0x887   : > { %9120 = vmatprep.subr.bf16.mxu0 %v9986_v41 }
 0x888   : > { %v4852_v23 = vrot.slane %v4850_v56, 5 }
 0x88a   : > { %9121 = vmatpush3.bf16.msra.mxu0 %v9986_v41  ;;  %v10010_v41 = vld [vmem:[#allocation2 + $0x3c] sm:$0x1]  ;;  %v4853_v17 = vsel %vm10872_vm15, %v4848_v10, %v4852_v23  ;;  %v7711_v10 = vld [vmem:[%s10167_s22 + $0x62] sm:$0xff]  ;;  %v10001_v23 = vld [vmem:[%s12394_s13 + $0x210] sm:$0xff]  }
 0x88b   : > { %9122 = vmatprep.subr.bf16.mxu0 %v9987_v20  ;;  %v4892_v61 = vshll.u32 %v10010_v41, 16  ;;  %v7696_v1 = vcombine.low %v4853_v17, %v4867_v5  ;;  %v9998_v41 = vld [vmem:[%s12393_s12 + $0x238] sm:$0xff]  }
 0x88d   : > { %v4894_v45 = vrot.slane %v4892_v61, 5  ;;  %v7709_v61 = vld [vmem:[%s10167_s22 + $0x42] sm:$0xff] }
 0x88e   : > { %9123 = vmatpush3.bf16.msra.mxu0 %v9987_v20  ;;  %v4899_v20 = vrot.slane %v4897_v55, 4  ;;  %v4908_v55 = vrot.slane %v4906_v42, 5 }
 0x88f   : > { %9124 = vmatprep.subr.bf16.mxu0 %v9988_v14  ;;  %v4895_v25 = vsel %vm10872_vm15, %v4890_v48, %v4894_v45  ;;  %v7714_v48 = vld [vmem:[%s10167_s22 + $0x92] sm:$0xff] }
 0x890   : > { %v4903_v40 = vor.u32 %v4902_v9, %v4899_v20  ;;  %v7697_v58 = vcombine.low %v4881_v32, %v4895_v25  ;;  %v5286_v9 = vpack.c.bf16 %v7712_v8, %v7711_v10  ;;  %v5287_v12 = vpack.c.bf16 %v7714_v48, %v11419_v7  ;;  %v10004_v7 = vld [vmem:[%s12394_s13 + $0x228] sm:$0xff]   ;;  %v10005_v45 = vld [vmem:[%s12394_s13 + $0x230] sm:$0xff]   ;;  %v7776_v25 = vld [vmem:[%s12396_s15] ss:$0 sm:$0xff] }
 0x891   : > { %v7777_v8 = vld [vmem:[%s12398_s17] ss:$0 sm:$0xff] }
 0x892   : > { %9125 = vmatpush3.bf16.msra.mxu0 %v9988_v14  ;;  %v4917_v14 = vor.u32 %v4916_v6, %v4913_v18  ;;  %v4904_v28 = vrot.slane %v4903_v40, 4  ;;  %v7710_v18 = vld [vmem:[%s10167_s22 + $0x52] sm:$0xff]  ;;  %v9999_v6 = vld [vmem:[%s12394_s13 + $0x200] sm:$0xff]  }
 0x893   : > { %9126 = vmatprep.subr.bf16.mxu0 %v9989_v46  ;;  %v5285_v20 = vpack.c.bf16 %v7710_v18, %v7709_v61 }
 0x894   : > { %v4918_v44 = vrot.slane %v4917_v14, 4  ;;  %v4909_v0 = vsel %vm10872_vm15, %v4904_v28, %v4908_v55 }
 0x896   : > { %9127 = vmatpush3.bf16.msra.mxu0 %v9989_v46  ;;  %v9992_v46 = vld [vmem:[%s12393_s12 + $0x208] sm:$0xff]   ;;  %v4923_v56 = vsel %vm10872_vm15, %v4918_v44, %v4922_v54 }
 0x897   : > { %9128 = vmatprep.subr.bf16.mxu0 %v9990_v33  ;;  %v7698_v35 = vcombine.low %v4909_v0, %v4923_v56 }
 0x89a   : > { %9129 = vmatpush3.bf16.msra.mxu0 %v9990_v33  ;;  %v9994_v33 = vld [vmem:[%s12393_s12 + $0x218] sm:$0xff]  }
 0x89b   : > { %9138 = vmatprep.subr.bf16.mxu0 %v9991_v15 }
 0x89d   : > { %9131 = vmatmul.mubr.bf16.vlgmr.msra.gmra.mrb[16].mxu0 %v7696_v1 }
 0x89e   : > { %9134 = vmatprep.mubr.bf16.mxu0 %v7697_v58  ;;  %9139 = vmatpush3.bf16.msra.mxu0 %v9991_v15  ;;  %v10002_v15 = vld [vmem:[%s12394_s13 + $0x218] sm:$0xff]  }
 0x89f   : > { %9140 = vmatprep.subr.bf16.mxu0 %v9992_v46 }
 0x8a2   : > { %9141 = vmatpush3.bf16.msra.mxu0 %v9992_v46 }
 0x8a3   : > { %9142 = vmatprep.subr.bf16.mxu0 %v9993_v21 }
 0x8a5   : > { %9135 = vmatmul.mubr.bf16.gmra.mrb[20].mxu0 %v7698_v35 }
 0x8a6   : > { %9143 = vmatpush3.bf16.msra.mxu0 %v9993_v21  ;;  %9154 = vmatprep.mubr.bf16.mxu0 %v5284_v39 }
 0x8a7   : > { %9144 = vmatprep.subr.bf16.mxu0 %v9994_v33 }
 0x8aa   : > { %9145 = vmatpush3.bf16.msra.mxu0 %v9994_v33 }
 0x8ab   : > { %9146 = vmatprep.subr.bf16.mxu0 %v9995_v59 }
 0x8ae   : > { %9147 = vmatpush3.bf16.msra.mxu0 %v9995_v59 }
 0x8af   : > { %9148 = vmatprep.subr.bf16.mxu0 %v9996_v57 }
 0x8b2   : > { %9149 = vmatpush3.bf16.msra.mxu0 %v9996_v57 }
 0x8b3   : > { %9150 = vmatprep.subr.bf16.mxu0 %v9997_v24 }
 0x8b6   : > { %9151 = vmatpush3.bf16.msra.mxu0 %v9997_v24 }
 0x8b7   : > { %9152 = vmatprep.subr.bf16.mxu0 %v9998_v41 }
 0x8ba   : > { %9153 = vmatpush3.bf16.msra.mxu0 %v9998_v41 }
 0x8bb   : > { %9162 = vmatprep.subr.bf16.mxu0 %v9999_v6 }
 0x8bd   : > { %9155 = vmatmul.mubr.bf16.vlgmr.msra.gmra.mrb[16].mxu0 %v5285_v20 }
 0x8be   : > { %9163 = vmatpush3.bf16.msra.mxu0 %v9999_v6  ;;  %9158 = vmatprep.mubr.bf16.mxu0 %v5286_v9 }
 0x8bf   : > { %9164 = vmatprep.subr.bf16.mxu0 %v10000_v4 }
 0x8c2   : > { %9165 = vmatpush3.bf16.msra.mxu0 %v10000_v4 }
 0x8c3   : > { %9166 = vmatprep.subr.bf16.mxu0 %v10001_v23 }
 0x8c5   : > { %9159 = vmatmul.mubr.bf16.gmra.mrb[20].mxu0 %v5287_v12 }
 0x8c6   : > { %9167 = vmatpush3.bf16.msra.mxu0 %v10001_v23  ;;  %9178 = vmatprep.mubr.bf16.mxu0 %v7763_v52  ;;  %v5629_v52 = vld [vmem:[%s12397_s16 + $0x58] sm:$0xff] }
 0x8c7   : > { %9168 = vmatprep.subr.bf16.mxu0 %v10002_v15  ;;  %v9626_v14 = vpack.c.bf16 %v5629_v52, %v5628_v29 }
 0x8c9   : > { %9627 = vmatprep.subr.bf16.mxu1 %v9626_v14 }
 0x8ca   : > { %9169 = vmatpush3.bf16.msra.mxu0 %v10002_v15  ;;  %9629 = vmatpush3.bf16.msra.mxu1 %v9626_v14 }
 0x8cb   : > { %9170 = vmatprep.subr.bf16.mxu0 %v10003_v37  ;;  %9631 = vmatprep.subr.bf16.mxu1 %v9630_v11 }
 0x8ce   : > { %9171 = vmatpush3.bf16.msra.mxu0 %v10003_v37  ;;  %9633 = vmatpush3.bf16.msra.mxu1 %v9630_v11 }
 0x8cf   : > { %9172 = vmatprep.subr.bf16.mxu0 %v10004_v7 }
 0x8d2   : > { %9173 = vmatpush3.bf16.msra.mxu0 %v10004_v7 }
 0x8d3   : > { %9174 = vmatprep.subr.bf16.mxu0 %v10005_v45 }
 0x8d6   : > { %9175 = vmatpush3.bf16.msra.mxu0 %v10005_v45 }
 0x8d7   : > { %9176 = vmatprep.subr.bf16.mxu0 %v10006_v3 }
 0x8da   : > { %9177 = vmatpush3.bf16.msra.mxu0 %v10006_v3 }
 0x8dd   : > { %9179 = vmatmul.mubr.bf16.vlgmr.msra.gmra.mrb[16].mxu0 %v7764_v36  ;;  %v5632_v36 = vld [vmem:[%s12397_s16 + $0x70] sm:$0xff] }
 0x8de   : > { %9182 = vmatprep.mubr.bf16.mxu0 %v7765_v16  ;;  %v9634_v30 = vpack.c.bf16 %v5633_v60, %v5632_v36 }
 0x8e0   : > { %9635 = vmatprep.subr.bf16.mxu1 %v9634_v30 }
 0x8e1   : > { %9637 = vmatpush3.bf16.msra.mxu1 %v9634_v30 }
 0x8e5   : > { %9183 = vmatmul.mubr.bf16.gmra.mrb[20].mxu0 %v7766_v63 }
 0x9b0   : > { %v9180_v16 = vpop.f32.mrb[16].mxu0 }
 0x9b1   : > { %v9654_v63 = vadd.f32 %v9180_v16, %v11456_v62  ;;  %v5541_v17 = vpop.f32.mrb[17].mxu0  ;;  %v5747_v16 = vld [vmem:[%s12399_s18 + $0x8] sm:$0xff] }
 0x9b2   : > { %v9655_v5 = vadd.f32 %v5541_v17, %v11461_v13  ;;  %v9181_v40 = vpop.f32.mrb[18].mxu0  ;;  %v5750_v17 = vld [vmem:[%s12399_s18 + $0x20] sm:$0xff] }
 0x9b3   : > { %v5589_v31 = vmul.f32 %v9654_v63, %v7775_v38  ;;  %v9656_v53 = vadd.f32 %v9181_v40, %v11465_v27  ;;  %v5544_v32 = vpop.f32.mrb[19].mxu0  ;;  %v5749_v63 = vld [vmem:[%s12399_s18 + $0x18] sm:$0xff]  ;;  %v5752_v40 = vld [vmem:[%s12399_s18 + $0x30] sm:$0xff] }
 0x9b4   : > { %v5587_v19 = vmul.f32 %v9655_v5, %v7775_v38  ;;  %v9657_v42 = vadd.f32 %v5544_v32, %v11467_v43  ;;  %v5751_v5 = vld [vmem:[%s12399_s18 + $0x28] sm:$0xff] }
 0x9b5   : > { %v5590_v1 = vmul.f32 %v9656_v53, %v7775_v38  ;;  %v5604_v28 = vadd.f32 %v7776_v25, %v5589_v31  ;;  %v5753_v31 = vld [vmem:[%s12399_s18 + $0x38] sm:$0xff]  ;;  %v5754_v53 = vld [vmem:[%s12399_s18 + $0x40] sm:$0xff]  ;;  %v5755_v32 = vld [vmem:[%s12399_s18 + $0x48] sm:$0xff] }
 0x9b6   : > { %v5588_v46 = vmul.f32 %v9657_v42, %v7775_v38  ;;  %v5602_v58 = vadd.f32 %v7776_v25, %v5587_v19  ;;  %v5757_v19 = vld [vmem:[%s12399_s18 + $0x58] sm:$0xff]  ;;  %v5758_v42 = vld [vmem:[%s12399_s18 + $0x60] sm:$0xff] }
 0x9b7   : > { %v5605_v47 = vadd.f32 %v7776_v25, %v5590_v1  ;;  %v5612_v39 = vmax.f32 %v5604_v28, 0.0  ;;  %v5759_v1 = vld [vmem:[%s12399_s18 + $0x68] sm:$0xff]  ;;  %v5762_v28 = vld [vmem:[%s12399_s18 + $0x80] sm:$0xff] }
 0x9b8   : > { %v5603_v62 = vadd.f32 %v7776_v25, %v5588_v46  ;;  %v9184_v44 = vpop.f32.mrb[20].mxu0  ;;  %v5610_v54 = vmax.f32 %v5602_v58, 0.0  ;;  %v5760_v46 = vld [vmem:[%s12399_s18 + $0x70] sm:$0xff]  ;;  %v5761_v58 = vld [vmem:[%s12399_s18 + $0x78] sm:$0xff] }
 0x9b9   : > { %v9658_v13 = vadd.f32 %v9184_v44, %v11475_v2  ;;  %v5557_v55 = vpop.f32.mrb[21].mxu0  ;;  %v5613_v2 = vmax.f32 %v5605_v47, 0.0  ;;  %v5764_v44 = vld [vmem:[%s12399_s18 + $0x90] sm:$0xff]  ;;  %v5771_v47 = vld [vmem:[%s12399_s18 + $0xc8] sm:$0xff] }
 0x9ba   : > { %v5611_v21 = vmax.f32 %v5603_v62, 0.0  ;;  %v9659_v27 = vadd.f32 %v5557_v55, %v11480_v49  ;;  %v9185_v26 = vpop.f32.mrb[22].mxu0  ;;  %9218 = vmatprep.mubr.f32.mxu1 %v5610_v54  ;;  %v5763_v62 = vld [vmem:[%s12399_s18 + $0x88] sm:$0xff]  ;;  %v5765_v54 = vld [vmem:[%s12399_s18 + $0x98] sm:$0xff] }
 0x9bb   : > { %v5593_v0 = vmul.f32 %v9658_v13, %v7775_v38  ;;  %v9660_v56 = vadd.f32 %v9185_v26, %v11482_v50  ;;  %v5560_v43 = vpop.f32.mrb[23].mxu0  ;;  %v5766_v13 = vld [vmem:[%s12399_s18 + $0xa0] sm:$0xff]  ;;  %v5767_v55 = vld [vmem:[%s12399_s18 + $0xa8] sm:$0xff] }
 0x9bc   : > { %v5591_v35 = vmul.f32 %v9659_v27, %v7775_v38  ;;  %v9661_v33 = vadd.f32 %v5560_v43, %v11484_v51  ;;  %9219 = vmatmul.mubr.f32.vlgmr.msra.gmra.mrb[50].mxu1 %v5611_v21  ;;  %v5746_v51 = vld [vmem:[%s12399_s18] sm:$0xff]  ;;  %v5768_v21 = vld [vmem:[%s12399_s18 + $0xb0] sm:$0xff]  ;;  %v5769_v27 = vld [vmem:[%s12399_s18 + $0xb8] sm:$0xff] }
 0x9bd   : > { %9221 = vmatprep.mubr.f32.mxu1 %v5612_v39  ;;  %v5594_v59 = vmul.f32 %v9660_v56, %v7775_v38  ;;  %v5608_v41 = vadd.f32 %v7776_v25, %v5593_v0  ;;  %v5770_v26 = vld [vmem:[%s12399_s18 + $0xc0] sm:$0xff]  ;;  %v5772_v0 = vld [vmem:[%s12399_s18 + $0xd0] sm:$0xff]  ;;  %v5773_v56 = vld [vmem:[%s12399_s18 + $0xd8] sm:$0xff] }
 0x9be   : > { %v5592_v57 = vmul.f32 %v9661_v33, %v7775_v38  ;;  %v5606_v24 = vadd.f32 %v7776_v25, %v5591_v35  ;;  %v5748_v38 = vld [vmem:[%s12399_s18 + $0x10] sm:$0xff]  ;;  %v5774_v43 = vld [vmem:[%s12399_s18 + $0xe0] sm:$0xff]  ;;  %v5775_v39 = vld [vmem:[%s12399_s18 + $0xe8] sm:$0xff] }
 0x9bf   : > { %v5609_v6 = vadd.f32 %v7776_v25, %v5594_v59  ;;  %v5616_v10 = vmax.f32 %v5608_v41, 0.0  ;;  %v5776_v35 = vld [vmem:[%s12399_s18 + $0xf0] sm:$0xff]  ;;  %v5777_v33 = vld [vmem:[%s12399_s18 + $0xf8] sm:$0xff]  ;;  %v5778_v59 = vld [vmem:[%s12399_s18 + $0x100] sm:$0xff] }
 0x9c0   : > { %9222 = vmatmul.mubr.f32.gmra.mrb[60].mxu1 %v5613_v2  ;;  %v5614_v49 = vmax.f32 %v5606_v24, 0.0  ;;  %v5607_v61 = vadd.f32 %v7776_v25, %v5592_v57  ;;  %v5756_v25 = vld [vmem:[%s12399_s18 + $0x50] sm:$0xff]  ;;  %v5779_v57 = vld [vmem:[%s12399_s18 + $0x108] sm:$0xff]  ;;  %v5781_v24 = vld [vmem:[%s12399_s18 + $0x118] sm:$0xff] }
 0x9c1   : > { %v5617_v50 = vmax.f32 %v5609_v6, 0.0  ;;  %v5780_v2 = vld [vmem:[%s12399_s18 + $0x110] sm:$0xff]  ;;  %v5782_v41 = vld [vmem:[%s12399_s18 + $0x120] sm:$0xff] }
 0x9c2   : > { %9224 = vmatprep.mubr.f32.mxu1 %v5614_v49  ;;  %v5615_v18 = vmax.f32 %v5607_v61, 0.0  ;;  %v5783_v49 = vld [vmem:[%s12399_s18 + $0x128] sm:$0xff]  ;;  %v5784_v61 = vld [vmem:[%s12399_s18 + $0x130] sm:$0xff]  ;;  %v5786_v6 = vld [vmem:[%s12399_s18 + $0x140] sm:$0xff] }
 0x9c4   : > { %9225 = vmatmul.mubr.f32.gmra.mrb[62].mxu1 %v5615_v18  ;;  %v5785_v18 = vld [vmem:[%s12399_s18 + $0x138] sm:$0xff] }
 0x9c5   : > { %9227 = vmatprep.mubr.f32.mxu1 %v5616_v10  ;;  %v5787_v10 = vld [vmem:[%s12399_s18 + $0x148] sm:$0xff] }
 0x9c8   : > { %9228 = vmatmul.mubr.f32.gmra.mrb[64].mxu1 %v5617_v50  ;;  %v5788_v50 = vld [vmem:[%s12399_s18 + $0x150] sm:$0xff] }
 0x9c9   : > { %9246 = vmatprep.mubr.msk.f32.mxu1 %vm614_vm1, %v5746_v51  ;;  %v5789_v51 = vld [vmem:[%s12399_s18 + $0x158] sm:$0xff] }
 0xa8f   : > { %v9220_v20 = vpop.f32.mrb[50].mxu1 }
 0xa90   : > { %v5713_v9 = vadd.f32 %v9220_v20, %v7777_v8  ;;  %v5707_v4 = vpop.f32.mrb[51].mxu1  ;;  %v5791_v20 = vld [vmem:[%s12399_s18 + $0x168] sm:$0xff] }
 0xa91   : > { %v5708_v48 = vadd.f32 %v7777_v8, %v5707_v4  ;;  %v5793_v4 = vld [vmem:[%s12399_s18 + $0x178] sm:$0xff] }
 0xa93   : > { %v9638_v23 = vpack.c.bf16 %v5713_v9, %v5708_v48  ;;  %v9223_v12 = vpop.f32.mrb[60].mxu1  ;;  %v5792_v9 = vld [vmem:[%s12399_s18 + $0x170] sm:$0xff]  ;;  %v5794_v48 = vld [vmem:[%s12399_s18 + $0x180] sm:$0xff] }
 0xa94   : > { %v5723_v15 = vadd.f32 %v9223_v12, %v7777_v8  ;;  %v5717_v37 = vpop.f32.mrb[61].mxu1  ;;  %v5796_v12 = vld [vmem:[%s12399_s18 + $0x190] sm:$0xff] }
 0xa95   : > { %v5718_v7 = vadd.f32 %v7777_v8, %v5717_v37  ;;  %9639 = vmatprep.subr.bf16.mxu1 %v9638_v23  ;;  %v5798_v37 = vld [vmem:[%s12399_s18 + $0x1a0] sm:$0xff] }
 0xa96   : > { %9641 = vmatpush3.bf16.msra.mxu1 %v9638_v23  ;;  %v5795_v23 = vld [vmem:[%s12399_s18 + $0x188] sm:$0xff] }
 0xa97   : > { %v9642_v45 = vpack.c.bf16 %v5723_v15, %v5718_v7  ;;  %v9226_v3 = vpop.f32.mrb[62].mxu1  ;;  %v5797_v15 = vld [vmem:[%s12399_s18 + $0x198] sm:$0xff]  ;;  %v5799_v7 = vld [vmem:[%s12399_s18 + $0x1a8] sm:$0xff] }
 0xa98   : > { %v5733_v29 = vadd.f32 %v9226_v3, %v7777_v8  ;;  %v5727_v52 = vpop.f32.mrb[63].mxu1  ;;  %v5801_v3 = vld [vmem:[%s12399_s18 + $0x1b8] sm:$0xff] }
 0xa99   : > { %v5728_v14 = vadd.f32 %v7777_v8, %v5727_v52  ;;  %9643 = vmatprep.subr.bf16.mxu1 %v9642_v45  ;;  %v5803_v52 = vld [vmem:[%s12399_s18 + $0x1c8] sm:$0xff] }
 0xa9a   : > { %9645 = vmatpush3.bf16.msra.mxu1 %v9642_v45  ;;  %v5800_v45 = vld [vmem:[%s12399_s18 + $0x1b0] sm:$0xff] }
 0xa9b   : > { %v9646_v34 = vpack.c.bf16 %v5733_v29, %v5728_v14  ;;  %v9229_v22 = vpop.f32.mrb[64].mxu1  ;;  %v5802_v29 = vld [vmem:[%s12399_s18 + $0x1c0] sm:$0xff]  ;;  %v5804_v14 = vld [vmem:[%s12399_s18 + $0x1d0] sm:$0xff] }
 0xa9c   : > { %v5743_v11 = vadd.f32 %v9229_v22, %v7777_v8  ;;  %v5737_v36 = vpop.f32.mrb[65].mxu1  ;;  %v5806_v22 = vld [vmem:[%s12399_s18 + $0x1e0] sm:$0xff] }
 0xa9d   : > { %v5738_v60 = vadd.f32 %v7777_v8, %v5737_v36  ;;  %9647 = vmatprep.subr.bf16.mxu1 %v9646_v34  ;;  %v5790_v8 = vld [vmem:[%s12399_s18 + $0x160] sm:$0xff]  ;;  %v5808_v36 = vld [vmem:[%s12399_s18 + $0x1f0] sm:$0xff] }
 0xa9e   : > { %9649 = vmatpush3.bf16.msra.mxu1 %v9646_v34  ;;  %v5805_v34 = vld [vmem:[%s12399_s18 + $0x1d8] sm:$0xff] }
 0xa9f   : > { %v9650_v30 = vpack.c.bf16 %v5743_v11, %v5738_v60  ;;  %v5807_v11 = vld [vmem:[%s12399_s18 + $0x1e8] sm:$0xff]  ;;  %v5809_v60 = vld [vmem:[%s12399_s18 + $0x1f8] sm:$0xff] }
 0xaa1   : > { %9651 = vmatprep.subr.bf16.mxu1 %v9650_v30 }
 0xaa2   : > { %9653 = vmatpush3.bf16.msra.mxu1 %v9650_v30  ;;  %v5810_v30 = vld [vmem:[%s12399_s18 + $0x200] sm:$0xff] }
 0xaa5   : > { %9247 = vmatmul.mubr.msk.f32.vlgmr.msra.gmra.mrb[66].mxu1 %vm614_vm1, %v5747_v16  ;;  %v5811_v16 = vld [vmem:[%s12399_s18 + $0x208] sm:$0xff] }
 0xaa6   : > { %9249 = vmatprep.mubr.msk.f32.mxu1 %vm614_vm1, %v5748_v38  ;;  %v5812_v38 = vld [vmem:[%s12399_s18 + $0x210] sm:$0xff] }
 0xaa9   : > { %9250 = vmatmul.mubr.msk.f32.gmra.mrb[68].mxu1 %vm614_vm1, %v5749_v63  ;;  %v5813_v63 = vld [vmem:[%s12399_s18 + $0x218] sm:$0xff] }
 0xaaa   : > { %9252 = vmatprep.mubr.msk.f32.mxu1 %vm614_vm1, %v5750_v17  ;;  %v5814_v17 = vld [vmem:[%s12399_s18 + $0x220] sm:$0xff] }
 0xaad   : > { %9253 = vmatmul.mubr.msk.f32.gmra.mrb[70].mxu1 %vm614_vm1, %v5751_v5  ;;  %v5815_v5 = vld [vmem:[%s12399_s18 + $0x228] sm:$0xff] }
 0xaae   : > { %9255 = vmatprep.mubr.msk.f32.mxu1 %vm614_vm1, %v5752_v40  ;;  %v5816_v40 = vld [vmem:[%s12399_s18 + $0x230] sm:$0xff] }
 0xab1   : > { %9256 = vmatmul.mubr.msk.f32.gmra.mrb[72].mxu1 %vm614_vm1, %v5753_v31  ;;  %v5817_v31 = vld [vmem:[%s12399_s18 + $0x238] sm:$0xff] }
 0xab2   : > { %9258 = vmatprep.mubr.msk.f32.mxu1 %vm614_vm1, %v5754_v53  ;;  %v5818_v53 = vld [vmem:[%s12399_s18 + $0x240] sm:$0xff] }
 0xab5   : > { %9259 = vmatmul.mubr.msk.f32.gmra.mrb[74].mxu1 %vm614_vm1, %v5755_v32  ;;  %v5819_v32 = vld [vmem:[%s12399_s18 + $0x248] sm:$0xff] }
 0xab6   : > { %9261 = vmatprep.mubr.msk.f32.mxu1 %vm614_vm1, %v5756_v25  ;;  %v5820_v25 = vld [vmem:[%s12399_s18 + $0x250] sm:$0xff] }
 0xab9   : > { %9262 = vmatmul.mubr.msk.f32.gmra.mrb[76].mxu1 %vm614_vm1, %v5757_v19  ;;  %v5821_v19 = vld [vmem:[%s12399_s18 + $0x258] sm:$0xff] }
 0xaba   : > { %9264 = vmatprep.mubr.msk.f32.mxu1 %vm614_vm1, %v5758_v42  ;;  %v5822_v42 = vld [vmem:[%s12399_s18 + $0x260] sm:$0xff] }
 0xabd   : > { %9265 = vmatmul.mubr.msk.f32.gmra.mrb[78].mxu1 %vm614_vm1, %v5759_v1  ;;  %v5823_v1 = vld [vmem:[%s12399_s18 + $0x268] sm:$0xff] }
 0xabe   : > { %9267 = vmatprep.mubr.msk.f32.mxu1 %vm614_vm1, %v5760_v46  ;;  %v5824_v46 = vld [vmem:[%s12399_s18 + $0x270] sm:$0xff] }
 0xac1   : > { %9268 = vmatmul.mubr.msk.f32.gmra.mrb[80].mxu1 %vm614_vm1, %v5761_v58  ;;  %v5825_v58 = vld [vmem:[%s12399_s18 + $0x278] sm:$0xff] }
 0xac2   : > { %9270 = vmatprep.mubr.msk.f32.mxu1 %vm614_vm1, %v5762_v28  ;;  %v5826_v28 = vld [vmem:[%s12399_s18 + $0x280] sm:$0xff] }
 0xac5   : > { %9271 = vmatmul.mubr.msk.f32.gmra.mrb[82].mxu1 %vm614_vm1, %v5763_v62  ;;  %v5827_v62 = vld [vmem:[%s12399_s18 + $0x288] sm:$0xff] }
 0xac6   : > { %9273 = vmatprep.mubr.msk.f32.mxu1 %vm614_vm1, %v5764_v44  ;;  %v5828_v44 = vld [vmem:[%s12399_s18 + $0x290] sm:$0xff] }
 0xac9   : > { %9274 = vmatmul.mubr.msk.f32.gmra.mrb[84].mxu1 %vm614_vm1, %v5765_v54  ;;  %v5829_v54 = vld [vmem:[%s12399_s18 + $0x298] sm:$0xff] }
 0xaca   : > { %9276 = vmatprep.mubr.msk.f32.mxu1 %vm614_vm1, %v5766_v13  ;;  %v5830_v13 = vld [vmem:[%s12399_s18 + $0x2a0] sm:$0xff] }
 0xacd   : > { %9277 = vmatmul.mubr.msk.f32.gmra.mrb[86].mxu1 %vm614_vm1, %v5767_v55  ;;  %v5831_v55 = vld [vmem:[%s12399_s18 + $0x2a8] sm:$0xff] }
 0xace   : > { %9279 = vmatprep.mubr.msk.f32.mxu1 %vm614_vm1, %v5768_v21  ;;  %v5832_v21 = vld [vmem:[%s12399_s18 + $0x2b0] sm:$0xff] }
 0xad1   : > { %9280 = vmatmul.mubr.msk.f32.gmra.mrb[88].mxu1 %vm614_vm1, %v5769_v27  ;;  %v5833_v27 = vld [vmem:[%s12399_s18 + $0x2b8] sm:$0xff] }
 0xad2   : > { %9282 = vmatprep.mubr.msk.f32.mxu1 %vm614_vm1, %v5770_v26  ;;  %v5834_v26 = vld [vmem:[%s12399_s18 + $0x2c0] sm:$0xff] }
 0xad5   : > { %9283 = vmatmul.mubr.msk.f32.gmra.mrb[90].mxu1 %vm614_vm1, %v5771_v47  ;;  %v5835_v47 = vld [vmem:[%s12399_s18 + $0x2c8] sm:$0xff] }
 0xad6   : > { %9285 = vmatprep.mubr.msk.f32.mxu1 %vm614_vm1, %v5772_v0  ;;  %v5836_v0 = vld [vmem:[%s12399_s18 + $0x2d0] sm:$0xff] }
 0xad9   : > { %9286 = vmatmul.mubr.msk.f32.gmra.mrb[92].mxu1 %vm614_vm1, %v5773_v56  ;;  %v5837_v56 = vld [vmem:[%s12399_s18 + $0x2d8] sm:$0xff] }
 0xada   : > { %9288 = vmatprep.mubr.msk.f32.mxu1 %vm614_vm1, %v5774_v43  ;;  %v5838_v43 = vld [vmem:[%s12399_s18 + $0x2e0] sm:$0xff] }
 0xadd   : > { %9289 = vmatmul.mubr.msk.f32.gmra.mrb[94].mxu1 %vm614_vm1, %v5775_v39  ;;  %v5839_v39 = vld [vmem:[%s12399_s18 + $0x2e8] sm:$0xff] }
 0xade   : > { %9291 = vmatprep.mubr.msk.f32.mxu1 %vm614_vm1, %v5776_v35  ;;  %v5840_v35 = vld [vmem:[%s12399_s18 + $0x2f0] sm:$0xff] }
 0xae1   : > { %9292 = vmatmul.mubr.msk.f32.gmra.mrb[96].mxu1 %vm614_vm1, %v5777_v33  ;;  %v5841_v33 = vld [vmem:[%s12399_s18 + $0x2f8] sm:$0xff] }
 0xae2   : > { %9294 = vmatprep.mubr.msk.f32.mxu1 %vm614_vm1, %v5778_v59  ;;  %v5842_v59 = vld [vmem:[%s12399_s18 + $0x300] sm:$0xff] }
 0xae5   : > { %9295 = vmatmul.mubr.msk.f32.gmra.mrb[98].mxu1 %vm614_vm1, %v5779_v57  ;;  %v5843_v57 = vld [vmem:[%s12399_s18 + $0x308] sm:$0xff] }
 0xae6   : > { %9297 = vmatprep.mubr.msk.f32.mxu1 %vm614_vm1, %v5780_v2  ;;  %v5844_v2 = vld [vmem:[%s12399_s18 + $0x310] sm:$0xff] }
 0xae9   : > { %9298 = vmatmul.mubr.msk.f32.gmra.mrb[100].mxu1 %vm614_vm1, %v5781_v24  ;;  %v5845_v24 = vld [vmem:[%s12399_s18 + $0x318] sm:$0xff] }
 0xaea   : > { %9300 = vmatprep.mubr.msk.f32.mxu1 %vm614_vm1, %v5782_v41  ;;  %v5846_v41 = vld [vmem:[%s12399_s18 + $0x320] sm:$0xff] }
 0xaed   : > { %9301 = vmatmul.mubr.msk.f32.gmra.mrb[102].mxu1 %vm614_vm1, %v5783_v49  ;;  %v5847_v49 = vld [vmem:[%s12399_s18 + $0x328] sm:$0xff] }
 0xaee   : > { %9303 = vmatprep.mubr.msk.f32.mxu1 %vm614_vm1, %v5784_v61  ;;  %v5848_v61 = vld [vmem:[%s12399_s18 + $0x330] sm:$0xff] }
 0xaf1   : > { %9304 = vmatmul.mubr.msk.f32.gmra.mrb[104].mxu1 %vm614_vm1, %v5785_v18  ;;  %v5849_v18 = vld [vmem:[%s12399_s18 + $0x338] sm:$0xff] }
 0xaf2   : > { %9306 = vmatprep.mubr.msk.f32.mxu1 %vm614_vm1, %v5786_v6  ;;  %v5850_v6 = vld [vmem:[%s12399_s18 + $0x340] sm:$0xff] }
 0xaf5   : > { %9307 = vmatmul.mubr.msk.f32.gmra.mrb[106].mxu1 %vm614_vm1, %v5787_v10  ;;  %v5851_v10 = vld [vmem:[%s12399_s18 + $0x348] sm:$0xff] }
 0xaf6   : > { %9309 = vmatprep.mubr.msk.f32.mxu1 %vm614_vm1, %v5788_v50  ;;  %v5852_v50 = vld [vmem:[%s12399_s18 + $0x350] sm:$0xff] }
 0xaf9   : > { %9310 = vmatmul.mubr.msk.f32.gmra.mrb[108].mxu1 %vm614_vm1, %v5789_v51  ;;  %v5853_v51 = vld [vmem:[%s12399_s18 + $0x358] sm:$0xff] }
 0xafa   : > { %9312 = vmatprep.mubr.msk.f32.mxu1 %vm614_vm1, %v5790_v8  ;;  %v5854_v8 = vld [vmem:[%s12399_s18 + $0x360] sm:$0xff] }
 0xafd   : > { %9313 = vmatmul.mubr.msk.f32.gmra.mrb[110].mxu1 %vm614_vm1, %v5791_v20 }
 0xafe   : > { %9315 = vmatprep.mubr.msk.f32.mxu1 %vm614_vm1, %v5792_v9 }
 0xb01   : > { %9316 = vmatmul.mubr.msk.f32.gmra.mrb[112].mxu1 %vm614_vm1, %v5793_v4  ;;  %v5855_v4 = vld [vmem:[%s12399_s18 + $0x368] sm:$0xff] }
 0xb02   : > { %9318 = vmatprep.mubr.msk.f32.mxu1 %vm614_vm1, %v5794_v48  ;;  %v5856_v48 = vld [vmem:[%s12399_s18 + $0x370] sm:$0xff] }
 0xb05   : > { %9319 = vmatmul.mubr.msk.f32.gmra.mrb[114].mxu1 %vm614_vm1, %v5795_v23 }
 0xb06   : > { %9321 = vmatprep.mubr.msk.f32.mxu1 %vm614_vm1, %v5796_v12 }
 0xb09   : > { %9322 = vmatmul.mubr.msk.f32.gmra.mrb[116].mxu1 %vm614_vm1, %v5797_v15  ;;  %v5857_v15 = vld [vmem:[%s12399_s18 + $0x378] sm:$0xff] }
 0xb0a   : > { %9324 = vmatprep.mubr.msk.f32.mxu1 %vm614_vm1, %v5798_v37  ;;  %v5858_v37 = vld [vmem:[%s12399_s18 + $0x380] sm:$0xff] }
 0xb0d   : > { %9325 = vmatmul.mubr.msk.f32.gmra.mrb[118].mxu1 %vm614_vm1, %v5799_v7 }
 0xb0e   : > { %9327 = vmatprep.mubr.msk.f32.mxu1 %vm614_vm1, %v5800_v45 }
 0xb11   : > { %9328 = vmatmul.mubr.msk.f32.gmra.mrb[120].mxu1 %vm614_vm1, %v5801_v3  ;;  %v5859_v3 = vld [vmem:[%s12399_s18 + $0x388] sm:$0xff] }
 0xb12   : > { %9330 = vmatprep.mubr.msk.f32.mxu1 %vm614_vm1, %v5802_v29  ;;  %v5860_v29 = vld [vmem:[%s12399_s18 + $0x390] sm:$0xff] }
 0xb15   : > { %9331 = vmatmul.mubr.msk.f32.gmra.mrb[122].mxu1 %vm614_vm1, %v5803_v52 }
 0xb16   : > { %9333 = vmatprep.mubr.msk.f32.mxu1 %vm614_vm1, %v5804_v14 }
 0xb19   : > { %9334 = vmatmul.mubr.msk.f32.gmra.mrb[124].mxu1 %vm614_vm1, %v5805_v34  ;;  %v5861_v34 = vld [vmem:[%s12399_s18 + $0x398] sm:$0xff] }
 0xb1a   : > { %9336 = vmatprep.mubr.msk.f32.mxu1 %vm614_vm1, %v5806_v22  ;;  %v5862_v22 = vld [vmem:[%s12399_s18 + $0x3a0] sm:$0xff] }
 0xb1d   : > { %9337 = vmatmul.mubr.msk.f32.gmra.mrb[126].mxu1 %vm614_vm1, %v5807_v11 }
 0xb1e   : > { %9339 = vmatprep.mubr.msk.f32.mxu1 %vm614_vm1, %v5808_v36 }
 0xb21   : > { %9340 = vmatmul.mubr.msk.f32.gmra.mrb[128].mxu1 %vm614_vm1, %v5809_v60  ;;  %v5863_v60 = vld [vmem:[%s12399_s18 + $0x3a8] sm:$0xff] }
 0xb22   : > { %9342 = vmatprep.mubr.msk.f32.mxu1 %vm614_vm1, %v5810_v30  ;;  %v5864_v30 = vld [vmem:[%s12399_s18 + $0x3b0] sm:$0xff] }
 0xb25   : > { %9343 = vmatmul.mubr.msk.f32.gmra.mrb[130].mxu1 %vm614_vm1, %v5811_v16 }
 0xb26   : > { %9345 = vmatprep.mubr.msk.f32.mxu1 %vm614_vm1, %v5812_v38 }
 0xb29   : > { %9346 = vmatmul.mubr.msk.f32.gmra.mrb[132].mxu1 %vm614_vm1, %v5813_v63  ;;  %v5865_v63 = vld [vmem:[%s12399_s18 + $0x3b8] sm:$0xff] }
 0xb2a   : > { %9348 = vmatprep.mubr.msk.f32.mxu1 %vm614_vm1, %v5814_v17  ;;  %v5866_v17 = vld [vmem:[%s12399_s18 + $0x3c0] sm:$0xff] }
 0xb2d   : > { %9349 = vmatmul.mubr.msk.f32.gmra.mrb[134].mxu1 %vm614_vm1, %v5815_v5 }
 0xb2e   : > { %9351 = vmatprep.mubr.msk.f32.mxu1 %vm614_vm1, %v5816_v40 }
 0xb31   : > { %9352 = vmatmul.mubr.msk.f32.gmra.mrb[136].mxu1 %vm614_vm1, %v5817_v31  ;;  %v5867_v31 = vld [vmem:[%s12399_s18 + $0x3c8] sm:$0xff] }
 0xb32   : > { %9354 = vmatprep.mubr.msk.f32.mxu1 %vm614_vm1, %v5818_v53  ;;  %v5868_v53 = vld [vmem:[%s12399_s18 + $0x3d0] sm:$0xff] }
 0xb35   : > { %9355 = vmatmul.mubr.msk.f32.gmra.mrb[138].mxu1 %vm614_vm1, %v5819_v32 }
 0xb36   : > { %9357 = vmatprep.mubr.msk.f32.mxu1 %vm614_vm1, %v5820_v25 }
 0xb39   : > { %9358 = vmatmul.mubr.msk.f32.gmra.mrb[140].mxu1 %vm614_vm1, %v5821_v19  ;;  %v5869_v19 = vld [vmem:[%s12399_s18 + $0x3d8] sm:$0xff] }
 0xb3a   : > { %9360 = vmatprep.mubr.msk.f32.mxu1 %vm614_vm1, %v5822_v42  ;;  %v5870_v42 = vld [vmem:[%s12399_s18 + $0x3e0] sm:$0xff] }
 0xb3d   : > { %9361 = vmatmul.mubr.msk.f32.gmra.mrb[142].mxu1 %vm614_vm1, %v5823_v1 }
 0xb3e   : > { %9363 = vmatprep.mubr.msk.f32.mxu1 %vm614_vm1, %v5824_v46 }
 0xb41   : > { %9364 = vmatmul.mubr.msk.f32.gmra.mrb[144].mxu1 %vm614_vm1, %v5825_v58  ;;  %v5871_v58 = vld [vmem:[%s12399_s18 + $0x3e8] sm:$0xff] }
 0xb42   : > { %9366 = vmatprep.mubr.msk.f32.mxu1 %vm614_vm1, %v5826_v28  ;;  %v5872_v28 = vld [vmem:[%s12399_s18 + $0x3f0] sm:$0xff] }
 0xb45   : > { %9367 = vmatmul.mubr.msk.f32.gmra.mrb[146].mxu1 %vm614_vm1, %v5827_v62 }
 0xb46   : > { %9369 = vmatprep.mubr.msk.f32.mxu1 %vm614_vm1, %v5828_v44 }
 0xb49   : > { %9370 = vmatmul.mubr.msk.f32.gmra.mrb[148].mxu1 %vm614_vm1, %v5829_v54  ;;  %v5873_v54 = vld [vmem:[%s12399_s18 + $0x3f8] sm:$0xff] }
 0xb4a   : > { %9372 = vmatprep.mubr.msk.f32.mxu1 %vm614_vm1, %v5830_v13 }
 0xb4d   : > { %9373 = vmatmul.mubr.msk.f32.gmra.mrb[150].mxu1 %vm614_vm1, %v5831_v55 }
 0xb4e   : > { %9375 = vmatprep.mubr.msk.f32.mxu1 %vm614_vm1, %v5832_v21 }
 0xb51   : > { %9376 = vmatmul.mubr.msk.f32.gmra.mrb[152].mxu1 %vm614_vm1, %v5833_v27 }
 0xb52   : > { %9378 = vmatprep.mubr.msk.f32.mxu1 %vm614_vm1, %v5834_v26 }
 0xb55   : > { %9379 = vmatmul.mubr.msk.f32.gmra.mrb[154].mxu1 %vm614_vm1, %v5835_v47 }
 0xb56   : > { %9381 = vmatprep.mubr.msk.f32.mxu1 %vm614_vm1, %v5836_v0 }
 0xb59   : > { %9382 = vmatmul.mubr.msk.f32.gmra.mrb[156].mxu1 %vm614_vm1, %v5837_v56 }
 0xb5a   : > { %9384 = vmatprep.mubr.msk.f32.mxu1 %vm614_vm1, %v5838_v43 }
 0xb5d   : > { %9385 = vmatmul.mubr.msk.f32.gmra.mrb[158].mxu1 %vm614_vm1, %v5839_v39 }
 0xb5e   : > { %9387 = vmatprep.mubr.msk.f32.mxu1 %vm614_vm1, %v5840_v35 }
 0xb61   : > { %9388 = vmatmul.mubr.msk.f32.gmra.mrb[160].mxu1 %vm614_vm1, %v5841_v33 }
 0xb62   : > { %9390 = vmatprep.mubr.msk.f32.mxu1 %vm614_vm1, %v5842_v59 }
 0xb65   : > { %9391 = vmatmul.mubr.msk.f32.gmra.mrb[162].mxu1 %vm614_vm1, %v5843_v57 }
 0xb66   : > { %9393 = vmatprep.mubr.msk.f32.mxu1 %vm614_vm1, %v5844_v2 }
 0xb69   : > { %9394 = vmatmul.mubr.msk.f32.gmra.mrb[164].mxu1 %vm614_vm1, %v5845_v24 }
 0xb6a   : > { %9396 = vmatprep.mubr.msk.f32.mxu1 %vm614_vm1, %v5846_v41 }
 0xb6d   : > { %9397 = vmatmul.mubr.msk.f32.gmra.mrb[166].mxu1 %vm614_vm1, %v5847_v49 }
 0xb6e   : > { %9399 = vmatprep.mubr.msk.f32.mxu1 %vm614_vm1, %v5848_v61 }
 0xb71   : > { %9400 = vmatmul.mubr.msk.f32.gmra.mrb[168].mxu1 %vm614_vm1, %v5849_v18 }
 0xb72   : > { %9402 = vmatprep.mubr.msk.f32.mxu1 %vm614_vm1, %v5850_v6 }
 0xb75   : > { %9403 = vmatmul.mubr.msk.f32.gmra.mrb[170].mxu1 %vm614_vm1, %v5851_v10 }
 0xb76   : > { %9405 = vmatprep.mubr.msk.f32.mxu1 %vm614_vm1, %v5852_v50 }
 0xb78   : > { %v9248_v20 = vpop.f32.mrb[66].mxu1 }
 0xb79   : > { %6964 = vst [vmem:[%s12163_s20 + $0x8] sm:$0xff] %v9248_v20  ;;  %v6324_v9 = vpop.f32.mrb[67].mxu1  ;;  %9406 = vmatmul.mubr.msk.f32.gmra.mrb[172].mxu1 %vm614_vm1, %v5853_v51 }
 0xb7a   : > { %6963 = vst [vmem:[%s12163_s20] sm:$0xff] %v6324_v9  ;;  %9408 = vmatprep.mubr.msk.f32.mxu1 %vm614_vm1, %v5854_v8 }
 0xb7c   : > { %v9251_v23 = vpop.f32.mrb[68].mxu1 }
 0xb7d   : > { %6966 = vst [vmem:[%s12163_s20 + $0x18] sm:$0xff] %v9251_v23  ;;  %v6334_v12 = vpop.f32.mrb[69].mxu1  ;;  %9409 = vmatmul.mubr.msk.f32.gmra.mrb[174].mxu1 %vm614_vm1, %v5855_v4 }
 0xb7e   : > { %6965 = vst [vmem:[%s12163_s20 + $0x10] sm:$0xff] %v6334_v12  ;;  %9411 = vmatprep.mubr.msk.f32.mxu1 %vm614_vm1, %v5856_v48 }
 0xb80   : > { %v9254_v7 = vpop.f32.mrb[70].mxu1 }
 0xb81   : > { %6968 = vst [vmem:[%s12163_s20 + $0x28] sm:$0xff] %v9254_v7  ;;  %v6344_v45 = vpop.f32.mrb[71].mxu1  ;;  %9412 = vmatmul.mubr.msk.f32.gmra.mrb[176].mxu1 %vm614_vm1, %v5857_v15 }
 0xb82   : > { %6967 = vst [vmem:[%s12163_s20 + $0x20] sm:$0xff] %v6344_v45  ;;  %9414 = vmatprep.mubr.msk.f32.mxu1 %vm614_vm1, %v5858_v37 }
 0xb84   : > { %v9257_v52 = vpop.f32.mrb[72].mxu1 }
 0xb85   : > { %6970 = vst [vmem:[%s12163_s20 + $0x38] sm:$0xff] %v9257_v52  ;;  %v6354_v14 = vpop.f32.mrb[73].mxu1  ;;  %9415 = vmatmul.mubr.msk.f32.gmra.mrb[178].mxu1 %vm614_vm1, %v5859_v3 }
 0xb86   : > { %6969 = vst [vmem:[%s12163_s20 + $0x30] sm:$0xff] %v6354_v14  ;;  %9417 = vmatprep.mubr.msk.f32.mxu1 %vm614_vm1, %v5860_v29 }
 0xb88   : > { %v9260_v11 = vpop.f32.mrb[74].mxu1 }
 0xb89   : > { %6972 = vst [vmem:[%s12163_s20 + $0x48] sm:$0xff] %v9260_v11  ;;  %v6364_v36 = vpop.f32.mrb[75].mxu1  ;;  %9418 = vmatmul.mubr.msk.f32.gmra.mrb[180].mxu1 %vm614_vm1, %v5861_v34 }
 0xb8a   : > { %6971 = vst [vmem:[%s12163_s20 + $0x40] sm:$0xff] %v6364_v36  ;;  %9420 = vmatprep.mubr.msk.f32.mxu1 %vm614_vm1, %v5862_v22 }
 0xb8c   : > { %v9263_v16 = vpop.f32.mrb[76].mxu1 }
 0xb8d   : > { %6974 = vst [vmem:[%s12163_s20 + $0x58] sm:$0xff] %v9263_v16  ;;  %v6374_v38 = vpop.f32.mrb[77].mxu1  ;;  %9421 = vmatmul.mubr.msk.f32.gmra.mrb[182].mxu1 %vm614_vm1, %v5863_v60 }
 0xb8e   : > { %6973 = vst [vmem:[%s12163_s20 + $0x50] sm:$0xff] %v6374_v38  ;;  %9423 = vmatprep.mubr.msk.f32.mxu1 %vm614_vm1, %v5864_v30 }
 0xb90   : > { %v9266_v5 = vpop.f32.mrb[78].mxu1 }
 0xb91   : > { %6976 = vst [vmem:[%s12163_s20 + $0x68] sm:$0xff] %v9266_v5  ;;  %v6384_v40 = vpop.f32.mrb[79].mxu1  ;;  %9424 = vmatmul.mubr.msk.f32.gmra.mrb[184].mxu1 %vm614_vm1, %v5865_v63 }
 0xb92   : > { %6975 = vst [vmem:[%s12163_s20 + $0x60] sm:$0xff] %v6384_v40  ;;  %9426 = vmatprep.mubr.msk.f32.mxu1 %vm614_vm1, %v5866_v17 }
 0xb94   : > { %v9269_v32 = vpop.f32.mrb[80].mxu1 }
 0xb95   : > { %6978 = vst [vmem:[%s12163_s20 + $0x78] sm:$0xff] %v9269_v32  ;;  %v6394_v25 = vpop.f32.mrb[81].mxu1  ;;  %9427 = vmatmul.mubr.msk.f32.gmra.mrb[186].mxu1 %vm614_vm1, %v5867_v31 }
 0xb96   : > { %6977 = vst [vmem:[%s12163_s20 + $0x70] sm:$0xff] %v6394_v25  ;;  %9429 = vmatprep.mubr.msk.f32.mxu1 %vm614_vm1, %v5868_v53 }
 0xb98   : > { %v9272_v1 = vpop.f32.mrb[82].mxu1 }
 0xb99   : > { %6980 = vst [vmem:[%s12163_s20 + $0x88] sm:$0xff] %v9272_v1  ;;  %v6404_v46 = vpop.f32.mrb[83].mxu1  ;;  %9430 = vmatmul.mubr.msk.f32.gmra.mrb[188].mxu1 %vm614_vm1, %v5869_v19 }
 0xb9a   : > { %6979 = vst [vmem:[%s12163_s20 + $0x80] sm:$0xff] %v6404_v46  ;;  %9432 = vmatprep.mubr.msk.f32.mxu1 %vm614_vm1, %v5870_v42 }
 0xb9c   : > { %v9275_v62 = vpop.f32.mrb[84].mxu1 }
 0xb9d   : > { %6982 = vst [vmem:[%s12163_s20 + $0x98] sm:$0xff] %v9275_v62  ;;  %v6414_v44 = vpop.f32.mrb[85].mxu1  ;;  %9433 = vmatmul.mubr.msk.f32.gmra.mrb[190].mxu1 %vm614_vm1, %v5871_v58 }
 0xb9e   : > { %6981 = vst [vmem:[%s12163_s20 + $0x90] sm:$0xff] %v6414_v44  ;;  %9435 = vmatprep.mubr.msk.f32.mxu1 %vm614_vm1, %v5872_v28 }
 0xba0   : > { %v9278_v13 = vpop.f32.mrb[86].mxu1 }
 0xba1   : > { %6984 = vst [vmem:[%s12163_s20 + $0xa8] sm:$0xff] %v9278_v13  ;;  %v6424_v55 = vpop.f32.mrb[87].mxu1  ;;  %9436 = vmatmul.mubr.msk.f32.gmra.mrb[192].mxu1 %vm614_vm1, %v5873_v54 }
 0xba2   : > { %6983 = vst [vmem:[%s12163_s20 + $0xa0] sm:$0xff] %v6424_v55 }
 0xba4   : > { %v9281_v21 = vpop.f32.mrb[88].mxu1 }
 0xba5   : > { %6986 = vst [vmem:[%s12163_s20 + $0xb8] sm:$0xff] %v9281_v21  ;;  %v6434_v27 = vpop.f32.mrb[89].mxu1 }
 0xba6   : > { %6985 = vst [vmem:[%s12163_s20 + $0xb0] sm:$0xff] %v6434_v27 }
 0xba8   : > { %v9284_v26 = vpop.f32.mrb[90].mxu1 }
 0xba9   : > { %6988 = vst [vmem:[%s12163_s20 + $0xc8] sm:$0xff] %v9284_v26  ;;  %v6444_v47 = vpop.f32.mrb[91].mxu1 }
 0xbaa   : > { %6987 = vst [vmem:[%s12163_s20 + $0xc0] sm:$0xff] %v6444_v47 }
 0xbac   : > { %v9287_v0 = vpop.f32.mrb[92].mxu1 }
 0xbad   : > { %6990 = vst [vmem:[%s12163_s20 + $0xd8] sm:$0xff] %v9287_v0  ;;  %v6454_v56 = vpop.f32.mrb[93].mxu1 }
 0xbae   : > { %6989 = vst [vmem:[%s12163_s20 + $0xd0] sm:$0xff] %v6454_v56 }
 0xbb0   : > { %v9290_v43 = vpop.f32.mrb[94].mxu1 }
 0xbb1   : > { %6992 = vst [vmem:[%s12163_s20 + $0xe8] sm:$0xff] %v9290_v43  ;;  %v6464_v39 = vpop.f32.mrb[95].mxu1 }
 0xbb2   : > { %6991 = vst [vmem:[%s12163_s20 + $0xe0] sm:$0xff] %v6464_v39 }
 0xbb4   : > { %v9293_v35 = vpop.f32.mrb[96].mxu1 }
 0xbb5   : > { %6994 = vst [vmem:[%s12163_s20 + $0xf8] sm:$0xff] %v9293_v35  ;;  %v6474_v33 = vpop.f32.mrb[97].mxu1 }
 0xbb6   : > { %6993 = vst [vmem:[%s12163_s20 + $0xf0] sm:$0xff] %v6474_v33 }
 0xbb8   : > { %v9296_v59 = vpop.f32.mrb[98].mxu1 }
 0xbb9   : > { %6996 = vst [vmem:[%s12163_s20 + $0x108] sm:$0xff] %v9296_v59  ;;  %v6484_v57 = vpop.f32.mrb[99].mxu1 }
 0xbba   : > { %6995 = vst [vmem:[%s12163_s20 + $0x100] sm:$0xff] %v6484_v57 }
 0xbbc   : > { %v9299_v2 = vpop.f32.mrb[100].mxu1 }
 0xbbd   : > { %6998 = vst [vmem:[%s12163_s20 + $0x118] sm:$0xff] %v9299_v2  ;;  %v6494_v24 = vpop.f32.mrb[101].mxu1 }
 0xbbe   : > { %6997 = vst [vmem:[%s12163_s20 + $0x110] sm:$0xff] %v6494_v24 }
 0xbc0   : > { %v9302_v41 = vpop.f32.mrb[102].mxu1 }
 0xbc1   : > { %7000 = vst [vmem:[%s12163_s20 + $0x128] sm:$0xff] %v9302_v41  ;;  %v6504_v49 = vpop.f32.mrb[103].mxu1 }
 0xbc2   : > { %6999 = vst [vmem:[%s12163_s20 + $0x120] sm:$0xff] %v6504_v49 }
 0xbc4   : > { %v9305_v61 = vpop.f32.mrb[104].mxu1 }
 0xbc5   : > { %7002 = vst [vmem:[%s12163_s20 + $0x138] sm:$0xff] %v9305_v61  ;;  %v6514_v18 = vpop.f32.mrb[105].mxu1 }
 0xbc6   : > { %7001 = vst [vmem:[%s12163_s20 + $0x130] sm:$0xff] %v6514_v18 }
 0xbc8   : > { %v9308_v6 = vpop.f32.mrb[106].mxu1 }
 0xbc9   : > { %7004 = vst [vmem:[%s12163_s20 + $0x148] sm:$0xff] %v9308_v6  ;;  %v6524_v10 = vpop.f32.mrb[107].mxu1 }
 0xbca   : > { %7003 = vst [vmem:[%s12163_s20 + $0x140] sm:$0xff] %v6524_v10 }
 0xbcc   : > { %v9311_v50 = vpop.f32.mrb[108].mxu1 }
 0xbcd   : > { %7006 = vst [vmem:[%s12163_s20 + $0x158] sm:$0xff] %v9311_v50  ;;  %v6534_v51 = vpop.f32.mrb[109].mxu1 }
 0xbce   : > { %7005 = vst [vmem:[%s12163_s20 + $0x150] sm:$0xff] %v6534_v51 }
 0xbd0   : > { %v9314_v8 = vpop.f32.mrb[110].mxu1 }
 0xbd1   : > { %7008 = vst [vmem:[%s12163_s20 + $0x168] sm:$0xff] %v9314_v8  ;;  %v6544_v20 = vpop.f32.mrb[111].mxu1 }
 0xbd2   : > { %7007 = vst [vmem:[%s12163_s20 + $0x160] sm:$0xff] %v6544_v20 }
 0xbd4   : > { %v9317_v9 = vpop.f32.mrb[112].mxu1 }
 0xbd5   : > { %7010 = vst [vmem:[%s12163_s20 + $0x178] sm:$0xff] %v9317_v9  ;;  %v6554_v4 = vpop.f32.mrb[113].mxu1 }
 0xbd6   : > { %7009 = vst [vmem:[%s12163_s20 + $0x170] sm:$0xff] %v6554_v4 }
 0xbd8   : > { %v9320_v48 = vpop.f32.mrb[114].mxu1 }
 0xbd9   : > { %7012 = vst [vmem:[%s12163_s20 + $0x188] sm:$0xff] %v9320_v48  ;;  %v6564_v23 = vpop.f32.mrb[115].mxu1 }
 0xbda   : > { %7011 = vst [vmem:[%s12163_s20 + $0x180] sm:$0xff] %v6564_v23 }
 0xbdc   : > { %v9323_v12 = vpop.f32.mrb[116].mxu1 }
 0xbdd   : > { %7014 = vst [vmem:[%s12163_s20 + $0x198] sm:$0xff] %v9323_v12  ;;  %v6574_v15 = vpop.f32.mrb[117].mxu1 }
 0xbde   : > { %7013 = vst [vmem:[%s12163_s20 + $0x190] sm:$0xff] %v6574_v15 }
 0xbe0   : > { %v9326_v37 = vpop.f32.mrb[118].mxu1 }
 0xbe1   : > { %7016 = vst [vmem:[%s12163_s20 + $0x1a8] sm:$0xff] %v9326_v37  ;;  %v6584_v7 = vpop.f32.mrb[119].mxu1 }
 0xbe2   : > { %7015 = vst [vmem:[%s12163_s20 + $0x1a0] sm:$0xff] %v6584_v7 }
 0xbe4   : > { %v9329_v45 = vpop.f32.mrb[120].mxu1 }
 0xbe5   : > { %7018 = vst [vmem:[%s12163_s20 + $0x1b8] sm:$0xff] %v9329_v45  ;;  %v6594_v3 = vpop.f32.mrb[121].mxu1 }
 0xbe6   : > { %7017 = vst [vmem:[%s12163_s20 + $0x1b0] sm:$0xff] %v6594_v3 }
 0xbe8   : > { %v9332_v29 = vpop.f32.mrb[122].mxu1 }
 0xbe9   : > { %7020 = vst [vmem:[%s12163_s20 + $0x1c8] sm:$0xff] %v9332_v29  ;;  %v6604_v52 = vpop.f32.mrb[123].mxu1 }
 0xbea   : > { %7019 = vst [vmem:[%s12163_s20 + $0x1c0] sm:$0xff] %v6604_v52 }
 0xbec   : > { %v9335_v14 = vpop.f32.mrb[124].mxu1 }
 0xbed   : > { %7022 = vst [vmem:[%s12163_s20 + $0x1d8] sm:$0xff] %v9335_v14  ;;  %v6614_v34 = vpop.f32.mrb[125].mxu1 }
 0xbee   : > { %7021 = vst [vmem:[%s12163_s20 + $0x1d0] sm:$0xff] %v6614_v34 }
 0xbf0   : > { %v9338_v22 = vpop.f32.mrb[126].mxu1 }
 0xbf1   : > { %7024 = vst [vmem:[%s12163_s20 + $0x1e8] sm:$0xff] %v9338_v22  ;;  %v6624_v11 = vpop.f32.mrb[127].mxu1 }
 0xbf2   : > { %7023 = vst [vmem:[%s12163_s20 + $0x1e0] sm:$0xff] %v6624_v11 }
 0xbf4   : > { %v9341_v36 = vpop.f32.mrb[128].mxu1 }
 0xbf5   : > { %7026 = vst [vmem:[%s12163_s20 + $0x1f8] sm:$0xff] %v9341_v36  ;;  %v6634_v60 = vpop.f32.mrb[129].mxu1 }
 0xbf6   : > { %7025 = vst [vmem:[%s12163_s20 + $0x1f0] sm:$0xff] %v6634_v60 }
 0xbf8   : > { %v9344_v30 = vpop.f32.mrb[130].mxu1 }
 0xbf9   : > { %7028 = vst [vmem:[%s12163_s20 + $0x208] sm:$0xff] %v9344_v30  ;;  %v6644_v16 = vpop.f32.mrb[131].mxu1 }
 0xbfa   : > { %7027 = vst [vmem:[%s12163_s20 + $0x200] sm:$0xff] %v6644_v16 }
 0xbfc   : > { %v9347_v38 = vpop.f32.mrb[132].mxu1 }
 0xbfd   : > { %7030 = vst [vmem:[%s12163_s20 + $0x218] sm:$0xff] %v9347_v38  ;;  %v6654_v63 = vpop.f32.mrb[133].mxu1 }
 0xbfe   : > { %7029 = vst [vmem:[%s12163_s20 + $0x210] sm:$0xff] %v6654_v63 }
 0xc00   : > { %v9350_v17 = vpop.f32.mrb[134].mxu1 }
 0xc01   : > { %7032 = vst [vmem:[%s12163_s20 + $0x228] sm:$0xff] %v9350_v17  ;;  %v6664_v5 = vpop.f32.mrb[135].mxu1 }
 0xc02   : > { %7031 = vst [vmem:[%s12163_s20 + $0x220] sm:$0xff] %v6664_v5 }
 0xc04   : > { %v9353_v40 = vpop.f32.mrb[136].mxu1 }
 0xc05   : > { %7034 = vst [vmem:[%s12163_s20 + $0x238] sm:$0xff] %v9353_v40  ;;  %v6674_v31 = vpop.f32.mrb[137].mxu1 }
 0xc06   : > { %7033 = vst [vmem:[%s12163_s20 + $0x230] sm:$0xff] %v6674_v31 }
 0xc08   : > { %v9356_v53 = vpop.f32.mrb[138].mxu1 }
 0xc09   : > { %7036 = vst [vmem:[%s12163_s20 + $0x248] sm:$0xff] %v9356_v53  ;;  %v6684_v32 = vpop.f32.mrb[139].mxu1 }
 0xc0a   : > { %7035 = vst [vmem:[%s12163_s20 + $0x240] sm:$0xff] %v6684_v32 }
 0xc0c   : > { %v9359_v25 = vpop.f32.mrb[140].mxu1 }
 0xc0d   : > { %7038 = vst [vmem:[%s12163_s20 + $0x258] sm:$0xff] %v9359_v25  ;;  %v6694_v19 = vpop.f32.mrb[141].mxu1 }
 0xc0e   : > { %7037 = vst [vmem:[%s12163_s20 + $0x250] sm:$0xff] %v6694_v19 }
 0xc10   : > { %v9362_v42 = vpop.f32.mrb[142].mxu1 }
 0xc11   : > { %7040 = vst [vmem:[%s12163_s20 + $0x268] sm:$0xff] %v9362_v42  ;;  %v6704_v1 = vpop.f32.mrb[143].mxu1 }
 0xc12   : > { %7039 = vst [vmem:[%s12163_s20 + $0x260] sm:$0xff] %v6704_v1 }
 0xc14   : > { %v9365_v46 = vpop.f32.mrb[144].mxu1 }
 0xc15   : > { %7042 = vst [vmem:[%s12163_s20 + $0x278] sm:$0xff] %v9365_v46  ;;  %v6714_v58 = vpop.f32.mrb[145].mxu1 }
 0xc16   : > { %7041 = vst [vmem:[%s12163_s20 + $0x270] sm:$0xff] %v6714_v58 }
 0xc18   : > { %v9368_v28 = vpop.f32.mrb[146].mxu1 }
 0xc19   : > { %7044 = vst [vmem:[%s12163_s20 + $0x288] sm:$0xff] %v9368_v28  ;;  %v6724_v62 = vpop.f32.mrb[147].mxu1 }
 0xc1a   : > { %7043 = vst [vmem:[%s12163_s20 + $0x280] sm:$0xff] %v6724_v62 }
 0xc1c   : > { %v9371_v44 = vpop.f32.mrb[148].mxu1 }
 0xc1d   : > { %7046 = vst [vmem:[%s12163_s20 + $0x298] sm:$0xff] %v9371_v44  ;;  %v6734_v54 = vpop.f32.mrb[149].mxu1 }
 0xc1e   : > { %7045 = vst [vmem:[%s12163_s20 + $0x290] sm:$0xff] %v6734_v54 }
 0xc20   : > { %v9374_v13 = vpop.f32.mrb[150].mxu1 }
 0xc21   : > { %7048 = vst [vmem:[%s12163_s20 + $0x2a8] sm:$0xff] %v9374_v13  ;;  %v6744_v55 = vpop.f32.mrb[151].mxu1 }
 0xc22   : > { %7047 = vst [vmem:[%s12163_s20 + $0x2a0] sm:$0xff] %v6744_v55 }
 0xc24   : > { %v9377_v21 = vpop.f32.mrb[152].mxu1 }
 0xc25   : > { %7050 = vst [vmem:[%s12163_s20 + $0x2b8] sm:$0xff] %v9377_v21  ;;  %v6754_v27 = vpop.f32.mrb[153].mxu1 }
 0xc26   : > { %7049 = vst [vmem:[%s12163_s20 + $0x2b0] sm:$0xff] %v6754_v27 }
 0xc28   : > { %v9380_v26 = vpop.f32.mrb[154].mxu1 }
 0xc29   : > { %7052 = vst [vmem:[%s12163_s20 + $0x2c8] sm:$0xff] %v9380_v26  ;;  %v6764_v47 = vpop.f32.mrb[155].mxu1 }
 0xc2a   : > { %7051 = vst [vmem:[%s12163_s20 + $0x2c0] sm:$0xff] %v6764_v47 }
 0xc2c   : > { %v9383_v0 = vpop.f32.mrb[156].mxu1 }
 0xc2d   : > { %7054 = vst [vmem:[%s12163_s20 + $0x2d8] sm:$0xff] %v9383_v0  ;;  %v6774_v56 = vpop.f32.mrb[157].mxu1 }
 0xc2e   : > { %7053 = vst [vmem:[%s12163_s20 + $0x2d0] sm:$0xff] %v6774_v56 }
 0xc30   : > { %v9386_v43 = vpop.f32.mrb[158].mxu1 }
 0xc31   : > { %7056 = vst [vmem:[%s12163_s20 + $0x2e8] sm:$0xff] %v9386_v43  ;;  %v6784_v39 = vpop.f32.mrb[159].mxu1 }
 0xc32   : > { %7055 = vst [vmem:[%s12163_s20 + $0x2e0] sm:$0xff] %v6784_v39 }
 0xc34   : > { %v9389_v35 = vpop.f32.mrb[160].mxu1 }
 0xc35   : > { %7058 = vst [vmem:[%s12163_s20 + $0x2f8] sm:$0xff] %v9389_v35  ;;  %v6794_v33 = vpop.f32.mrb[161].mxu1 }
 0xc36   : > { %7057 = vst [vmem:[%s12163_s20 + $0x2f0] sm:$0xff] %v6794_v33 }
 0xc38   : > { %v9392_v59 = vpop.f32.mrb[162].mxu1 }
 0xc39   : > { %7060 = vst [vmem:[%s12163_s20 + $0x308] sm:$0xff] %v9392_v59  ;;  %v6804_v57 = vpop.f32.mrb[163].mxu1 }
 0xc3a   : > { %7059 = vst [vmem:[%s12163_s20 + $0x300] sm:$0xff] %v6804_v57 }
 0xc3c   : > { %v9395_v2 = vpop.f32.mrb[164].mxu1 }
 0xc3d   : > { %7062 = vst [vmem:[%s12163_s20 + $0x318] sm:$0xff] %v9395_v2  ;;  %v6814_v24 = vpop.f32.mrb[165].mxu1 }
 0xc3e   : > { %7061 = vst [vmem:[%s12163_s20 + $0x310] sm:$0xff] %v6814_v24 }
 0xc40   : > { %v9398_v41 = vpop.f32.mrb[166].mxu1 }
 0xc41   : > { %7064 = vst [vmem:[%s12163_s20 + $0x328] sm:$0xff] %v9398_v41  ;;  %v6824_v49 = vpop.f32.mrb[167].mxu1 }
 0xc42   : > { %7063 = vst [vmem:[%s12163_s20 + $0x320] sm:$0xff] %v6824_v49 }
 0xc44   : > { %v9401_v61 = vpop.f32.mrb[168].mxu1 }
 0xc45   : > { %7066 = vst [vmem:[%s12163_s20 + $0x338] sm:$0xff] %v9401_v61  ;;  %v6834_v18 = vpop.f32.mrb[169].mxu1 }
 0xc46   : > { %7065 = vst [vmem:[%s12163_s20 + $0x330] sm:$0xff] %v6834_v18 }
 0xc48   : > { %v9404_v6 = vpop.f32.mrb[170].mxu1 }
 0xc49   : > { %7068 = vst [vmem:[%s12163_s20 + $0x348] sm:$0xff] %v9404_v6  ;;  %v6844_v10 = vpop.f32.mrb[171].mxu1 }
 0xc4a   : > { %7067 = vst [vmem:[%s12163_s20 + $0x340] sm:$0xff] %v6844_v10 }
 0xc4c   : > { %v9407_v50 = vpop.f32.mrb[172].mxu1 }
 0xc4d   : > { %7070 = vst [vmem:[%s12163_s20 + $0x358] sm:$0xff] %v9407_v50  ;;  %v6854_v51 = vpop.f32.mrb[173].mxu1 }
 0xc4e   : > { %7069 = vst [vmem:[%s12163_s20 + $0x350] sm:$0xff] %v6854_v51 }
 0xc50   : > { %v9410_v8 = vpop.f32.mrb[174].mxu1 }
 0xc51   : > { %7072 = vst [vmem:[%s12163_s20 + $0x368] sm:$0xff] %v9410_v8  ;;  %v6864_v20 = vpop.f32.mrb[175].mxu1 }
 0xc52   : > { %7071 = vst [vmem:[%s12163_s20 + $0x360] sm:$0xff] %v6864_v20 }
 0xc54   : > { %v9413_v9 = vpop.f32.mrb[176].mxu1 }
 0xc55   : > { %7074 = vst [vmem:[%s12163_s20 + $0x378] sm:$0xff] %v9413_v9  ;;  %v6874_v4 = vpop.f32.mrb[177].mxu1 }
 0xc56   : > { %7073 = vst [vmem:[%s12163_s20 + $0x370] sm:$0xff] %v6874_v4 }
 0xc58   : > { %v9416_v48 = vpop.f32.mrb[178].mxu1 }
 0xc59   : > { %7076 = vst [vmem:[%s12163_s20 + $0x388] sm:$0xff] %v9416_v48  ;;  %v6884_v23 = vpop.f32.mrb[179].mxu1 }
 0xc5a   : > { %7075 = vst [vmem:[%s12163_s20 + $0x380] sm:$0xff] %v6884_v23 }
 0xc5c   : > { %v9419_v12 = vpop.f32.mrb[180].mxu1 }
 0xc5d   : > { %7078 = vst [vmem:[%s12163_s20 + $0x398] sm:$0xff] %v9419_v12  ;;  %v6894_v15 = vpop.f32.mrb[181].mxu1 }
 0xc5e   : > { %7077 = vst [vmem:[%s12163_s20 + $0x390] sm:$0xff] %v6894_v15 }
 0xc60   : > { %v9422_v37 = vpop.f32.mrb[182].mxu1 }
 0xc61   : > { %7080 = vst [vmem:[%s12163_s20 + $0x3a8] sm:$0xff] %v9422_v37  ;;  %v6904_v7 = vpop.f32.mrb[183].mxu1 }
 0xc62   : > { %7079 = vst [vmem:[%s12163_s20 + $0x3a0] sm:$0xff] %v6904_v7 }
 0xc64   : > { %v9425_v45 = vpop.f32.mrb[184].mxu1 }
 0xc65   : > { %7082 = vst [vmem:[%s12163_s20 + $0x3b8] sm:$0xff] %v9425_v45  ;;  %v6914_v3 = vpop.f32.mrb[185].mxu1 }
 0xc66   : > { %7081 = vst [vmem:[%s12163_s20 + $0x3b0] sm:$0xff] %v6914_v3 }
 0xc68   : > { %v9428_v29 = vpop.f32.mrb[186].mxu1 }
 0xc69   : > { %7084 = vst [vmem:[%s12163_s20 + $0x3c8] sm:$0xff] %v9428_v29  ;;  %v6924_v52 = vpop.f32.mrb[187].mxu1 }
 0xc6a   : > { %7083 = vst [vmem:[%s12163_s20 + $0x3c0] sm:$0xff] %v6924_v52 }
 0xc6c   : > { %v9431_v14 = vpop.f32.mrb[188].mxu1 }
 0xc6d   : > { %7086 = vst [vmem:[%s12163_s20 + $0x3d8] sm:$0xff] %v9431_v14  ;;  %v6934_v34 = vpop.f32.mrb[189].mxu1 }
 0xc6e   : > { %7085 = vst [vmem:[%s12163_s20 + $0x3d0] sm:$0xff] %v6934_v34 }
 0xc70   : > { %v9434_v22 = vpop.f32.mrb[190].mxu1 }
 0xc71   : > { %7088 = vst [vmem:[%s12163_s20 + $0x3e8] sm:$0xff] %v9434_v22  ;;  %v6944_v11 = vpop.f32.mrb[191].mxu1 }
 0xc72   : > { %7087 = vst [vmem:[%s12163_s20 + $0x3e0] sm:$0xff] %v6944_v11 }
 0xc74   : > { %v9437_v36 = vpop.f32.mrb[192].mxu1 }
 0xc75   : > { %7090 = vst [vmem:[%s12163_s20 + $0x3f8] sm:$0xff] %v9437_v36  ;;  %v6954_v60 = vpop.f32.mrb[193].mxu1 }
 0xc76   : > { %7089 = vst [vmem:[%s12163_s20 + $0x3f0] sm:$0xff] %v6954_v60 }
 0xc77 PF: > { %s29_s0 = sadd.s32 1, %s10019_s0  }
 0xc78   : > { %p26_p4 = scmp.ge.s32.totalorder %s29_s0, 4  }
 0xc7a   :  { %28 = sbr.rel (!%p26_p4) target bundleno = 5 (0x5), region = 149 }

</bundles_post_ra>
